<compile_context>
chip_gen: v7x
topology: tpu7x:2x2x1
jax: 0.10.0
libtpu: 0.0.40
codegen_flags: <defaults>
</compile_context>

<pallas_src>
import functools

import jax
import jax.numpy as jnp
from jax.experimental import pallas as pl
from jax.experimental.pallas import tpu as pltpu

ENC_DIMS = [256, 128, 128, 128]
DEC_DIMS = [128, 128, 128, 256]
N_ENC = len(ENC_DIMS) - 1  # 3 linear layers
N_DEC = len(DEC_DIMS) - 1  # 3 linear layers

MAX_TB = 512       # big tiles amortize ~0.35us/step overhead (~85% of HBM roofline at 512)
W_SLAB_ROWS = 768  # 256 + 128 + 128 + 128 + 128
B_SLAB_COLS = 896  # 128 * 5 + 256
B_SLAB_ROWS = 8    # one f32 sublane tile; bias is broadcast in-kernel (not coupled to TB)


def _round_up(x, m):
    return ((x + m - 1) // m) * m


def _choose_tb(batch):
    """Batch tile: as large as possible (cap 512), multiple of 8, >=2 grid steps when possible
    so dimension_semantics=("parallel",) actually splits work across v7x's two TensorCores."""
    if batch <= 16:
        return max(8, _round_up(batch, 8))
    return min(MAX_TB, _round_up(pl.cdiv(batch, 2), 8))


def _default_compute_dtype():
    """bf16 epilogue on chips with bf16 VPU/EUP (v6e/v7x); f32 elsewhere (v5e and older)."""
    kind = jax.devices()[0].device_kind.lower()
    if "v6" in kind or "v7" in kind:
        return "bfloat16"
    return "float32"


def mlp_kernel(x_ref, w_ref, wlast_ref, b_ref, mid_ref, back_ref, *, compute_dtype):
    """x_ref:(TB,256) f32 | w_ref:(768,128) bf16 | wlast_ref:(128,256) bf16 |
    b_ref:(8,896) f32 (row 0 = packed biases) | mid_ref:(TB,128) f32 | back_ref:(TB,256) f32."""
    cdt = compute_dtype

    def layer(h_bf16, w_bf16, b_col, n_out, apply_tanh):
        # MXU matmul, f32 accumulate; epilogue (bias add + optional tanh) in `cdt`.
        y = jnp.dot(h_bf16, w_bf16, preferred_element_type=jnp.float32)
        b = b_ref[0:1, b_col:b_col + n_out].astype(cdt)   # sublane broadcast, near-free on VPU
        y = y.astype(cdt) + b
        if apply_tanh:
            y = jnp.tanh(y)
        return y

    h = x_ref[...].astype(jnp.bfloat16)                           # (TB, 256)

    # ---- encoder: 256 -> 128 -> 128 -> 128 (no tanh after last linear)
    h = layer(h, w_ref[0:256, :], 0, 128, True)
    h = layer(h.astype(jnp.bfloat16), w_ref[256:384, :], 128, 128, True)
    mid = layer(h.astype(jnp.bfloat16), w_ref[384:512, :], 256, 128, False)
    mid_ref[...] = mid.astype(mid_ref.dtype)

    # ---- decoder: 128 -> 128 -> 128 -> 256 (no tanh after last linear)
    h = layer(mid.astype(jnp.bfloat16), w_ref[512:640, :], 384, 128, True)
    h = layer(h.astype(jnp.bfloat16), w_ref[640:768, :], 512, 128, True)
    back = layer(h.astype(jnp.bfloat16), wlast_ref[...], 640, 256, False)
    back_ref[...] = back.astype(back_ref.dtype)


def init_params(key):
    """PyTorch-Linear-style init: U(-1/sqrt(fan_in), 1/sqrt(fan_in)). Returns [(W, b), ...]
    with W stored as (in_features, out_features) so y = x @ W + b (== PyTorch x @ W.T + b)."""
    params = []
    idx = 0
    for dims in (ENC_DIMS, DEC_DIMS):
        for i in range(len(dims) - 1):
            fan_in, fan_out = dims[i], dims[i + 1]
            kw = jax.random.fold_in(key, 2 * idx)
            kb = jax.random.fold_in(key, 2 * idx + 1)
            bound = 1.0 / (fan_in ** 0.5)
            w = jax.random.uniform(kw, (fan_in, fan_out), jnp.float32, -bound, bound)
            b = jax.random.uniform(kb, (fan_out,), jnp.float32, -bound, bound)
            params.append((w, b))
            idx += 1
    return params


def pack_params(params):
    """Two bf16 weight slabs + one small f32 bias slab (independent of the batch tile)."""
    ws = [w for (w, _) in params]
    bs = [b for (_, b) in params]
    w_slab = jnp.concatenate(ws[:-1], axis=0).astype(jnp.bfloat16)       # (768, 128)
    w_last = ws[-1].astype(jnp.bfloat16)                                 # (128, 256)
    b_row = jnp.concatenate(bs, axis=0).astype(jnp.float32)              # (896,)
    b_slab = jnp.tile(b_row[None, :], (B_SLAB_ROWS, 1))                  # (8, 896)
    assert w_slab.shape == (W_SLAB_ROWS, 128)
    assert w_last.shape == (128, 256)
    assert b_slab.shape == (B_SLAB_ROWS, B_SLAB_COLS)
    return w_slab, w_last, b_slab


@functools.partial(jax.jit, static_argnames=("compute_dtype",))
def _mlp_forward(desc, w_slab, w_last, b_slab, *, compute_dtype):
    B = desc.shape[0]
    tb = _choose_tb(B)
    n_blocks = pl.cdiv(B, tb)
    cdt = jnp.dtype(compute_dtype)

    kernel = functools.partial(mlp_kernel, compute_dtype=cdt)
    mid, back = pl.pallas_call(
        kernel,
        out_shape=(
            jax.ShapeDtypeStruct((B, ENC_DIMS[-1]), jnp.float32),        # desc_mlp
            jax.ShapeDtypeStruct((B, DEC_DIMS[-1]), jnp.float32),        # desc_back
        ),
        grid_spec=pltpu.PrefetchScalarGridSpec(
            num_scalar_prefetch=0,
            grid=(n_blocks,),
            in_specs=[
                pl.BlockSpec((tb, 256), lambda i: (i, 0)),               # activations: tiled
                # Constant index_maps -> weight/bias blocks stay VMEM-resident across steps.
                pl.BlockSpec((W_SLAB_ROWS, 128), lambda i: (0, 0)),
                pl.BlockSpec((128, 256), lambda i: (0, 0)),
                pl.BlockSpec((B_SLAB_ROWS, B_SLAB_COLS), lambda i: (0, 0)),
            ],
            out_specs=(
                pl.BlockSpec((tb, ENC_DIMS[-1]), lambda i: (i, 0)),
                pl.BlockSpec((tb, DEC_DIMS[-1]), lambda i: (i, 0)),
            ),
        ),
        compiler_params=pltpu.CompilerParams(
            dimension_semantics=("parallel",),             # v7x: 2 TCs split the batch grid
            vmem_limit_bytes=32 * 1024 * 1024,             # TB=512 f32 activations fit on v5e
        ),
    )(desc, w_slab, w_last, b_slab)
    return mid, back


def mlp_module_128_short(desc, w_slab, w_last, b_slab, compute_dtype=None):
    if compute_dtype is None:
        compute_dtype = _default_compute_dtype()
    return _mlp_forward(desc, w_slab, w_last, b_slab, compute_dtype=compute_dtype)


def reference_forward(desc, params, compute_dtype):
    """Pure-JAX reference mirroring the kernel numerics (bf16 dot operands, f32 accumulate,
    epilogue in `compute_dtype`)."""
    cdt = jnp.dtype(compute_dtype)

    def chain(h, ps):
        n = len(ps)
        for i, (w, b) in enumerate(ps):
            y = jnp.dot(h.astype(jnp.bfloat16), w.astype(jnp.bfloat16),
                        preferred_element_type=jnp.float32)
            y = y.astype(cdt) + b.astype(cdt)
            if i < n - 1:
                y = jnp.tanh(y)
            h = y
        return h

    mid = chain(desc.astype(jnp.float32), params[:N_ENC])
    back = chain(mid, params[N_ENC:])
    return mid.astype(jnp.float32), back.astype(jnp.float32)


if __name__ == "__main__":
    key = jax.random.PRNGKey(0)
    # B divisible by the 512-row tile -> 2 grid steps (both v7x TensorCores busy, no padding).
    B = 1024
    desc = jax.random.normal(jax.random.fold_in(key, 1000), (B, 256), jnp.float32)

    params = init_params(key)
    w_slab, w_last, b_slab = pack_params(params)
    compute_dtype = _default_compute_dtype()

    desc_mlp, desc_back = mlp_module_128_short(desc, w_slab, w_last, b_slab, compute_dtype)
    jax.block_until_ready((desc_mlp, desc_back))

    ref_mid, ref_back = reference_forward(desc, params, compute_dtype)
    assert desc_mlp.shape == (B, 128) and desc_back.shape == (B, 256)
    assert jnp.allclose(desc_mlp, ref_mid, atol=1e-2, rtol=1e-2)
    assert jnp.allclose(desc_back, ref_back, atol=1e-2, rtol=1e-2)

    print("KERNEL_OK")
</pallas_src>

<mosaic_0001>
module attributes {stable_mosaic.version = 11 : i64} {
  func.func @mlp_kernel(%arg0: i32, %arg1: memref<512x256xf32, #tpu.memory_space<vmem>>, %arg2: memref<768x128xbf16, #tpu.memory_space<vmem>>, %arg3: memref<128x256xbf16, #tpu.memory_space<vmem>>, %arg4: memref<8x896xf32, #tpu.memory_space<vmem>>, %arg5: memref<512x128xf32, #tpu.memory_space<vmem>>, %arg6: memref<512x256xf32, #tpu.memory_space<vmem>>) attributes {dimension_semantics = [#tpu.dimension_semantics<parallel>], iteration_bounds = array<i64: 2>, scalar_prefetch = 0 : i64, scratch_operands = 0 : i64, tpu.core_type = #tpu.core_type<tc>, window_params = [{transform_indices = @transform_0, window_bounds = array<i64: 512, 256>}, {pipeline_mode = #tpu.pipeline_mode<synchronous>, transform_indices = @transform_1, window_bounds = array<i64: 768, 128>}, {pipeline_mode = #tpu.pipeline_mode<synchronous>, transform_indices = @transform_2, window_bounds = array<i64: 128, 256>}, {pipeline_mode = #tpu.pipeline_mode<synchronous>, transform_indices = @transform_3, window_bounds = array<i64: 8, 896>}, {transform_indices = @transform_4, window_bounds = array<i64: 512, 128>}, {transform_indices = @transform_5, window_bounds = array<i64: 512, 256>}]} {
    %c0 = arith.constant 0 : index
    %c0_0 = arith.constant 0 : index
    %0 = vector.load %arg1[%c0, %c0_0] : memref<512x256xf32, #tpu.memory_space<vmem>>, vector<512x256xf32>
    %1 = arith.truncf %0 : vector<512x256xf32> to vector<512x256xbf16>
    %c0_1 = arith.constant 0 : index
    %c0_2 = arith.constant 0 : index
    %2 = vector.load %arg2[%c0_1, %c0_2] : memref<768x128xbf16, #tpu.memory_space<vmem>>, vector<256x128xbf16>
    %cst = arith.constant dense<0.000000e+00> : vector<512x128xf32>
    %3 = tpu.matmul %1, %2, %cst {dimension_numbers = #tpu.dot_dimension_numbers<[1], [0], [0], [1], [0, 0, 1, 1], [], []>} : vector<512x256xbf16>, vector<256x128xbf16>, vector<512x128xf32> -> vector<512x128xf32>
    %c0_3 = arith.constant 0 : index
    %c0_4 = arith.constant 0 : index
    %4 = vector.load %arg4[%c0_3, %c0_4] : memref<8x896xf32, #tpu.memory_space<vmem>>, vector<1x128xf32>
    %5 = vector.broadcast %4 : vector<1x128xf32> to vector<512x128xf32>
    %6 = arith.addf %3, %5 : vector<512x128xf32>
    %7 = math.tanh %6 : vector<512x128xf32>
    %8 = arith.truncf %7 : vector<512x128xf32> to vector<512x128xbf16>
    %c256 = arith.constant 256 : index
    %c0_5 = arith.constant 0 : index
    %9 = vector.load %arg2[%c256, %c0_5] : memref<768x128xbf16, #tpu.memory_space<vmem>>, vector<128x128xbf16>
    %cst_6 = arith.constant dense<0.000000e+00> : vector<512x128xf32>
    %10 = tpu.matmul %8, %9, %cst_6 {dimension_numbers = #tpu.dot_dimension_numbers<[1], [0], [0], [1], [0, 0, 1, 1], [], []>} : vector<512x128xbf16>, vector<128x128xbf16>, vector<512x128xf32> -> vector<512x128xf32>
    %c0_7 = arith.constant 0 : index
    %c128 = arith.constant 128 : index
    %11 = vector.load %arg4[%c0_7, %c128] : memref<8x896xf32, #tpu.memory_space<vmem>>, vector<1x128xf32>
    %12 = vector.broadcast %11 : vector<1x128xf32> to vector<512x128xf32>
    %13 = arith.addf %10, %12 : vector<512x128xf32>
    %14 = math.tanh %13 : vector<512x128xf32>
    %15 = arith.truncf %14 : vector<512x128xf32> to vector<512x128xbf16>
    %c384 = arith.constant 384 : index
    %c0_8 = arith.constant 0 : index
    %16 = vector.load %arg2[%c384, %c0_8] : memref<768x128xbf16, #tpu.memory_space<vmem>>, vector<128x128xbf16>
    %cst_9 = arith.constant dense<0.000000e+00> : vector<512x128xf32>
    %17 = tpu.matmul %15, %16, %cst_9 {dimension_numbers = #tpu.dot_dimension_numbers<[1], [0], [0], [1], [0, 0, 1, 1], [], []>} : vector<512x128xbf16>, vector<128x128xbf16>, vector<512x128xf32> -> vector<512x128xf32>
    %c0_10 = arith.constant 0 : index
    %c256_11 = arith.constant 256 : index
    %18 = vector.load %arg4[%c0_10, %c256_11] : memref<8x896xf32, #tpu.memory_space<vmem>>, vector<1x128xf32>
    %19 = vector.broadcast %18 : vector<1x128xf32> to vector<512x128xf32>
    %20 = arith.addf %17, %19 : vector<512x128xf32>
    %c0_12 = arith.constant 0 : index
    %c0_13 = arith.constant 0 : index
    %21 = vector.load %arg5[%c0_12, %c0_13] : memref<512x128xf32, #tpu.memory_space<vmem>>, vector<512x128xf32>
    tpu.vector_store %arg5[%c0_12, %c0_13], %20 {strides = array<i32>} : memref<512x128xf32, #tpu.memory_space<vmem>>, vector<512x128xf32>,
    %22 = arith.truncf %20 : vector<512x128xf32> to vector<512x128xbf16>
    %c512 = arith.constant 512 : index
    %c0_14 = arith.constant 0 : index
    %23 = vector.load %arg2[%c512, %c0_14] : memref<768x128xbf16, #tpu.memory_space<vmem>>, vector<128x128xbf16>
    %cst_15 = arith.constant dense<0.000000e+00> : vector<512x128xf32>
    %24 = tpu.matmul %22, %23, %cst_15 {dimension_numbers = #tpu.dot_dimension_numbers<[1], [0], [0], [1], [0, 0, 1, 1], [], []>} : vector<512x128xbf16>, vector<128x128xbf16>, vector<512x128xf32> -> vector<512x128xf32>
    %c0_16 = arith.constant 0 : index
    %c384_17 = arith.constant 384 : index
    %25 = vector.load %arg4[%c0_16, %c384_17] : memref<8x896xf32, #tpu.memory_space<vmem>>, vector<1x128xf32>
    %26 = vector.broadcast %25 : vector<1x128xf32> to vector<512x128xf32>
    %27 = arith.addf %24, %26 : vector<512x128xf32>
    %28 = math.tanh %27 : vector<512x128xf32>
    %29 = arith.truncf %28 : vector<512x128xf32> to vector<512x128xbf16>
    %c640 = arith.constant 640 : index
    %c0_18 = arith.constant 0 : index
    %30 = vector.load %arg2[%c640, %c0_18] : memref<768x128xbf16, #tpu.memory_space<vmem>>, vector<128x128xbf16>
    %cst_19 = arith.constant dense<0.000000e+00> : vector<512x128xf32>
    %31 = tpu.matmul %29, %30, %cst_19 {dimension_numbers = #tpu.dot_dimension_numbers<[1], [0], [0], [1], [0, 0, 1, 1], [], []>} : vector<512x128xbf16>, vector<128x128xbf16>, vector<512x128xf32> -> vector<512x128xf32>
    %c0_20 = arith.constant 0 : index
    %c512_21 = arith.constant 512 : index
    %32 = vector.load %arg4[%c0_20, %c512_21] : memref<8x896xf32, #tpu.memory_space<vmem>>, vector<1x128xf32>
    %33 = vector.broadcast %32 : vector<1x128xf32> to vector<512x128xf32>
    %34 = arith.addf %31, %33 : vector<512x128xf32>
    %35 = math.tanh %34 : vector<512x128xf32>
    %36 = arith.truncf %35 : vector<512x128xf32> to vector<512x128xbf16>
    %c0_22 = arith.constant 0 : index
    %c0_23 = arith.constant 0 : index
    %37 = vector.load %arg3[%c0_22, %c0_23] : memref<128x256xbf16, #tpu.memory_space<vmem>>, vector<128x256xbf16>
    %cst_24 = arith.constant dense<0.000000e+00> : vector<512x256xf32>
    %38 = tpu.matmul %36, %37, %cst_24 {dimension_numbers = #tpu.dot_dimension_numbers<[1], [0], [0], [1], [0, 0, 1, 1], [], []>} : vector<512x128xbf16>, vector<128x256xbf16>, vector<512x256xf32> -> vector<512x256xf32>
    %c0_25 = arith.constant 0 : index
    %c640_26 = arith.constant 640 : index
    %39 = vector.load %arg4[%c0_25, %c640_26] : memref<8x896xf32, #tpu.memory_space<vmem>>, vector<1x256xf32>
    %40 = vector.broadcast %39 : vector<1x256xf32> to vector<512x256xf32>
    %41 = arith.addf %38, %40 : vector<512x256xf32>
    %c0_27 = arith.constant 0 : index
    %c0_28 = arith.constant 0 : index
    %42 = vector.load %arg6[%c0_27, %c0_28] : memref<512x256xf32, #tpu.memory_space<vmem>>, vector<512x256xf32>
    tpu.vector_store %arg6[%c0_27, %c0_28], %41 {strides = array<i32>} : memref<512x256xf32, #tpu.memory_space<vmem>>, vector<512x256xf32>,
    return
  }
  func.func @transform_0(%arg0: i32) -> (i32, i32) {
    %c0_i32 = arith.constant 0 : i32
    %c0_i32_0 = arith.constant 0 : i32
    return %arg0, %c0_i32 : i32, i32
  }
  func.func @transform_1(%arg0: i32) -> (i32, i32) {
    %c0_i32 = arith.constant 0 : i32
    %c0_i32_0 = arith.constant 0 : i32
    %c0_i32_1 = arith.constant 0 : i32
    return %c0_i32, %c0_i32_0 : i32, i32
  }
  func.func @transform_2(%arg0: i32) -> (i32, i32) {
    %c0_i32 = arith.constant 0 : i32
    %c0_i32_0 = arith.constant 0 : i32
    %c0_i32_1 = arith.constant 0 : i32
    return %c0_i32, %c0_i32_0 : i32, i32
  }
  func.func @transform_3(%arg0: i32) -> (i32, i32) {
    %c0_i32 = arith.constant 0 : i32
    %c0_i32_0 = arith.constant 0 : i32
    %c0_i32_1 = arith.constant 0 : i32
    return %c0_i32, %c0_i32_0 : i32, i32
  }
  func.func @transform_4(%arg0: i32) -> (i32, i32) {
    %c0_i32 = arith.constant 0 : i32
    %c0_i32_0 = arith.constant 0 : i32
    return %arg0, %c0_i32 : i32, i32
  }
  func.func @transform_5(%arg0: i32) -> (i32, i32) {
    %c0_i32 = arith.constant 0 : i32
    %c0_i32_0 = arith.constant 0 : i32
    return %arg0, %c0_i32 : i32, i32
  }
}

</mosaic_0001>

<bundles_post_ra>
// kernel: _mlp_forward.1
= control target key start
LH: loop header
LB: loop body
LE: loop exit
PB: predicated region body
PF: predicated region fallthrough
CT: control target
= control target key end

     0   :  { %11 = vsyncpa [#allocation3], 0  ;;  %s6250_s0 = inlined_call_operand.hbm [shape: f32[1024,256], index: 0, kind: input, shape index: {}]   ;;  %s6251_s1 = inlined_call_operand.hbm [shape: bf16[768,128], index: 1, kind: input, shape index: {}]   ;;  %s6252_s2 = inlined_call_operand.hbm [shape: bf16[128,256], index: 2, kind: input, shape index: {}]   ;;  %s6253_s3 = inlined_call_operand.hbm [shape: f32[8,896], index: 3, kind: input, shape index: {}]   ;;  %s6254_s4 = inlined_call_operand.hbm [shape: f32[1024,128], index: 4, kind: output, shape index: {0}]   ;;  %s6255_s5 = inlined_call_operand.hbm [shape: f32[1024,256], index: 5, kind: output, shape index: {1}]  }
   0x1   :  { %13 = vsyncpa [#allocation3 + $0x1], 0 }
   0x2   :  { %14 = vsyncpa [#allocation6], 0 }
   0x3   :  { %15 = vsyncpa [#allocation9], 0 }
   0x4   :  { %16 = vsyncpa [#allocation4], 0 }
   0x5   :  { %18 = vsyncpa [#allocation4 + $0x1], 0 }
   0x6   :  { %19 = vsyncpa [#allocation12], 0 }
   0x7   :  { %21 = vsyncpa [#allocation12 + $0x1], 0  ;;  %s5104_s18 = smov 0   ;;  %s5106_s19 = smov 0  }
   0x8   :  { %s5108_s20 = smov 0   ;;  %s5110_s21 = smov 0  }
   0x9 LB: > { %s5125_s22 = sadd.s32 4294967295, %s5055_s21   ;;  %s3567_s23 = sadd.s32 4294967294, %s5055_s21   ;;  %s5055_s21 = sphi %s5110_s21, %s6278_s21   ;;  %s5051_s20 = sphi %s5108_s20, %s6277_s20   ;;  %s5047_s19 = sphi %s5106_s19, %s6276_s19   ;;  %s5043_s18 = sphi %s5104_s18, %s6275_s18  }
   0xa   : > { %p47_p0 = scmp.ne.s32.totalorder %s5047_s19, %s5043_s18  ;;  %p6256_p1 = scmp.eq.s32.totalorder %s5125_s22, 0 }
   0xb   : > { %p140_p3 = scmp.eq.s32.totalorder %s3567_s23, 1  ;;  %p3568_p5 = scmp.ge.s32.totalorder %s5055_s21, 1 }
   0xc   : > { %p5134_p4 = por %p6256_p1, %p47_p0  ;;  %p173_p7 = scmp.lt.s32.totalorder %s5055_s21, 3 }
   0xd   : > { %p5139_p6 = por %p140_p3, %p47_p0  ;;  %s5057_s27 = smov [#allocation5]  }
   0xe   : > { %s6259_s24 = scalar_select %p5134_p4, 1, 0 }
   0xf   : > { %s6260_s25 = scalar_select %p5139_p6, 1, 0 }
  0x10   : > { %p5144_p8 = pnand %p3568_p5, %p173_p7  ;;  %s185_s28 = sshll.u32 %s5057_s27, 4  ;;  %s5148_s28 = int_to_ptr.vmem [resolvable:$true] %s185_s28 }
  0x11   : > { %s5058_s30 = smov [#allocation7]   ;;  %s4835_s9 = scalar_lea.hbm %s6251_s1, 6144 }
  0x12   : > { %s6261_s26 = scalar_select %p5144_p8, 1, 0 }
  0x13   : > { %p4176_p9 = pneg %p5144_p8  ;;  %s198_s6 = sshll.u32 %s5058_s30, 4  ;;  %s5159_s6 = int_to_ptr.vmem [resolvable:$true] %s198_s6 }
  0x14   : > { %p4836_p12 = scmp.ne.s32.totalorder %s6251_s1, %s4835_s9  ;;  %p4842_p5 = scmp.lt.u32.totalorder %s4835_s9, %s6251_s1 }
  0x15   : > { %p5155_p11 = pnand %p4176_p9, %p6256_p1 }
  0x17   : > { %p5169_p13 = pneg %p5155_p11 }
  0x19   : > { %p4838_p0 = pnand %p5169_p13, %p4836_p12 }
  0x1b   : > { %p4839_p3 = pneg %p4838_p0 }
  0x1d   : > { %p4844_p7 = pnand %p4842_p5, %p4839_p3 }
  0x1f   : > { %4847 = shalt.err (!%p4844_p7)
}
  0x20   : > { %s4848_s15 = scalar_lea.vmem %s5148_s28, 6144  ;;  %p4856_p2 = scmp.lt.s32.totalorder %s5148_s28, %s5148_s28 }
  0x21   : > { %p4849_p9 = scmp.ne.s32.totalorder %s5148_s28, %s4848_s15  ;;  %p4857_p6 = scmp.lt.s32.totalorder %s4848_s15, %s4848_s15 }
  0x23   : > { %p4851_p10 = pnand %p4849_p9, %p5169_p13  ;;  %p4858_p12 = por %p4857_p6, %p4856_p2 }
  0x25   : > { %p4852_p1 = pneg %p4851_p10 }
  0x27   : > { %p4859_p0 = pnand %p4858_p12, %p4852_p1 }
  0x29   : > { %4862 = shalt.err (!%p4859_p0)
}
  0x2a   : > { %s5059_s16 = smov 64   ;;  %s5060_s17 = smov 4  }
  0x2b   : > { %4179 = dma.hbm_to_vmem [thread:$0]  (!%p5155_p11), %s6251_s1, 6144, %s5148_s28, [#allocation6], %s5059_s16, %s5059_s16, %s5060_s17  }
  0x2c   : > { %s4863_s8 = scalar_lea.hbm %s6252_s2, 2048 }
  0x2d   : > { %p4864_p2 = scmp.ne.s32.totalorder %s6252_s2, %s4863_s8  ;;  %p4870_p10 = scmp.lt.u32.totalorder %s4863_s8, %s6252_s2 }
  0x2f   : > { %p4866_p1 = pnand %p4864_p2, %p5169_p13 }
  0x31   : > { %p4867_p6 = pneg %p4866_p1 }
  0x33   : > { %p4872_p3 = pnand %p4870_p10, %p4867_p6 }
  0x35   : > { %4875 = shalt.err (!%p4872_p3)
}
  0x36   : > { %s4876_s28 = scalar_lea.vmem %s5159_s6, 2048  ;;  %p4884_p12 = scmp.lt.s32.totalorder %s5159_s6, %s5159_s6 }
  0x37   : > { %p4877_p5 = scmp.ne.s32.totalorder %s5159_s6, %s4876_s28  ;;  %p4885_p0 = scmp.lt.s32.totalorder %s4876_s28, %s4876_s28 }
  0x39   : > { %p4879_p7 = pnand %p4877_p5, %p5169_p13  ;;  %p4886_p2 = por %p4885_p0, %p4884_p12 }
  0x3b   : > { %p4880_p9 = pneg %p4879_p7 }
  0x3d   : > { %p4887_p1 = pnand %p4886_p2, %p4880_p9 }
  0x3f   : > { %4890 = shalt.err (!%p4887_p1)
}
  0x40   : > { %s5061_s14 = smov 128   ;;  %s5062_s15 = smov 8  }
  0x41   : > { %4182 = dma.hbm_to_vmem [thread:$0]  (!%p5155_p11), %s6252_s2, 2048, %s5159_s6, [#allocation6], %s5061_s14, %s5061_s14, %s5062_s15  }
  0x42   : > { %s5063_s23 = smov [#allocation8]   ;;  %s5214_s30 = sadd.s32 1, %s5055_s21  }
  0x43   : > { %s212_s27 = sshll.u32 %s5063_s23, 4  ;;  %s4891_s9 = scalar_lea.hbm %s6253_s3, 896  ;;  %s213_s27 = int_to_ptr.vmem [resolvable:$true] %s212_s27 }
  0x44   : > { %p4892_p6 = scmp.ne.s32.totalorder %s6253_s3, %s4891_s9  ;;  %p4898_p5 = scmp.lt.u32.totalorder %s4891_s9, %s6253_s3 }
  0x46   : > { %p4894_p10 = pnand %p4892_p6, %p5169_p13 }
  0x48   : > { %p4895_p3 = pneg %p4894_p10 }
  0x4a   : > { %p4900_p7 = pnand %p4898_p5, %p4895_p3 }
  0x4c   : > { %4903 = shalt.err (!%p4900_p7)
}
  0x4d   : > { %s4904_s6 = scalar_lea.vmem %s213_s27, 896  ;;  %p4912_p2 = scmp.lt.s32.totalorder %s213_s27, %s213_s27 }
  0x4e   : > { %p4905_p9 = scmp.ne.s32.totalorder %s213_s27, %s4904_s6  ;;  %p4913_p1 = scmp.lt.s32.totalorder %s4904_s6, %s4904_s6 }
  0x50   : > { %p4907_p12 = pnand %p4905_p9, %p5169_p13  ;;  %p4914_p4 = por %p4913_p1, %p4912_p2 }
  0x52   : > { %p4908_p0 = pneg %p4907_p12 }
  0x54   : > { %p4915_p8 = pnand %p4914_p4, %p4908_p0 }
  0x56   : > { %4918 = shalt.err (!%p4915_p8)
}
  0x57   : > { %4185 = dma.hbm_to_vmem [thread:$0]  (!%p5155_p11), %s6253_s3, 896, %s213_s27, [#allocation9]  }
  0x58   : > { %s31_s12 = ssub.s32 %s5055_s21, %s5214_s30  ;;  %s34_s16 = sadd.s32 1, %s5051_s20 }
  0x59   : > { %p32_p4 = scmp.eq.s32.totalorder %s31_s12, 0  ;;  %p41_p8 = scmp.ne.s32.totalorder %s5051_s20, %s5047_s19 }
  0x5a   : > { %p42_p13 = scmp.eq.s32.totalorder %s5055_s21, 0  ;;  %p4200_p6 = scmp.lt.s32.totalorder %s5055_s21, 2 }
  0x5b   : > { %s5242_s29 = scalar_select %p32_p4, %s5051_s20, %s34_s16  }
  0x5c   : > { %p43_p10 = por %p42_p13, %p41_p8  ;;  %p6264_p3 = scmp.eq.s32.totalorder %s5125_s22, 1 }
  0x5d   : > { %s223_s23 = sand.u32 1, %s5051_s20   ;;  %s3658_s7 = sshll.u32 %s5055_s21, 14 }
  0x5e   : > { %p5246_p5 = por %p6264_p3, %p41_p8  ;;  %s3573_s8 = sshll.u32 %s223_s23, 10 }
  0x5f   : > { %s5255_s27 = scalar_lea.hbm %s6250_s0, %s3658_s7  ;;  %s227_s11 = scalar_lea.vmem [#allocation2], %s3573_s8 }
  0x60   : > { %s235_s13 = sshll.u32 %s227_s11, 4  ;;  %p5257_p11 = pnand %p4200_p6, %p43_p10  ;;  %s5261_s13 = int_to_ptr.vmem [resolvable:$true] %s235_s13 }
  0x61   : > { %s5263_s6 = scalar_lea.sflag [#allocation3], %s223_s23  ;;  %s4919_s14 = scalar_lea.hbm %s5255_s27, 16384 }
  0x62   : > { %p4920_p7 = scmp.ne.s32.totalorder %s5255_s27, %s4919_s14  ;;  %p4921_p9 = pneg %p5257_p11 }
  0x63   : > { %s4924_s16 = scalar_lea.hbm %s6250_s0, 32768  ;;  %p4925_p2 = scmp.lt.u32.totalorder %s5255_s27, %s6250_s0 }
  0x64   : > { %p4922_p12 = pnand %p4921_p9, %p4920_p7  ;;  %p4926_p1 = scmp.lt.u32.totalorder %s4924_s16, %s4919_s14 }
  0x65   : > { %p4928_p8 = scmp.lt.u32.totalorder %s4919_s14, %s5255_s27 }
  0x66   : > { %p4923_p0 = pneg %p4922_p12  ;;  %p4927_p4 = por %p4926_p1, %p4925_p2 }
  0x68   : > { %p4929_p13 = por %p4928_p8, %p4927_p4 }
  0x6a   : > { %p4930_p6 = pnand %p4929_p13, %p4923_p0 }
  0x6c   : > { %4933 = shalt.err (!%p4930_p6)
}
  0x6d   : > { %s4934_s23 = scalar_lea.vmem %s5261_s13, 16384  ;;  %s5064_s9 = smov [#allocation2]  }
  0x6e   : > { %p4935_p10 = scmp.ne.s32.totalorder %s5261_s13, %s4934_s23  ;;  %s4939_s10 = sshll.u32 %s5064_s9, 4  ;;  %s4940_s10 = int_to_ptr.vmem [resolvable:$false] %s4939_s10 }
  0x6f   : > { %s4941_s11 = scalar_lea.vmem %s4940_s10, 32768  ;;  %p4942_p12 = scmp.lt.s32.totalorder %s5261_s13, %s4940_s10 }
  0x70   : > { %p4937_p3 = pnand %p4935_p10, %p4921_p9  ;;  %p4943_p2 = scmp.lt.s32.totalorder %s4941_s11, %s4934_s23 }
  0x72   : > { %p4938_p7 = pneg %p4937_p3  ;;  %p4944_p1 = por %p4943_p2, %p4942_p12 }
  0x74   : > { %p4945_p4 = pnand %p4944_p1, %p4938_p7 }
  0x76   : > { %4948 = shalt.err (!%p4945_p4)
}
  0x77   : > { %s5065_s14 = smov 256   ;;  %s5066_s15 = smov 16  }
  0x78   : > { %4189 = dma.hbm_to_vmem [thread:$0]  (!%p5257_p11), %s5255_s27, 16384, %s5261_s13, %s5263_s6, %s5065_s14, %s5065_s14, %s5066_s15  }
  0x79   : > { %p6267_p9 = scmp.ne.s32.totalorder %s6261_s26, 0 }
  0x7a   : > { %s5294_s12 = sand.u32 (!%p6267_p9), 1, %s5047_s19   ;;  %p6268_p0 = scmp.ne.s32.totalorder (!%p6267_p9), %s6259_s24, 0 }
  0x7b   : > { %247 = sbr.rel (%p6267_p9) target bundleno = 1832 (0x728), region = 36  ;;  %s3578_s16 = sshll.u32 (!%p6267_p9), %s5294_s12, 10 }
  0x7c   : > { %s250_s7 = scalar_lea.sflag (!%p6267_p9), [#allocation3], %s5294_s12  ;;  %s5300_s8 = scalar_lea.vmem (!%p6267_p9), [#allocation2], %s3578_s16 }
  0x82   : > { %5022 = dma.done.wait (%p6268_p0), %s250_s7, 16384  }
  0x83   : > { %5024 = vsyncadd (%p6268_p0), %s250_s7, 4294950912  ;;  %p6269_p11 = scmp.eq.s32.totalorder %s5125_s22, 0 }
  0x85   : > { %5026 = dma.done.wait (%p6269_p11), [#allocation6], 8192   ;;  %p6270_p8 = pmov %p6269_p11 }
  0x87   : > { %5028 = vsyncadd (%p6270_p8), [#allocation6], 4294959104  ;;  %p6271_p13 = pmov %p6270_p8 }
  0x88   : > { %p6272_p6 = pmov %p6270_p8 }
  0x89   : > { %5030 = dma.done.wait (%p6271_p13), [#allocation9], 896  }
  0x8a   : > { %5032 = vsyncadd (%p6272_p6), [#allocation9], 4294966400  ;;  %v5067_v0 = vmov 0   ;;  %v4251_v1 = vld [vmem:[#allocation5] sm:$0xff]   ;;  %v4252_v2 = vld [vmem:[#allocation5 + $0x8] sm:$0xff]   ;;  %s3582_s24 = sshll.u32 %s5294_s12, 9 }
  0x8b   : > { %622 = vmatprep.subr.bf16.mxu0 %v5067_v0  ;;  %v4253_v3 = vld [vmem:[#allocation5 + $0x10] sm:$0xff]   ;;  %v4254_v4 = vld [vmem:[#allocation5 + $0x18] sm:$0xff]   ;;  %v4255_v5 = vld [vmem:[#allocation5 + $0x20] sm:$0xff]   ;;  %s5595_s26 = scalar_lea.vmem [#allocation10], %s3582_s24  ;;  %s5910_s27 = scalar_lea.vmem [#allocation11], %s3578_s16 }
  0x8c   : > { %623 = vmatpush1.bf16.msra.mxu0 %v4251_v1  ;;  %v302_v6 = vld [vmem:[%s5300_s8 + $0x8] sm:$0xff]  ;;  %v304_v7 = vld [vmem:[%s5300_s8 + $0x18] sm:$0xff]  ;;  %v4257_v10 = vld [vmem:[#allocation5 + $0x30] sm:$0xff]   ;;  %s3659_s13 = sshll.u32 %s5125_s22, 13  ;;  %s3416_s9 = sshll.u32 %s5595_s26, 4  ;;  %s6035_s9 = int_to_ptr.vmem [resolvable:$true] %s3416_s9 }
  0x8d   : > { %624 = vmatprep.subr.bf16.mxu0 %v5067_v0  ;;  %v430_v8 = vpack.c.bf16 %v304_v7, %v302_v6  ;;  %v4256_v9 = vld [vmem:[#allocation5 + $0x28] sm:$0xff]   ;;  %v4258_v11 = vld [vmem:[#allocation5 + $0x38] sm:$0xff]   ;;  %v4259_v12 = vld [vmem:[#allocation5 + $0x40] sm:$0xff]   ;;  %s6030_s23 = scalar_lea.hbm %s6254_s4, %s3659_s13  ;;  %s3398_s10 = scalar_lea.sflag [#allocation4], %s5294_s12 }
  0x8e   : > { %v4260_v13 = vld [vmem:[#allocation5 + $0x48] sm:$0xff]   ;;  %v4261_v14 = vld [vmem:[#allocation5 + $0x50] sm:$0xff]   ;;  %v4262_v15 = vld [vmem:[#allocation5 + $0x58] sm:$0xff]   ;;  %s4949_s11 = scalar_lea.vmem %s6035_s9, 8192  ;;  %s5068_s14 = smov [#allocation10]  }
  0x8f   : > { %654 = vmatprep.mubr.bf16.mxu0 %v430_v8  ;;  %v4263_v16 = vld [vmem:[#allocation5 + $0x60] sm:$0xff]   ;;  %v4264_v17 = vld [vmem:[#allocation5 + $0x68] sm:$0xff]   ;;  %v4265_v18 = vld [vmem:[#allocation5 + $0x70] sm:$0xff]   ;;  %p4950_p10 = scmp.ne.s32.totalorder %s6035_s9, %s4949_s11  ;;  %s4953_s15 = sshll.u32 %s5068_s14, 4  ;;  %s4954_s15 = int_to_ptr.vmem [resolvable:$false] %s4953_s15 }
  0x90   : > { %625 = vmatpush1.bf16.msra.mxu0 %v4252_v2  ;;  %v4266_v19 = vld [vmem:[#allocation5 + $0x78] sm:$0xff]   ;;  %v301_v20 = vld [vmem:[%s5300_s8] sm:$0xff]  ;;  %v303_v21 = vld [vmem:[%s5300_s8 + $0x10] sm:$0xff]  ;;  %s4955_s16 = scalar_lea.vmem %s4954_s15, 16384  ;;  %p4956_p12 = scmp.lt.s32.totalorder %s6035_s9, %s4954_s15 }
  0x91   : > { %626 = vmatprep.subr.bf16.mxu0 %v5067_v0  ;;  %v306_v22 = vld [vmem:[%s5300_s8 + $0x28] sm:$0xff]  ;;  %v308_v23 = vld [vmem:[%s5300_s8 + $0x38] sm:$0xff]  ;;  %v429_v24 = vpack.c.bf16 %v303_v21, %v301_v20  ;;  %v305_v26 = vld [vmem:[%s5300_s8 + $0x20] sm:$0xff]  ;;  %p4951_p3 = pnand %p4950_p10, %p5246_p5  ;;  %p4957_p2 = scmp.lt.s32.totalorder %s4955_s16, %s4949_s11 }
  0x92   : > { %v432_v25 = vpack.c.bf16 %v308_v23, %v306_v22  ;;  %v307_v27 = vld [vmem:[%s5300_s8 + $0x30] sm:$0xff]  ;;  %v310_v28 = vld [vmem:[%s5300_s8 + $0x48] sm:$0xff]  ;;  %v312_v29 = vld [vmem:[%s5300_s8 + $0x58] sm:$0xff] }
  0x93   : > { %v431_v30 = vpack.c.bf16 %v307_v27, %v305_v26  ;;  %v434_v31 = vpack.c.bf16 %v312_v29, %v310_v28  ;;  %v309_v32 = vld [vmem:[%s5300_s8 + $0x40] sm:$0xff]  ;;  %v311_v33 = vld [vmem:[%s5300_s8 + $0x50] sm:$0xff]  ;;  %v314_v34 = vld [vmem:[%s5300_s8 + $0x68] sm:$0xff]  ;;  %p4952_p7 = pneg %p4951_p3  ;;  %p4958_p1 = por %p4957_p2, %p4956_p12 }
  0x94   : > { %627 = vmatpush1.bf16.msra.mxu0 %v4253_v3  ;;  %v316_v35 = vld [vmem:[%s5300_s8 + $0x78] sm:$0xff]  ;;  %v433_v36 = vpack.c.bf16 %v311_v33, %v309_v32  ;;  %v313_v38 = vld [vmem:[%s5300_s8 + $0x60] sm:$0xff]  ;;  %v315_v39 = vld [vmem:[%s5300_s8 + $0x70] sm:$0xff] }
  0x95   : > { %628 = vmatprep.subr.bf16.mxu0 %v5067_v0  ;;  %v436_v37 = vpack.c.bf16 %v316_v35, %v314_v34  ;;  %v318_v40 = vld [vmem:[%s5300_s8 + $0x88] sm:$0xff]  ;;  %v320_v41 = vld [vmem:[%s5300_s8 + $0x98] sm:$0xff]  ;;  %v435_v42 = vpack.c.bf16 %v315_v39, %v313_v38  ;;  %v317_v44 = vld [vmem:[%s5300_s8 + $0x80] sm:$0xff]  ;;  %p4959_p4 = pnand %p4958_p1, %p4952_p7 }
  0x96   : > { %v438_v43 = vpack.c.bf16 %v320_v41, %v318_v40  ;;  %v319_v45 = vld [vmem:[%s5300_s8 + $0x90] sm:$0xff]  ;;  %v322_v46 = vld [vmem:[%s5300_s8 + $0xa8] sm:$0xff]  ;;  %v324_v47 = vld [vmem:[%s5300_s8 + $0xb8] sm:$0xff] }
  0x97   : > { %v437_v48 = vpack.c.bf16 %v319_v45, %v317_v44  ;;  %v440_v49 = vpack.c.bf16 %v324_v47, %v322_v46  ;;  %v321_v50 = vld [vmem:[%s5300_s8 + $0xa0] sm:$0xff]  ;;  %v323_v51 = vld [vmem:[%s5300_s8 + $0xb0] sm:$0xff]  ;;  %v326_v52 = vld [vmem:[%s5300_s8 + $0xc8] sm:$0xff] }
  0x98   : > { %629 = vmatpush1.bf16.msra.mxu0 %v4254_v4  ;;  %v328_v53 = vld [vmem:[%s5300_s8 + $0xd8] sm:$0xff]  ;;  %v439_v54 = vpack.c.bf16 %v323_v51, %v321_v50  ;;  %v325_v56 = vld [vmem:[%s5300_s8 + $0xc0] sm:$0xff]  ;;  %v327_v57 = vld [vmem:[%s5300_s8 + $0xd0] sm:$0xff] }
  0x99   : > { %630 = vmatprep.subr.bf16.mxu0 %v5067_v0  ;;  %v442_v55 = vpack.c.bf16 %v328_v53, %v326_v52  ;;  %v330_v58 = vld [vmem:[%s5300_s8 + $0xe8] sm:$0xff]  ;;  %v332_v59 = vld [vmem:[%s5300_s8 + $0xf8] sm:$0xff]  ;;  %v441_v60 = vpack.c.bf16 %v327_v57, %v325_v56  ;;  %v329_v62 = vld [vmem:[%s5300_s8 + $0xe0] sm:$0xff] }
  0x9a   : > { %v444_v61 = vpack.c.bf16 %v332_v59, %v330_v58  ;;  %v331_v63 = vld [vmem:[%s5300_s8 + $0xf0] sm:$0xff]  ;;  %v334_v1 = vld [vmem:[%s5300_s8 + $0x108] sm:$0xff]  ;;  %v336_v2 = vld [vmem:[%s5300_s8 + $0x118] sm:$0xff] }
  0x9b   : > { %v443_v3 = vpack.c.bf16 %v331_v63, %v329_v62  ;;  %v446_v4 = vpack.c.bf16 %v336_v2, %v334_v1  ;;  %v335_v6 = vld [vmem:[%s5300_s8 + $0x110] sm:$0xff]  ;;  %v338_v7 = vld [vmem:[%s5300_s8 + $0x128] sm:$0xff]  ;;  %v340_v8 = vld [vmem:[%s5300_s8 + $0x138] sm:$0xff] }
  0x9c   : > { %631 = vmatpush1.bf16.msra.mxu0 %v4255_v5  ;;  %v333_v5 = vld [vmem:[%s5300_s8 + $0x100] sm:$0xff]  ;;  %v346_v20 = vld [vmem:[%s5300_s8 + $0x168] sm:$0xff]  ;;  %v348_v21 = vld [vmem:[%s5300_s8 + $0x178] sm:$0xff] }
  0x9d   : > { %632 = vmatprep.subr.bf16.mxu0 %v5067_v0  ;;  %v452_v23 = vpack.c.bf16 %v348_v21, %v346_v20  ;;  %v347_v26 = vld [vmem:[%s5300_s8 + $0x170] sm:$0xff]  ;;  %v350_v27 = vld [vmem:[%s5300_s8 + $0x188] sm:$0xff]  ;;  %v352_v28 = vld [vmem:[%s5300_s8 + $0x198] sm:$0xff] }
  0x9e   : > { %v4269_v29 = vld [vmem:[#allocation5 + $0x90] sm:$0xff]   ;;  %v4270_v32 = vld [vmem:[#allocation5 + $0x98] sm:$0xff]   ;;  %v349_v33 = vld [vmem:[%s5300_s8 + $0x180] sm:$0xff] }
  0x9f   : > { %v351_v34 = vld [vmem:[%s5300_s8 + $0x190] sm:$0xff]  ;;  %v354_v35 = vld [vmem:[%s5300_s8 + $0x1a8] sm:$0xff]  ;;  %v353_v41 = vld [vmem:[%s5300_s8 + $0x1a0] sm:$0xff] }
  0xa0   : > { %633 = vmatpush1.bf16.msra.mxu0 %v4256_v9  ;;  %v445_v9 = vpack.c.bf16 %v335_v6, %v333_v5  ;;  %v453_v38 = vpack.c.bf16 %v351_v34, %v349_v33  ;;  %v4272_v40 = vld [vmem:[#allocation5 + $0xa8] sm:$0xff]   ;;  %v360_v44 = vld [vmem:[%s5300_s8 + $0x1d8] sm:$0xff]  ;;  %v4273_v45 = vld [vmem:[#allocation5 + $0xb0] sm:$0xff]  }
  0xa1   : > { %634 = vmatprep.subr.bf16.mxu0 %v5067_v0  ;;  %v359_v50 = vld [vmem:[%s5300_s8 + $0x1d0] sm:$0xff]  ;;  %v362_v51 = vld [vmem:[%s5300_s8 + $0x1e8] sm:$0xff]  ;;  %v364_v52 = vld [vmem:[%s5300_s8 + $0x1f8] sm:$0xff] }
  0xa2   : > { %v363_v56 = vld [vmem:[%s5300_s8 + $0x1f0] sm:$0xff]  ;;  %v366_v57 = vld [vmem:[%s5300_s8 + $0x208] sm:$0xff]  ;;  %v368_v58 = vld [vmem:[%s5300_s8 + $0x218] sm:$0xff] }
  0xa3   : > { %v367_v62 = vld [vmem:[%s5300_s8 + $0x210] sm:$0xff]  ;;  %v370_v63 = vld [vmem:[%s5300_s8 + $0x228] sm:$0xff]  ;;  %v372_v1 = vld [vmem:[%s5300_s8 + $0x238] sm:$0xff] }
  0xa4   : > { %635 = vmatpush1.bf16.msra.mxu0 %v4257_v10  ;;  %v448_v10 = vpack.c.bf16 %v340_v8, %v338_v7  ;;  %v371_v5 = vld [vmem:[%s5300_s8 + $0x230] sm:$0xff]  ;;  %v374_v6 = vld [vmem:[%s5300_s8 + $0x248] sm:$0xff]  ;;  %v376_v7 = vld [vmem:[%s5300_s8 + $0x258] sm:$0xff] }
  0xa5   : > { %636 = vmatprep.subr.bf16.mxu0 %v5067_v0  ;;  %v389_v34 = vld [vmem:[%s5300_s8 + $0x2c0] sm:$0xff] }
  0xa8   : > { %637 = vmatpush1.bf16.msra.mxu0 %v4258_v11  ;;  %v337_v11 = vld [vmem:[%s5300_s8 + $0x120] sm:$0xff] }
  0xa9   : > { %638 = vmatprep.subr.bf16.mxu0 %v5067_v0 }
  0xac   : > { %639 = vmatpush1.bf16.msra.mxu0 %v4259_v12  ;;  %v339_v12 = vld [vmem:[%s5300_s8 + $0x130] sm:$0xff] }
  0xad   : > { %640 = vmatprep.subr.bf16.mxu0 %v5067_v0 }
  0xb0   : > { %641 = vmatpush1.bf16.msra.mxu0 %v4260_v13  ;;  %v342_v13 = vld [vmem:[%s5300_s8 + $0x148] sm:$0xff] }
  0xb1   : > { %642 = vmatprep.subr.bf16.mxu0 %v5067_v0 }
  0xb4   : > { %643 = vmatpush1.bf16.msra.mxu0 %v4261_v14  ;;  %v344_v14 = vld [vmem:[%s5300_s8 + $0x158] sm:$0xff] }
  0xb5   : > { %644 = vmatprep.subr.bf16.mxu0 %v5067_v0 }
  0xb8   : > { %645 = vmatpush1.bf16.msra.mxu0 %v4262_v15  ;;  %v447_v15 = vpack.c.bf16 %v339_v12, %v337_v11  ;;  %v375_v11 = vld [vmem:[%s5300_s8 + $0x250] sm:$0xff]  ;;  %v378_v12 = vld [vmem:[%s5300_s8 + $0x268] sm:$0xff] }
  0xb9   : > { %646 = vmatprep.subr.bf16.mxu0 %v5067_v0 }
  0xbc   : > { %647 = vmatpush1.bf16.msra.mxu0 %v4263_v16  ;;  %v450_v16 = vpack.c.bf16 %v344_v14, %v342_v13  ;;  %v380_v13 = vld [vmem:[%s5300_s8 + $0x278] sm:$0xff] }
  0xbd   : > { %648 = vmatprep.subr.bf16.mxu0 %v5067_v0 }
  0xc0   : > { %649 = vmatpush1.bf16.msra.mxu0 %v4264_v17  ;;  %v4267_v17 = vld [vmem:[#allocation5 + $0x80] sm:$0xff]  }
  0xc1   : > { %650 = vmatprep.subr.bf16.mxu0 %v5067_v0  ;;  %3822 = vmatprep.subr.bf16.mxu1 %v4267_v17 }
  0xc2   : > { %3823 = vmatpush3.bf16.msra.mxu1 %v4267_v17  ;;  %v379_v17 = vld [vmem:[%s5300_s8 + $0x270] sm:$0xff] }
  0xc4   : > { %651 = vmatpush1.bf16.msra.mxu0 %v4265_v18  ;;  %v341_v18 = vld [vmem:[%s5300_s8 + $0x140] sm:$0xff] }
  0xc5   : > { %652 = vmatprep.subr.bf16.mxu0 %v5067_v0 }
  0xc8   : > { %653 = vmatpush1.bf16.msra.mxu0 %v4266_v19  ;;  %v343_v19 = vld [vmem:[%s5300_s8 + $0x150] sm:$0xff] }
  0xc9   : > { %v449_v22 = vpack.c.bf16 %v343_v19, %v341_v18  ;;  %v382_v18 = vld [vmem:[%s5300_s8 + $0x288] sm:$0xff]  ;;  %v384_v19 = vld [vmem:[%s5300_s8 + $0x298] sm:$0xff] }
  0xca   : > { %v470_v21 = vpack.c.bf16 %v384_v19, %v382_v18 }
  0xcb   : > { %655 = vmatmul.mubr.bf16.vlgmr.msra.gmra.mrb[0].mxu0 %v429_v24  ;;  %v4268_v24 = vld [vmem:[#allocation5 + $0x88] sm:$0xff]  }
  0xcc   : > { %662 = vmatprep.mubr.bf16.mxu0 %v432_v25  ;;  %v345_v25 = vld [vmem:[%s5300_s8 + $0x160] sm:$0xff]  ;;  %3824 = vmatprep.subr.bf16.mxu1 %v4268_v24 }
  0xcd   : > { %3825 = vmatpush3.bf16.msra.mxu1 %v4268_v24  ;;  %v386_v24 = vld [vmem:[%s5300_s8 + $0x2a8] sm:$0xff] }
  0xce   : > { %3826 = vmatprep.subr.bf16.mxu1 %v4269_v29 }
  0xd1   : > { %3827 = vmatpush3.bf16.msra.mxu1 %v4269_v29  ;;  %v387_v29 = vld [vmem:[%s5300_s8 + $0x2b0] sm:$0xff] }
  0xd2   : > { %3828 = vmatprep.subr.bf16.mxu1 %v4270_v32 }
  0xd3   : > { %663 = vmatmul.mubr.bf16.gmra.mrb[4].mxu0 %v431_v30  ;;  %v451_v30 = vpack.c.bf16 %v347_v26, %v345_v25  ;;  %v388_v25 = vld [vmem:[%s5300_s8 + $0x2b8] sm:$0xff] }
  0xd4   : > { %670 = vmatprep.mubr.bf16.mxu0 %v434_v31  ;;  %v454_v31 = vpack.c.bf16 %v352_v28, %v350_v27  ;;  %v472_v27 = vpack.c.bf16 %v388_v25, %v386_v24  ;;  %v385_v28 = vld [vmem:[%s5300_s8 + $0x2a0] sm:$0xff] }
  0xd5   : > { %3829 = vmatpush3.bf16.msra.mxu1 %v4270_v32  ;;  %v471_v32 = vpack.c.bf16 %v387_v29, %v385_v28  ;;  %v419_v28 = vld [vmem:[%s5300_s8 + $0x3b0] sm:$0xff] }
  0xdb   : > { %671 = vmatmul.mubr.bf16.gmra.mrb[8].mxu0 %v433_v36  ;;  %v356_v36 = vld [vmem:[%s5300_s8 + $0x1b8] sm:$0xff] }
  0xdc   : > { %678 = vmatprep.mubr.bf16.mxu0 %v436_v37  ;;  %v4271_v37 = vld [vmem:[#allocation5 + $0xa0] sm:$0xff]   ;;  %v456_v39 = vpack.c.bf16 %v356_v36, %v354_v35  ;;  %v391_v35 = vld [vmem:[%s5300_s8 + $0x2d0] sm:$0xff]  ;;  %v394_v36 = vld [vmem:[%s5300_s8 + $0x2e8] sm:$0xff] }
  0xdd   : > { %3830 = vmatprep.subr.bf16.mxu1 %v4271_v37 }
  0xde   : > { %3831 = vmatpush3.bf16.msra.mxu1 %v4271_v37  ;;  %v396_v37 = vld [vmem:[%s5300_s8 + $0x2f8] sm:$0xff] }
  0xdf   : > { %3832 = vmatprep.subr.bf16.mxu1 %v4272_v40 }
  0xe2   : > { %3833 = vmatpush3.bf16.msra.mxu1 %v4272_v40  ;;  %v393_v40 = vld [vmem:[%s5300_s8 + $0x2e0] sm:$0xff] }
  0xe3   : > { %679 = vmatmul.mubr.bf16.gmra.mrb[12].mxu0 %v435_v42  ;;  %v355_v42 = vld [vmem:[%s5300_s8 + $0x1b0] sm:$0xff]  ;;  %3834 = vmatprep.subr.bf16.mxu1 %v4273_v45 }
  0xe4   : > { %686 = vmatprep.mubr.bf16.mxu0 %v438_v43  ;;  %v358_v43 = vld [vmem:[%s5300_s8 + $0x1c8] sm:$0xff]  ;;  %v455_v46 = vpack.c.bf16 %v355_v42, %v353_v41  ;;  %v395_v41 = vld [vmem:[%s5300_s8 + $0x2f0] sm:$0xff] }
  0xe5   : > { %v458_v47 = vpack.c.bf16 %v360_v44, %v358_v43  ;;  %v398_v42 = vld [vmem:[%s5300_s8 + $0x308] sm:$0xff]  ;;  %v400_v43 = vld [vmem:[%s5300_s8 + $0x318] sm:$0xff]  ;;  %v475_v44 = vpack.c.bf16 %v395_v41, %v393_v40 }
  0xe6   : > { %3835 = vmatpush3.bf16.msra.mxu1 %v4273_v45  ;;  %v478_v45 = vpack.c.bf16 %v400_v43, %v398_v42  ;;  %v421_v42 = vld [vmem:[%s5300_s8 + $0x3c0] sm:$0xff]  ;;  %v423_v43 = vld [vmem:[%s5300_s8 + $0x3d0] sm:$0xff] }
  0xeb   : > { %687 = vmatmul.mubr.bf16.gmra.mrb[16].mxu0 %v437_v48  ;;  %v4274_v48 = vld [vmem:[#allocation5 + $0xb8] sm:$0xff]  }
  0xec   : > { %694 = vmatprep.mubr.bf16.mxu0 %v440_v49  ;;  %v357_v49 = vld [vmem:[%s5300_s8 + $0x1c0] sm:$0xff]  ;;  %3836 = vmatprep.subr.bf16.mxu1 %v4274_v48 }
  0xed   : > { %3837 = vmatpush3.bf16.msra.mxu1 %v4274_v48  ;;  %v457_v53 = vpack.c.bf16 %v359_v50, %v357_v49  ;;  %v402_v48 = vld [vmem:[%s5300_s8 + $0x328] sm:$0xff]  ;;  %v404_v49 = vld [vmem:[%s5300_s8 + $0x338] sm:$0xff] }
  0xf3   : > { %695 = vmatmul.mubr.bf16.gmra.mrb[20].mxu0 %v439_v54  ;;  %v460_v54 = vpack.c.bf16 %v364_v52, %v362_v51  ;;  %v480_v51 = vpack.c.bf16 %v404_v49, %v402_v48  ;;  %v401_v52 = vld [vmem:[%s5300_s8 + $0x320] sm:$0xff] }
  0xf4   : > { %702 = vmatprep.mubr.bf16.mxu0 %v442_v55  ;;  %v361_v55 = vld [vmem:[%s5300_s8 + $0x1e0] sm:$0xff] }
  0xf5   : > { %v459_v59 = vpack.c.bf16 %v363_v56, %v361_v55  ;;  %v408_v55 = vld [vmem:[%s5300_s8 + $0x358] sm:$0xff] }
  0xfb   : > { %703 = vmatmul.mubr.bf16.gmra.mrb[24].mxu0 %v441_v60  ;;  %v462_v60 = vpack.c.bf16 %v368_v58, %v366_v57  ;;  %v405_v58 = vld [vmem:[%s5300_s8 + $0x340] sm:$0xff] }
  0xfc   : > { %710 = vmatprep.mubr.bf16.mxu0 %v444_v61  ;;  %v365_v61 = vld [vmem:[%s5300_s8 + $0x200] sm:$0xff] }
  0xfd   : > { %v461_v2 = vpack.c.bf16 %v367_v62, %v365_v61  ;;  %v412_v61 = vld [vmem:[%s5300_s8 + $0x378] sm:$0xff] }
 0x103   : > { %711 = vmatmul.mubr.bf16.gmra.mrb[28].mxu0 %v443_v3  ;;  %v464_v3 = vpack.c.bf16 %v372_v1, %v370_v63  ;;  %v5440_v1 = vld [vmem:[#allocation8] ss:$0 sm:$0xff] }
 0x104   : > { %718 = vmatprep.mubr.bf16.mxu0 %v446_v4  ;;  %v369_v4 = vld [vmem:[%s5300_s8 + $0x220] sm:$0xff] }
 0x105   : > { %v463_v8 = vpack.c.bf16 %v371_v5, %v369_v4  ;;  %v414_v4 = vld [vmem:[%s5300_s8 + $0x388] sm:$0xff]  ;;  %v416_v5 = vld [vmem:[%s5300_s8 + $0x398] sm:$0xff] }
 0x10b   : > { %719 = vmatmul.mubr.bf16.gmra.mrb[32].mxu0 %v445_v9  ;;  %v466_v9 = vpack.c.bf16 %v376_v7, %v374_v6 }
 0x10c   : > { %726 = vmatprep.mubr.bf16.mxu0 %v448_v10  ;;  %v373_v10 = vld [vmem:[%s5300_s8 + $0x240] sm:$0xff] }
 0x10d   : > { %v465_v14 = vpack.c.bf16 %v375_v11, %v373_v10  ;;  %v486_v11 = vpack.c.bf16 %v416_v5, %v414_v4 }
 0x113   : > { %727 = vmatmul.mubr.bf16.gmra.mrb[36].mxu0 %v447_v15  ;;  %v468_v15 = vpack.c.bf16 %v380_v13, %v378_v12 }
 0x114   : > { %734 = vmatprep.mubr.bf16.mxu0 %v450_v16  ;;  %v377_v16 = vld [vmem:[%s5300_s8 + $0x260] sm:$0xff] }
 0x115   : > { %v467_v20 = vpack.c.bf16 %v379_v17, %v377_v16  ;;  %v418_v16 = vld [vmem:[%s5300_s8 + $0x3a8] sm:$0xff]  ;;  %v420_v17 = vld [vmem:[%s5300_s8 + $0x3b8] sm:$0xff] }
 0x11b   : > { %735 = vmatmul.mubr.bf16.gmra.mrb[40].mxu0 %v449_v22  ;;  %v381_v22 = vld [vmem:[%s5300_s8 + $0x280] sm:$0xff] }
 0x11c   : > { %742 = vmatprep.mubr.bf16.mxu0 %v452_v23  ;;  %v383_v23 = vld [vmem:[%s5300_s8 + $0x290] sm:$0xff] }
 0x11d   : > { %v469_v26 = vpack.c.bf16 %v383_v23, %v381_v22  ;;  %v488_v23 = vpack.c.bf16 %v420_v17, %v418_v16 }
 0x123   : > { %743 = vmatmul.mubr.bf16.gmra.mrb[44].mxu0 %v451_v30  ;;  %v390_v30 = vld [vmem:[%s5300_s8 + $0x2c8] sm:$0xff] }
 0x124   : > { %750 = vmatprep.mubr.bf16.mxu0 %v454_v31  ;;  %v392_v31 = vld [vmem:[%s5300_s8 + $0x2d8] sm:$0xff] }
 0x125   : > { %v474_v33 = vpack.c.bf16 %v392_v31, %v390_v30  ;;  %v422_v30 = vld [vmem:[%s5300_s8 + $0x3c8] sm:$0xff]  ;;  %v424_v31 = vld [vmem:[%s5300_s8 + $0x3d8] sm:$0xff] }
 0x12b   : > { %751 = vmatmul.mubr.bf16.gmra.mrb[48].mxu0 %v453_v38  ;;  %v473_v38 = vpack.c.bf16 %v391_v35, %v389_v34 }
 0x12c   : > { %758 = vmatprep.mubr.bf16.mxu0 %v456_v39  ;;  %v476_v39 = vpack.c.bf16 %v396_v37, %v394_v36 }
 0x133   : > { %759 = vmatmul.mubr.bf16.gmra.mrb[52].mxu0 %v455_v46  ;;  %v397_v46 = vld [vmem:[%s5300_s8 + $0x300] sm:$0xff] }
 0x134   : > { %766 = vmatprep.mubr.bf16.mxu0 %v458_v47  ;;  %v399_v47 = vld [vmem:[%s5300_s8 + $0x310] sm:$0xff] }
 0x135   : > { %v477_v50 = vpack.c.bf16 %v399_v47, %v397_v46  ;;  %v428_v46 = vld [vmem:[%s5300_s8 + $0x3f8] sm:$0xff] }
 0x13b   : > { %767 = vmatmul.mubr.bf16.gmra.mrb[56].mxu0 %v457_v53  ;;  %v403_v53 = vld [vmem:[%s5300_s8 + $0x330] sm:$0xff] }
 0x13c   : > { %774 = vmatprep.mubr.bf16.mxu0 %v460_v54  ;;  %v406_v54 = vld [vmem:[%s5300_s8 + $0x348] sm:$0xff]  ;;  %v479_v56 = vpack.c.bf16 %v403_v53, %v401_v52 }
 0x13d   : > { %v482_v57 = vpack.c.bf16 %v408_v55, %v406_v54 }
 0x143   : > { %775 = vmatmul.mubr.bf16.gmra.mrb[60].mxu0 %v459_v59  ;;  %v407_v59 = vld [vmem:[%s5300_s8 + $0x350] sm:$0xff] }
 0x144   : > { %782 = vmatprep.mubr.bf16.mxu0 %v462_v60  ;;  %v410_v60 = vld [vmem:[%s5300_s8 + $0x368] sm:$0xff]  ;;  %v481_v62 = vpack.c.bf16 %v407_v59, %v405_v58  ;;  %v427_v58 = vld [vmem:[%s5300_s8 + $0x3f0] sm:$0xff] }
 0x145   : > { %v484_v63 = vpack.c.bf16 %v412_v61, %v410_v60 }
 0x14b   : > { %783 = vmatmul.mubr.bf16.gmra.mrb[64].mxu0 %v461_v2  ;;  %v409_v2 = vld [vmem:[%s5300_s8 + $0x360] sm:$0xff] }
 0x14c   : > { %790 = vmatprep.mubr.bf16.mxu0 %v464_v3  ;;  %v411_v3 = vld [vmem:[%s5300_s8 + $0x370] sm:$0xff] }
 0x153   : > { %791 = vmatmul.mubr.bf16.gmra.mrb[68].mxu0 %v463_v8 }
 0x154   : > { %798 = vmatprep.mubr.bf16.mxu0 %v466_v9  ;;  %v483_v9 = vpack.c.bf16 %v411_v3, %v409_v2 }
 0x15b   : > { %799 = vmatmul.mubr.bf16.gmra.mrb[72].mxu0 %v465_v14  ;;  %v413_v14 = vld [vmem:[%s5300_s8 + $0x380] sm:$0xff] }
 0x15c   : > { %806 = vmatprep.mubr.bf16.mxu0 %v468_v15  ;;  %v415_v15 = vld [vmem:[%s5300_s8 + $0x390] sm:$0xff] }
 0x163   : > { %807 = vmatmul.mubr.bf16.gmra.mrb[76].mxu0 %v467_v20 }
 0x164   : > { %814 = vmatprep.mubr.bf16.mxu0 %v470_v21  ;;  %v485_v21 = vpack.c.bf16 %v415_v15, %v413_v14 }
 0x16b   : > { %815 = vmatmul.mubr.bf16.gmra.mrb[80].mxu0 %v469_v26 }
 0x16c   : > { %822 = vmatprep.mubr.bf16.mxu0 %v472_v27  ;;  %v417_v27 = vld [vmem:[%s5300_s8 + $0x3a0] sm:$0xff] }
 0x16d   : > { %v487_v36 = vpack.c.bf16 %v419_v28, %v417_v27 }
 0x173   : > { %823 = vmatmul.mubr.bf16.gmra.mrb[84].mxu0 %v471_v32 }
 0x174   : > { %830 = vmatprep.mubr.bf16.mxu0 %v474_v33 }
 0x17b   : > { %831 = vmatmul.mubr.bf16.gmra.mrb[88].mxu0 %v473_v38  ;;  %v490_v38 = vpack.c.bf16 %v424_v31, %v422_v30 }
 0x17c   : > { %838 = vmatprep.mubr.bf16.mxu0 %v476_v39 }
 0x183   : > { %839 = vmatmul.mubr.bf16.gmra.mrb[92].mxu0 %v475_v44 }
 0x184   : > { %846 = vmatprep.mubr.bf16.mxu0 %v478_v45  ;;  %v426_v45 = vld [vmem:[%s5300_s8 + $0x3e8] sm:$0xff] }
 0x185   : > { %v492_v53 = vpack.c.bf16 %v428_v46, %v426_v45 }
 0x18b   : > { %847 = vmatmul.mubr.bf16.gmra.mrb[96].mxu0 %v477_v50 }
 0x18c   : > { %854 = vmatprep.mubr.bf16.mxu0 %v480_v51  ;;  %v489_v51 = vpack.c.bf16 %v423_v43, %v421_v42 }
 0x193   : > { %855 = vmatmul.mubr.bf16.gmra.mrb[100].mxu0 %v479_v56 }
 0x194   : > { %862 = vmatprep.mubr.bf16.mxu0 %v482_v57  ;;  %v425_v57 = vld [vmem:[%s5300_s8 + $0x3e0] sm:$0xff] }
 0x195   : > { %v491_v2 = vpack.c.bf16 %v427_v58, %v425_v57 }
 0x19b   : > { %863 = vmatmul.mubr.bf16.gmra.mrb[104].mxu0 %v481_v62 }
 0x19c   : > { %870 = vmatprep.mubr.bf16.mxu0 %v484_v63 }
 0x19e   : > { %v656_v6 = vpop.f32.mrb[0].mxu0 }
 0x19f   : > { %v657_v7 = vadd.f32 %v656_v6, %v5440_v1  ;;  %v658_v8 = vpop.f32.mrb[1].mxu0 }
 0x1a0   : > { %v659_v10 = vpop.f32.mrb[2].mxu0 }
 0x1a1   : > { %v660_v12 = vadd.f32 %v659_v10, %v5440_v1  ;;  %v661_v13 = vpop.f32.mrb[3].mxu0  ;;  %4323 = vtanh.f32 %v657_v7 }
 0x1a3   : > { %4325 = vtanh.f32 %v660_v12  ;;  %871 = vmatmul.mubr.bf16.gmra.mrb[108].mxu0 %v483_v9 }
 0x1a4   : > { %878 = vmatprep.mubr.bf16.mxu0 %v486_v11 }
 0x1a6   : > { %v664_v18 = vpop.f32.mrb[4].mxu0 }
 0x1a7   : > { %v665_v19 = vadd.f32 %v664_v18, %v5440_v1  ;;  %v666_v20 = vpop.f32.mrb[5].mxu0 }
 0x1a8   : > { %v667_v22 = vpop.f32.mrb[6].mxu0 }
 0x1a9   : > { %v668_v24 = vadd.f32 %v667_v22, %v5440_v1  ;;  %v669_v25 = vpop.f32.mrb[7].mxu0  ;;  %4327 = vtanh.f32 %v665_v19 }
 0x1ab   : > { %4329 = vtanh.f32 %v668_v24  ;;  %879 = vmatmul.mubr.bf16.gmra.mrb[112].mxu0 %v485_v21  ;;  %v4324_v26 = vpop.eup %4323 }
 0x1ac   : > { %886 = vmatprep.mubr.bf16.mxu0 %v488_v23 }
 0x1ad   : > { %v4326_v29 = vpop.eup %4325 }
 0x1ae   : > { %v672_v32 = vpop.f32.mrb[8].mxu0  ;;  %v975_v33 = vpack.c.bf16 %v4326_v29, %v4324_v26 }
 0x1af   : > { %v673_v34 = vadd.f32 %v672_v32, %v5440_v1  ;;  %v674_v35 = vpop.f32.mrb[9].mxu0 }
 0x1b0   : > { %v675_v37 = vpop.f32.mrb[10].mxu0  ;;  %3838 = vmatprep.mubr.bf16.mxu1 %v975_v33  ;;  %v4275_v33 = vld [vmem:[#allocation5 + $0xc0] sm:$0xff]  }
 0x1b1   : > { %v676_v39 = vadd.f32 %v675_v37, %v5440_v1  ;;  %v677_v40 = vpop.f32.mrb[11].mxu0  ;;  %4331 = vtanh.f32 %v673_v34  ;;  %3902 = vmatprep.subr.bf16.mxu1 %v4275_v33 }
 0x1b3   : > { %4333 = vtanh.f32 %v676_v39  ;;  %887 = vmatmul.mubr.bf16.gmra.mrb[116].mxu0 %v487_v36  ;;  %v4328_v41 = vpop.eup %4327 }
 0x1b4   : > { %894 = vmatprep.mubr.bf16.mxu0 %v490_v38 }
 0x1b5   : > { %v4330_v44 = vpop.eup %4329 }
 0x1b6   : > { %v680_v47 = vpop.f32.mrb[12].mxu0  ;;  %v976_v48 = vpack.c.bf16 %v4330_v44, %v4328_v41 }
 0x1b7   : > { %v681_v49 = vadd.f32 %v680_v47, %v5440_v1  ;;  %v682_v50 = vpop.f32.mrb[13].mxu0 }
 0x1b8   : > { %v683_v52 = vpop.f32.mrb[14].mxu0  ;;  %3839 = vmatmul.mubr.bf16.vlgmr.msra.gmra.mrb[0].mxu1 %v976_v48 }
 0x1b9   : > { %v684_v54 = vadd.f32 %v683_v52, %v5440_v1  ;;  %v685_v55 = vpop.f32.mrb[15].mxu0  ;;  %4335 = vtanh.f32 %v681_v49  ;;  %3903 = vmatpush3.bf16.msra.mxu1 %v4275_v33  ;;  %v4276_v52 = vld [vmem:[#allocation5 + $0xc8] sm:$0xff]  }
 0x1ba   : > { %3904 = vmatprep.subr.bf16.mxu1 %v4276_v52 }
 0x1bb   : > { %4337 = vtanh.f32 %v684_v54  ;;  %895 = vmatmul.mubr.bf16.gmra.mrb[120].mxu0 %v489_v51  ;;  %v4332_v56 = vpop.eup %4331 }
 0x1bc   : > { %902 = vmatprep.mubr.bf16.mxu0 %v492_v53 }
 0x1bd   : > { %v4334_v59 = vpop.eup %4333  ;;  %3905 = vmatpush3.bf16.msra.mxu1 %v4276_v52 }
 0x1be   : > { %v688_v60 = vpop.f32.mrb[16].mxu0  ;;  %v977_v61 = vpack.c.bf16 %v4334_v59, %v4332_v56 }
 0x1bf   : > { %v689_v62 = vadd.f32 %v688_v60, %v5440_v1  ;;  %v690_v63 = vpop.f32.mrb[17].mxu0 }
 0x1c0   : > { %v691_v3 = vpop.f32.mrb[18].mxu0  ;;  %3842 = vmatprep.mubr.bf16.mxu1 %v977_v61 }
 0x1c1   : > { %v692_v4 = vadd.f32 %v691_v3, %v5440_v1  ;;  %v693_v5 = vpop.f32.mrb[19].mxu0  ;;  %4339 = vtanh.f32 %v689_v62 }
 0x1c3   : > { %4341 = vtanh.f32 %v692_v4  ;;  %903 = vmatmul.mubr.bf16.gmra.mrb[124].mxu0 %v491_v2  ;;  %v4336_v6 = vpop.eup %4335 }
 0x1c5   : > { %v4338_v7 = vpop.eup %4337 }
 0x1c6   : > { %v696_v8 = vpop.f32.mrb[20].mxu0  ;;  %v978_v9 = vpack.c.bf16 %v4338_v7, %v4336_v6 }
 0x1c7   : > { %v697_v10 = vadd.f32 %v696_v8, %v5440_v1  ;;  %v698_v11 = vpop.f32.mrb[21].mxu0 }
 0x1c8   : > { %v699_v12 = vpop.f32.mrb[22].mxu0  ;;  %3843 = vmatmul.mubr.bf16.gmra.mrb[4].mxu1 %v978_v9  ;;  %v4277_v9 = vld [vmem:[#allocation5 + $0xd0] sm:$0xff]  }
 0x1c9   : > { %v700_v13 = vadd.f32 %v699_v12, %v5440_v1  ;;  %v701_v14 = vpop.f32.mrb[23].mxu0  ;;  %4343 = vtanh.f32 %v697_v10  ;;  %3906 = vmatprep.subr.bf16.mxu1 %v4277_v9 }
 0x1ca   : > { %3907 = vmatpush3.bf16.msra.mxu1 %v4277_v9 }
 0x1cb   : > { %4345 = vtanh.f32 %v700_v13  ;;  %v4340_v15 = vpop.eup %4339 }
 0x1cd   : > { %v4342_v16 = vpop.eup %4341 }
 0x1ce   : > { %v704_v17 = vpop.f32.mrb[24].mxu0  ;;  %v979_v18 = vpack.c.bf16 %v4342_v16, %v4340_v15 }
 0x1cf   : > { %v705_v19 = vadd.f32 %v704_v17, %v5440_v1  ;;  %v706_v20 = vpop.f32.mrb[25].mxu0 }
 0x1d0   : > { %v707_v21 = vpop.f32.mrb[26].mxu0  ;;  %3846 = vmatprep.mubr.bf16.mxu1 %v979_v18 }
 0x1d1   : > { %v708_v22 = vadd.f32 %v707_v21, %v5440_v1  ;;  %v709_v23 = vpop.f32.mrb[27].mxu0  ;;  %4347 = vtanh.f32 %v705_v19 }
 0x1d3   : > { %4349 = vtanh.f32 %v708_v22  ;;  %v4344_v24 = vpop.eup %4343 }
 0x1d5   : > { %v4346_v25 = vpop.eup %4345 }
 0x1d6   : > { %v712_v26 = vpop.f32.mrb[28].mxu0  ;;  %v980_v27 = vpack.c.bf16 %v4346_v25, %v4344_v24 }
 0x1d7   : > { %v713_v28 = vadd.f32 %v712_v26, %v5440_v1  ;;  %v714_v29 = vpop.f32.mrb[29].mxu0 }
 0x1d8   : > { %v715_v30 = vpop.f32.mrb[30].mxu0  ;;  %3847 = vmatmul.mubr.bf16.gmra.mrb[8].mxu1 %v980_v27 }
 0x1d9   : > { %v716_v31 = vadd.f32 %v715_v30, %v5440_v1  ;;  %v717_v32 = vpop.f32.mrb[31].mxu0  ;;  %4351 = vtanh.f32 %v713_v28  ;;  %v4278_v28 = vld [vmem:[#allocation5 + $0xd8] sm:$0xff]  }
 0x1da   : > { %3908 = vmatprep.subr.bf16.mxu1 %v4278_v28 }
 0x1db   : > { %4353 = vtanh.f32 %v716_v31  ;;  %v4348_v34 = vpop.eup %4347  ;;  %3909 = vmatpush3.bf16.msra.mxu1 %v4278_v28 }
 0x1dd   : > { %v4350_v35 = vpop.eup %4349 }
 0x1de   : > { %v720_v36 = vpop.f32.mrb[32].mxu0  ;;  %v981_v37 = vpack.c.bf16 %v4350_v35, %v4348_v34 }
 0x1df   : > { %v721_v38 = vadd.f32 %v720_v36, %v5440_v1  ;;  %v722_v39 = vpop.f32.mrb[33].mxu0 }
 0x1e0   : > { %v723_v40 = vpop.f32.mrb[34].mxu0  ;;  %3850 = vmatprep.mubr.bf16.mxu1 %v981_v37 }
 0x1e1   : > { %v724_v41 = vadd.f32 %v723_v40, %v5440_v1  ;;  %v725_v42 = vpop.f32.mrb[35].mxu0  ;;  %4355 = vtanh.f32 %v721_v38 }
 0x1e3   : > { %4357 = vtanh.f32 %v724_v41  ;;  %v4352_v43 = vpop.eup %4351 }
 0x1e5   : > { %v4354_v44 = vpop.eup %4353 }
 0x1e6   : > { %v728_v45 = vpop.f32.mrb[36].mxu0  ;;  %v982_v46 = vpack.c.bf16 %v4354_v44, %v4352_v43 }
 0x1e7   : > { %v729_v47 = vadd.f32 %v728_v45, %v5440_v1  ;;  %v730_v48 = vpop.f32.mrb[37].mxu0 }
 0x1e8   : > { %v731_v49 = vpop.f32.mrb[38].mxu0  ;;  %3851 = vmatmul.mubr.bf16.gmra.mrb[12].mxu1 %v982_v46 }
 0x1e9   : > { %v732_v50 = vadd.f32 %v731_v49, %v5440_v1  ;;  %v733_v51 = vpop.f32.mrb[39].mxu0  ;;  %4359 = vtanh.f32 %v729_v47  ;;  %v4279_v47 = vld [vmem:[#allocation5 + $0xe0] sm:$0xff]  }
 0x1ea   : > { %3910 = vmatprep.subr.bf16.mxu1 %v4279_v47 }
 0x1eb   : > { %4361 = vtanh.f32 %v732_v50  ;;  %v4356_v53 = vpop.eup %4355  ;;  %3911 = vmatpush3.bf16.msra.mxu1 %v4279_v47 }
 0x1ed   : > { %v4358_v54 = vpop.eup %4357 }
 0x1ee   : > { %v736_v55 = vpop.f32.mrb[40].mxu0  ;;  %v983_v56 = vpack.c.bf16 %v4358_v54, %v4356_v53 }
 0x1ef   : > { %v737_v57 = vadd.f32 %v736_v55, %v5440_v1  ;;  %v738_v58 = vpop.f32.mrb[41].mxu0 }
 0x1f0   : > { %v739_v59 = vpop.f32.mrb[42].mxu0  ;;  %3854 = vmatprep.mubr.bf16.mxu1 %v983_v56 }
 0x1f1   : > { %v740_v60 = vadd.f32 %v739_v59, %v5440_v1  ;;  %v741_v61 = vpop.f32.mrb[43].mxu0  ;;  %4363 = vtanh.f32 %v737_v57  ;;  %v4280_v57 = vld [vmem:[#allocation5 + $0xe8] sm:$0xff]  }
 0x1f2   : > { %3912 = vmatprep.subr.bf16.mxu1 %v4280_v57 }
 0x1f3   : > { %4365 = vtanh.f32 %v740_v60  ;;  %v4360_v62 = vpop.eup %4359  ;;  %3913 = vmatpush3.bf16.msra.mxu1 %v4280_v57 }
 0x1f5   : > { %v4362_v63 = vpop.eup %4361 }
 0x1f6   : > { %v744_v2 = vpop.f32.mrb[44].mxu0  ;;  %v984_v3 = vpack.c.bf16 %v4362_v63, %v4360_v62 }
 0x1f7   : > { %v745_v4 = vadd.f32 %v744_v2, %v5440_v1  ;;  %v746_v5 = vpop.f32.mrb[45].mxu0  ;;  %v4281_v2 = vld [vmem:[#allocation5 + $0xf0] sm:$0xff]  }
 0x1f8   : > { %v747_v6 = vpop.f32.mrb[46].mxu0  ;;  %3855 = vmatmul.mubr.bf16.gmra.mrb[16].mxu1 %v984_v3  ;;  %3914 = vmatprep.subr.bf16.mxu1 %v4281_v2 }
 0x1f9   : > { %v748_v7 = vadd.f32 %v747_v6, %v5440_v1  ;;  %v749_v8 = vpop.f32.mrb[47].mxu0  ;;  %4367 = vtanh.f32 %v745_v4  ;;  %3915 = vmatpush3.bf16.msra.mxu1 %v4281_v2  ;;  %v4282_v6 = vld [vmem:[#allocation5 + $0xf8] sm:$0xff]  }
 0x1fa   : > { %3916 = vmatprep.subr.bf16.mxu1 %v4282_v6 }
 0x1fb   : > { %4369 = vtanh.f32 %v748_v7  ;;  %v4364_v10 = vpop.eup %4363 }
 0x1fd   : > { %v4366_v11 = vpop.eup %4365  ;;  %3917 = vmatpush3.bf16.msra.mxu1 %v4282_v6 }
 0x1fe   : > { %v752_v12 = vpop.f32.mrb[48].mxu0  ;;  %v985_v13 = vpack.c.bf16 %v4366_v11, %v4364_v10 }
 0x1ff   : > { %v753_v14 = vadd.f32 %v752_v12, %v5440_v1  ;;  %v754_v15 = vpop.f32.mrb[49].mxu0 }
 0x200   : > { %v755_v16 = vpop.f32.mrb[50].mxu0  ;;  %3858 = vmatprep.mubr.bf16.mxu1 %v985_v13 }
 0x201   : > { %v756_v17 = vadd.f32 %v755_v16, %v5440_v1  ;;  %v757_v18 = vpop.f32.mrb[51].mxu0  ;;  %4371 = vtanh.f32 %v753_v14 }
 0x203   : > { %4373 = vtanh.f32 %v756_v17  ;;  %v4368_v19 = vpop.eup %4367 }
 0x205   : > { %v4370_v20 = vpop.eup %4369 }
 0x206   : > { %v760_v21 = vpop.f32.mrb[52].mxu0  ;;  %v986_v22 = vpack.c.bf16 %v4370_v20, %v4368_v19 }
 0x207   : > { %v761_v23 = vadd.f32 %v760_v21, %v5440_v1  ;;  %v762_v24 = vpop.f32.mrb[53].mxu0 }
 0x208   : > { %v763_v25 = vpop.f32.mrb[54].mxu0  ;;  %3859 = vmatmul.mubr.bf16.gmra.mrb[20].mxu1 %v986_v22 }
 0x209   : > { %v764_v26 = vadd.f32 %v763_v25, %v5440_v1  ;;  %v765_v27 = vpop.f32.mrb[55].mxu0  ;;  %4375 = vtanh.f32 %v761_v23 }
 0x20b   : > { %4377 = vtanh.f32 %v764_v26  ;;  %v4372_v29 = vpop.eup %4371 }
 0x20d   : > { %v4374_v30 = vpop.eup %4373 }
 0x20e   : > { %v768_v31 = vpop.f32.mrb[56].mxu0  ;;  %v987_v32 = vpack.c.bf16 %v4374_v30, %v4372_v29 }
 0x20f   : > { %v769_v33 = vadd.f32 %v768_v31, %v5440_v1  ;;  %v770_v34 = vpop.f32.mrb[57].mxu0 }
 0x210   : > { %v771_v35 = vpop.f32.mrb[58].mxu0  ;;  %3862 = vmatprep.mubr.bf16.mxu1 %v987_v32 }
 0x211   : > { %v772_v36 = vadd.f32 %v771_v35, %v5440_v1  ;;  %v773_v37 = vpop.f32.mrb[59].mxu0  ;;  %4379 = vtanh.f32 %v769_v33 }
 0x213   : > { %4381 = vtanh.f32 %v772_v36  ;;  %v4376_v38 = vpop.eup %4375 }
 0x215   : > { %v4378_v39 = vpop.eup %4377 }
 0x216   : > { %v776_v40 = vpop.f32.mrb[60].mxu0  ;;  %v988_v41 = vpack.c.bf16 %v4378_v39, %v4376_v38 }
 0x217   : > { %v777_v42 = vadd.f32 %v776_v40, %v5440_v1  ;;  %v778_v43 = vpop.f32.mrb[61].mxu0 }
 0x218   : > { %v779_v44 = vpop.f32.mrb[62].mxu0  ;;  %3863 = vmatmul.mubr.bf16.gmra.mrb[24].mxu1 %v988_v41 }
 0x219   : > { %v780_v45 = vadd.f32 %v779_v44, %v5440_v1  ;;  %v781_v46 = vpop.f32.mrb[63].mxu0  ;;  %4383 = vtanh.f32 %v777_v42 }
 0x21b   : > { %4385 = vtanh.f32 %v780_v45  ;;  %v4380_v48 = vpop.eup %4379 }
 0x21d   : > { %v4382_v49 = vpop.eup %4381 }
 0x21e   : > { %v784_v50 = vpop.f32.mrb[64].mxu0  ;;  %v989_v51 = vpack.c.bf16 %v4382_v49, %v4380_v48 }
 0x21f   : > { %v785_v52 = vadd.f32 %v784_v50, %v5440_v1  ;;  %v786_v53 = vpop.f32.mrb[65].mxu0 }
 0x220   : > { %v787_v54 = vpop.f32.mrb[66].mxu0  ;;  %3866 = vmatprep.mubr.bf16.mxu1 %v989_v51 }
 0x221   : > { %v788_v55 = vadd.f32 %v787_v54, %v5440_v1  ;;  %v789_v56 = vpop.f32.mrb[67].mxu0  ;;  %4387 = vtanh.f32 %v785_v52 }
 0x223   : > { %4389 = vtanh.f32 %v788_v55  ;;  %v4384_v58 = vpop.eup %4383 }
 0x225   : > { %v4386_v59 = vpop.eup %4385 }
 0x226   : > { %v792_v60 = vpop.f32.mrb[68].mxu0  ;;  %v990_v61 = vpack.c.bf16 %v4386_v59, %v4384_v58 }
 0x227   : > { %v793_v62 = vadd.f32 %v792_v60, %v5440_v1  ;;  %v794_v63 = vpop.f32.mrb[69].mxu0 }
 0x228   : > { %v795_v3 = vpop.f32.mrb[70].mxu0  ;;  %3867 = vmatmul.mubr.bf16.gmra.mrb[28].mxu1 %v990_v61 }
 0x229   : > { %v796_v4 = vadd.f32 %v795_v3, %v5440_v1  ;;  %v797_v5 = vpop.f32.mrb[71].mxu0  ;;  %4391 = vtanh.f32 %v793_v62 }
 0x22b   : > { %4393 = vtanh.f32 %v796_v4  ;;  %v4388_v7 = vpop.eup %4387 }
 0x22d   : > { %v4390_v8 = vpop.eup %4389 }
 0x22e   : > { %v800_v9 = vpop.f32.mrb[72].mxu0  ;;  %v991_v10 = vpack.c.bf16 %v4390_v8, %v4388_v7 }
 0x22f   : > { %v801_v11 = vadd.f32 %v800_v9, %v5440_v1  ;;  %v802_v12 = vpop.f32.mrb[73].mxu0 }
 0x230   : > { %v803_v13 = vpop.f32.mrb[74].mxu0  ;;  %3870 = vmatprep.mubr.bf16.mxu1 %v991_v10 }
 0x231   : > { %v804_v14 = vadd.f32 %v803_v13, %v5440_v1  ;;  %v805_v15 = vpop.f32.mrb[75].mxu0  ;;  %4395 = vtanh.f32 %v801_v11 }
 0x233   : > { %4397 = vtanh.f32 %v804_v14  ;;  %v4392_v16 = vpop.eup %4391 }
 0x235   : > { %v4394_v17 = vpop.eup %4393 }
 0x236   : > { %v808_v18 = vpop.f32.mrb[76].mxu0  ;;  %v992_v19 = vpack.c.bf16 %v4394_v17, %v4392_v16 }
 0x237   : > { %v809_v20 = vadd.f32 %v808_v18, %v5440_v1  ;;  %v810_v21 = vpop.f32.mrb[77].mxu0 }
 0x238   : > { %v811_v22 = vpop.f32.mrb[78].mxu0  ;;  %3871 = vmatmul.mubr.bf16.gmra.mrb[32].mxu1 %v992_v19 }
 0x239   : > { %v812_v23 = vadd.f32 %v811_v22, %v5440_v1  ;;  %v813_v24 = vpop.f32.mrb[79].mxu0  ;;  %4399 = vtanh.f32 %v809_v20 }
 0x23b   : > { %4401 = vtanh.f32 %v812_v23  ;;  %v4396_v25 = vpop.eup %4395 }
 0x23d   : > { %v4398_v26 = vpop.eup %4397 }
 0x23e   : > { %v816_v27 = vpop.f32.mrb[80].mxu0  ;;  %v993_v28 = vpack.c.bf16 %v4398_v26, %v4396_v25 }
 0x23f   : > { %v817_v29 = vadd.f32 %v816_v27, %v5440_v1  ;;  %v818_v30 = vpop.f32.mrb[81].mxu0 }
 0x240   : > { %v819_v31 = vpop.f32.mrb[82].mxu0  ;;  %3874 = vmatprep.mubr.bf16.mxu1 %v993_v28 }
 0x241   : > { %v820_v32 = vadd.f32 %v819_v31, %v5440_v1  ;;  %v821_v33 = vpop.f32.mrb[83].mxu0  ;;  %4403 = vtanh.f32 %v817_v29 }
 0x243   : > { %4405 = vtanh.f32 %v820_v32  ;;  %v4400_v34 = vpop.eup %4399 }
 0x245   : > { %v4402_v35 = vpop.eup %4401 }
 0x246   : > { %v824_v36 = vpop.f32.mrb[84].mxu0  ;;  %v994_v37 = vpack.c.bf16 %v4402_v35, %v4400_v34 }
 0x247   : > { %v825_v38 = vadd.f32 %v824_v36, %v5440_v1  ;;  %v826_v39 = vpop.f32.mrb[85].mxu0 }
 0x248   : > { %v827_v40 = vpop.f32.mrb[86].mxu0  ;;  %3875 = vmatmul.mubr.bf16.gmra.mrb[36].mxu1 %v994_v37 }
 0x249   : > { %v828_v41 = vadd.f32 %v827_v40, %v5440_v1  ;;  %v829_v42 = vpop.f32.mrb[87].mxu0  ;;  %4407 = vtanh.f32 %v825_v38 }
 0x24b   : > { %4409 = vtanh.f32 %v828_v41  ;;  %v4404_v43 = vpop.eup %4403 }
 0x24d   : > { %v4406_v44 = vpop.eup %4405 }
 0x24e   : > { %v832_v45 = vpop.f32.mrb[88].mxu0  ;;  %v995_v46 = vpack.c.bf16 %v4406_v44, %v4404_v43 }
 0x24f   : > { %v833_v47 = vadd.f32 %v832_v45, %v5440_v1  ;;  %v834_v48 = vpop.f32.mrb[89].mxu0 }
 0x250   : > { %v835_v49 = vpop.f32.mrb[90].mxu0  ;;  %3878 = vmatprep.mubr.bf16.mxu1 %v995_v46 }
 0x251   : > { %v836_v50 = vadd.f32 %v835_v49, %v5440_v1  ;;  %v837_v51 = vpop.f32.mrb[91].mxu0  ;;  %4411 = vtanh.f32 %v833_v47 }
 0x253   : > { %4413 = vtanh.f32 %v836_v50  ;;  %v4408_v52 = vpop.eup %4407 }
 0x255   : > { %v4410_v53 = vpop.eup %4409 }
 0x256   : > { %v840_v54 = vpop.f32.mrb[92].mxu0  ;;  %v996_v55 = vpack.c.bf16 %v4410_v53, %v4408_v52  ;;  %v5520_v53 = vld [vmem:[#allocation8 + $0x8] ss:$0 sm:$0xff] }
 0x257   : > { %v841_v56 = vadd.f32 %v840_v54, %v5440_v1  ;;  %v842_v57 = vpop.f32.mrb[93].mxu0 }
 0x258   : > { %v843_v58 = vpop.f32.mrb[94].mxu0  ;;  %3879 = vmatmul.mubr.bf16.gmra.mrb[40].mxu1 %v996_v55 }
 0x259   : > { %v844_v59 = vadd.f32 %v843_v58, %v5440_v1  ;;  %v845_v60 = vpop.f32.mrb[95].mxu0  ;;  %4415 = vtanh.f32 %v841_v56 }
 0x25b   : > { %4417 = vtanh.f32 %v844_v59  ;;  %v4412_v61 = vpop.eup %4411 }
 0x25d   : > { %v4414_v62 = vpop.eup %4413 }
 0x25e   : > { %v848_v63 = vpop.f32.mrb[96].mxu0  ;;  %v997_v2 = vpack.c.bf16 %v4414_v62, %v4412_v61 }
 0x25f   : > { %v849_v3 = vadd.f32 %v848_v63, %v5440_v1  ;;  %v850_v4 = vpop.f32.mrb[97].mxu0 }
 0x260   : > { %v851_v5 = vpop.f32.mrb[98].mxu0  ;;  %3882 = vmatprep.mubr.bf16.mxu1 %v997_v2 }
 0x261   : > { %v852_v6 = vadd.f32 %v851_v5, %v5440_v1  ;;  %v853_v7 = vpop.f32.mrb[99].mxu0  ;;  %4419 = vtanh.f32 %v849_v3 }
 0x263   : > { %4421 = vtanh.f32 %v852_v6  ;;  %v4416_v8 = vpop.eup %4415 }
 0x265   : > { %v4418_v9 = vpop.eup %4417 }
 0x266   : > { %v856_v10 = vpop.f32.mrb[100].mxu0  ;;  %v998_v11 = vpack.c.bf16 %v4418_v9, %v4416_v8 }
 0x267   : > { %v857_v12 = vadd.f32 %v856_v10, %v5440_v1  ;;  %v858_v13 = vpop.f32.mrb[101].mxu0 }
 0x268   : > { %v859_v14 = vpop.f32.mrb[102].mxu0  ;;  %3883 = vmatmul.mubr.bf16.gmra.mrb[44].mxu1 %v998_v11 }
 0x269   : > { %v860_v15 = vadd.f32 %v859_v14, %v5440_v1  ;;  %v861_v16 = vpop.f32.mrb[103].mxu0  ;;  %4423 = vtanh.f32 %v857_v12 }
 0x26b   : > { %4425 = vtanh.f32 %v860_v15  ;;  %v4420_v17 = vpop.eup %4419 }
 0x26d   : > { %v4422_v18 = vpop.eup %4421 }
 0x26e   : > { %v864_v19 = vpop.f32.mrb[104].mxu0  ;;  %v999_v20 = vpack.c.bf16 %v4422_v18, %v4420_v17 }
 0x26f   : > { %v865_v21 = vadd.f32 %v864_v19, %v5440_v1  ;;  %v866_v22 = vpop.f32.mrb[105].mxu0 }
 0x270   : > { %v867_v23 = vpop.f32.mrb[106].mxu0  ;;  %3886 = vmatprep.mubr.bf16.mxu1 %v999_v20 }
 0x271   : > { %v868_v24 = vadd.f32 %v867_v23, %v5440_v1  ;;  %v869_v25 = vpop.f32.mrb[107].mxu0  ;;  %4427 = vtanh.f32 %v865_v21 }
 0x273   : > { %4429 = vtanh.f32 %v868_v24  ;;  %v4424_v26 = vpop.eup %4423 }
 0x275   : > { %v4426_v27 = vpop.eup %4425 }
 0x276   : > { %v872_v28 = vpop.f32.mrb[108].mxu0  ;;  %v1000_v29 = vpack.c.bf16 %v4426_v27, %v4424_v26 }
 0x277   : > { %v873_v30 = vadd.f32 %v872_v28, %v5440_v1  ;;  %v874_v31 = vpop.f32.mrb[109].mxu0 }
 0x278   : > { %v875_v32 = vpop.f32.mrb[110].mxu0  ;;  %3887 = vmatmul.mubr.bf16.gmra.mrb[48].mxu1 %v1000_v29 }
 0x279   : > { %v876_v33 = vadd.f32 %v875_v32, %v5440_v1  ;;  %v877_v34 = vpop.f32.mrb[111].mxu0  ;;  %4431 = vtanh.f32 %v873_v30 }
 0x27b   : > { %4433 = vtanh.f32 %v876_v33  ;;  %v4428_v35 = vpop.eup %4427 }
 0x27d   : > { %v4430_v36 = vpop.eup %4429 }
 0x27e   : > { %v880_v37 = vpop.f32.mrb[112].mxu0  ;;  %v1001_v38 = vpack.c.bf16 %v4430_v36, %v4428_v35 }
 0x27f   : > { %v881_v39 = vadd.f32 %v880_v37, %v5440_v1  ;;  %v882_v40 = vpop.f32.mrb[113].mxu0 }
 0x280   : > { %v883_v41 = vpop.f32.mrb[114].mxu0  ;;  %3890 = vmatprep.mubr.bf16.mxu1 %v1001_v38 }
 0x281   : > { %v884_v42 = vadd.f32 %v883_v41, %v5440_v1  ;;  %v885_v43 = vpop.f32.mrb[115].mxu0  ;;  %4435 = vtanh.f32 %v881_v39 }
 0x283   : > { %4437 = vtanh.f32 %v884_v42  ;;  %v4432_v44 = vpop.eup %4431 }
 0x285   : > { %v4434_v45 = vpop.eup %4433 }
 0x286   : > { %v888_v46 = vpop.f32.mrb[116].mxu0  ;;  %v1002_v47 = vpack.c.bf16 %v4434_v45, %v4432_v44 }
 0x287   : > { %v889_v48 = vadd.f32 %v888_v46, %v5440_v1  ;;  %v890_v49 = vpop.f32.mrb[117].mxu0 }
 0x288   : > { %v891_v50 = vpop.f32.mrb[118].mxu0  ;;  %3891 = vmatmul.mubr.bf16.gmra.mrb[52].mxu1 %v1002_v47 }
 0x289   : > { %v892_v51 = vadd.f32 %v891_v50, %v5440_v1  ;;  %v893_v52 = vpop.f32.mrb[119].mxu0  ;;  %4439 = vtanh.f32 %v889_v48 }
 0x28b   : > { %4441 = vtanh.f32 %v892_v51  ;;  %v3840_v54 = vpop.f32.mrb[0].mxu1  ;;  %v4436_v55 = vpop.eup %4435  ;;  %v4283_v51 = vld [vmem:[#allocation5 + $0x100] sm:$0xff]  }
 0x28c   : > { %v1115_v56 = vadd.f32 %v3840_v54, %v5520_v53  ;;  %v1106_v57 = vpop.f32.mrb[1].mxu1  ;;  %3982 = vmatprep.subr.bf16.mxu1 %v4283_v51 }
 0x28d   : > { %v4438_v58 = vpop.eup %4437  ;;  %v1107_v59 = vadd.f32 %v1106_v57, %v5520_v53  ;;  %v3841_v60 = vpop.f32.mrb[2].mxu1 }
 0x28e   : > { %4443 = vtanh.f32 %v1115_v56  ;;  %v1118_v61 = vadd.f32 %v3841_v60, %v5520_v53  ;;  %v896_v62 = vpop.f32.mrb[120].mxu0  ;;  %v1109_v63 = vpop.f32.mrb[3].mxu1  ;;  %v1003_v2 = vpack.c.bf16 %v4438_v58, %v4436_v55 }
 0x28f   : > { %4445 = vtanh.f32 %v1107_v59  ;;  %v897_v3 = vadd.f32 %v896_v62, %v5440_v1  ;;  %v1110_v4 = vadd.f32 %v1109_v63, %v5520_v53  ;;  %v898_v5 = vpop.f32.mrb[121].mxu0 }
 0x290   : > { %4447 = vtanh.f32 %v1118_v61  ;;  %v899_v6 = vpop.f32.mrb[122].mxu0  ;;  %3894 = vmatprep.mubr.bf16.mxu1 %v1003_v2  ;;  %v4284_v5 = vld [vmem:[#allocation5 + $0x108] sm:$0xff]  }
 0x291   : > { %4449 = vtanh.f32 %v897_v3  ;;  %v900_v7 = vadd.f32 %v899_v6, %v5440_v1  ;;  %v901_v8 = vpop.f32.mrb[123].mxu0 }
 0x292   : > { %4451 = vtanh.f32 %v1110_v4 }
 0x293   : > { %4453 = vtanh.f32 %v900_v7  ;;  %v4440_v9 = vpop.eup %4439 }
 0x295   : > { %v4442_v10 = vpop.eup %4441 }
 0x296   : > { %v904_v11 = vpop.f32.mrb[124].mxu0  ;;  %v1004_v12 = vpack.c.bf16 %v4442_v10, %v4440_v9 }
 0x297   : > { %v905_v13 = vadd.f32 %v904_v11, %v5440_v1  ;;  %v906_v14 = vpop.f32.mrb[125].mxu0 }
 0x298   : > { %v4444_v15 = vpop.eup %4443  ;;  %v907_v16 = vpop.f32.mrb[126].mxu0  ;;  %3895 = vmatmul.mubr.bf16.gmra.mrb[56].mxu1 %v1004_v12 }
 0x299   : > { %v4446_v17 = vpop.eup %4445  ;;  %v908_v18 = vadd.f32 %v907_v16, %v5440_v1  ;;  %v909_v19 = vpop.f32.mrb[127].mxu0  ;;  %4455 = vtanh.f32 %v905_v13 }
 0x29a   : > { %v4448_v20 = vpop.eup %4447 }
 0x29b   : > { %v4450_v21 = vpop.eup %4449  ;;  %4457 = vtanh.f32 %v908_v18  ;;  %v3844_v22 = vpop.f32.mrb[4].mxu1  ;;  %v1426_v23 = vpack.c.bf16 %v4448_v20, %v4444_v15  ;;  %v4285_v20 = vld [vmem:[#allocation5 + $0x110] sm:$0xff]  }
 0x29c   : > { %v4452_v24 = vpop.eup %4451  ;;  %v1131_v25 = vadd.f32 %v3844_v22, %v5520_v53  ;;  %v1122_v26 = vpop.f32.mrb[5].mxu1 }
 0x29d   : > { %v4454_v27 = vpop.eup %4453  ;;  %v1123_v28 = vadd.f32 %v1122_v26, %v5520_v53  ;;  %v3845_v29 = vpop.f32.mrb[6].mxu1  ;;  %v1425_v30 = vpack.c.bf16 %v4452_v24, %v4446_v17 }
 0x29e   : > { %4459 = vtanh.f32 %v1131_v25  ;;  %v1134_v31 = vadd.f32 %v3845_v29, %v5520_v53  ;;  %v1125_v1 = vpop.f32.mrb[7].mxu1  ;;  %v1005_v32 = vpack.c.bf16 %v4454_v27, %v4450_v21 }
 0x29f   : > { %4461 = vtanh.f32 %v1123_v28  ;;  %v1126_v33 = vadd.f32 %v1125_v1, %v5520_v53 }
 0x2a0   : > { %4463 = vtanh.f32 %v1134_v31  ;;  %3898 = vmatprep.mubr.bf16.mxu1 %v1005_v32 }
 0x2a1   : > { %4465 = vtanh.f32 %v1126_v33 }
 0x2a3   : > { %v4456_v34 = vpop.eup %4455 }
 0x2a5   : > { %v4458_v35 = vpop.eup %4457 }
 0x2a6   : > { %v1006_v36 = vpack.c.bf16 %v4458_v35, %v4456_v34  ;;  %v4286_v34 = vld [vmem:[#allocation5 + $0x118] sm:$0xff]  }
 0x2a8   : > { %v4460_v37 = vpop.eup %4459  ;;  %3899 = vmatmul.mubr.bf16.gmra.mrb[60].mxu1 %v1006_v36 }
 0x2a9   : > { %v4462_v38 = vpop.eup %4461  ;;  %3918 = vmatprep.mubr.bf16.mxu1 %v1425_v30 }
 0x2aa   : > { %v4464_v39 = vpop.eup %4463 }
 0x2ab   : > { %v4466_v40 = vpop.eup %4465  ;;  %v3848_v41 = vpop.f32.mrb[8].mxu1  ;;  %v1428_v42 = vpack.c.bf16 %v4464_v39, %v4460_v37 }
 0x2ac   : > { %v1147_v43 = vadd.f32 %v3848_v41, %v5520_v53  ;;  %v1138_v44 = vpop.f32.mrb[9].mxu1  ;;  %v1427_v45 = vpack.c.bf16 %v4466_v40, %v4462_v38 }
 0x2ad   : > { %v1139_v46 = vadd.f32 %v1138_v44, %v5520_v53  ;;  %v3849_v47 = vpop.f32.mrb[10].mxu1 }
 0x2ae   : > { %4467 = vtanh.f32 %v1147_v43  ;;  %v1150_v48 = vadd.f32 %v3849_v47, %v5520_v53  ;;  %v1141_v49 = vpop.f32.mrb[11].mxu1 }
 0x2af   : > { %4469 = vtanh.f32 %v1139_v46  ;;  %v1142_v50 = vadd.f32 %v1141_v49, %v5520_v53  ;;  %v4287_v49 = vld [vmem:[#allocation5 + $0x120] sm:$0xff]  }
 0x2b0   : > { %4471 = vtanh.f32 %v1150_v48  ;;  %3919 = vmatmul.mubr.bf16.vlgmr.msra.gmra.mrb[64].mxu1 %v1426_v23 }
 0x2b1   : > { %4473 = vtanh.f32 %v1142_v50  ;;  %3922 = vmatprep.mubr.bf16.mxu1 %v1427_v45  ;;  %3983 = vmatpush3.bf16.msra.mxu1 %v4283_v51 }
 0x2b2   : > { %3984 = vmatprep.subr.bf16.mxu1 %v4284_v5 }
 0x2b5   : > { %3985 = vmatpush3.bf16.msra.mxu1 %v4284_v5 }
 0x2b6   : > { %3986 = vmatprep.subr.bf16.mxu1 %v4285_v20 }
 0x2b8   : > { %v4468_v52 = vpop.eup %4467  ;;  %3923 = vmatmul.mubr.bf16.gmra.mrb[68].mxu1 %v1428_v42 }
 0x2b9   : > { %v4470_v54 = vpop.eup %4469  ;;  %3987 = vmatpush3.bf16.msra.mxu1 %v4285_v20 }
 0x2ba   : > { %v4472_v55 = vpop.eup %4471  ;;  %3988 = vmatprep.subr.bf16.mxu1 %v4286_v34 }
 0x2bb   : > { %v4474_v56 = vpop.eup %4473  ;;  %v3852_v57 = vpop.f32.mrb[12].mxu1  ;;  %v1430_v58 = vpack.c.bf16 %v4472_v55, %v4468_v52 }
 0x2bc   : > { %v1163_v59 = vadd.f32 %v3852_v57, %v5520_v53  ;;  %v1154_v60 = vpop.f32.mrb[13].mxu1  ;;  %v1429_v61 = vpack.c.bf16 %v4474_v56, %v4470_v54 }
 0x2bd   : > { %v1155_v62 = vadd.f32 %v1154_v60, %v5520_v53  ;;  %v3853_v63 = vpop.f32.mrb[14].mxu1  ;;  %3989 = vmatpush3.bf16.msra.mxu1 %v4286_v34 }
 0x2be   : > { %4475 = vtanh.f32 %v1163_v59  ;;  %v1166_v2 = vadd.f32 %v3853_v63, %v5520_v53  ;;  %v1157_v3 = vpop.f32.mrb[15].mxu1  ;;  %3926 = vmatprep.mubr.bf16.mxu1 %v1429_v61  ;;  %3990 = vmatprep.subr.bf16.mxu1 %v4287_v49 }
 0x2bf   : > { %4477 = vtanh.f32 %v1155_v62  ;;  %v1158_v4 = vadd.f32 %v1157_v3, %v5520_v53  ;;  %v4288_v3 = vld [vmem:[#allocation5 + $0x128] sm:$0xff]  }
 0x2c0   : > { %4479 = vtanh.f32 %v1166_v2  ;;  %3927 = vmatmul.mubr.bf16.gmra.mrb[72].mxu1 %v1430_v58 }
 0x2c1   : > { %4481 = vtanh.f32 %v1158_v4  ;;  %3991 = vmatpush3.bf16.msra.mxu1 %v4287_v49  ;;  %v4292_v49 = vld [vmem:[#allocation5 + $0x148] sm:$0xff]  }
 0x2c2   : > { %3992 = vmatprep.subr.bf16.mxu1 %v4288_v3 }
 0x2c5   : > { %3993 = vmatpush3.bf16.msra.mxu1 %v4288_v3 }
 0x2c8   : > { %v4476_v6 = vpop.eup %4475 }
 0x2c9   : > { %v4478_v7 = vpop.eup %4477 }
 0x2ca   : > { %v4480_v8 = vpop.eup %4479 }
 0x2cb   : > { %v4482_v9 = vpop.eup %4481  ;;  %v3856_v10 = vpop.f32.mrb[16].mxu1  ;;  %v1432_v11 = vpack.c.bf16 %v4480_v8, %v4476_v6 }
 0x2cc   : > { %v1179_v12 = vadd.f32 %v3856_v10, %v5520_v53  ;;  %v1170_v13 = vpop.f32.mrb[17].mxu1  ;;  %v1431_v14 = vpack.c.bf16 %v4482_v9, %v4478_v7 }
 0x2cd   : > { %v1171_v15 = vadd.f32 %v1170_v13, %v5520_v53  ;;  %v3857_v16 = vpop.f32.mrb[18].mxu1 }
 0x2ce   : > { %4483 = vtanh.f32 %v1179_v12  ;;  %v1182_v17 = vadd.f32 %v3857_v16, %v5520_v53  ;;  %v1173_v18 = vpop.f32.mrb[19].mxu1  ;;  %3930 = vmatprep.mubr.bf16.mxu1 %v1431_v14 }
 0x2cf   : > { %4485 = vtanh.f32 %v1171_v15  ;;  %v1174_v19 = vadd.f32 %v1173_v18, %v5520_v53  ;;  %3931 = vmatmul.mubr.bf16.gmra.mrb[76].mxu1 %v1432_v11 }
 0x2d0   : > { %4487 = vtanh.f32 %v1182_v17  ;;  %v4289_v17 = vld [vmem:[#allocation5 + $0x130] sm:$0xff]  }
 0x2d1   : > { %4489 = vtanh.f32 %v1174_v19  ;;  %3994 = vmatprep.subr.bf16.mxu1 %v4289_v17  ;;  %v4290_v19 = vld [vmem:[#allocation5 + $0x138] sm:$0xff]  }
 0x2d2   : > { %3995 = vmatpush3.bf16.msra.mxu1 %v4289_v17  ;;  %v4293_v17 = vld [vmem:[#allocation5 + $0x150] sm:$0xff]  }
 0x2d3   : > { %3996 = vmatprep.subr.bf16.mxu1 %v4290_v19 }
 0x2d6   : > { %3997 = vmatpush3.bf16.msra.mxu1 %v4290_v19 }
 0x2d8   : > { %v4484_v21 = vpop.eup %4483 }
 0x2d9   : > { %v4486_v22 = vpop.eup %4485 }
 0x2da   : > { %v4488_v23 = vpop.eup %4487 }
 0x2db   : > { %v4490_v24 = vpop.eup %4489  ;;  %v3860_v25 = vpop.f32.mrb[20].mxu1  ;;  %v1434_v26 = vpack.c.bf16 %v4488_v23, %v4484_v21 }
 0x2dc   : > { %v1195_v27 = vadd.f32 %v3860_v25, %v5520_v53  ;;  %v1186_v28 = vpop.f32.mrb[21].mxu1  ;;  %v1433_v29 = vpack.c.bf16 %v4490_v24, %v4486_v22  ;;  %v4291_v22 = vld [vmem:[#allocation5 + $0x140] sm:$0xff]  }
 0x2dd   : > { %v1187_v30 = vadd.f32 %v1186_v28, %v5520_v53  ;;  %v3861_v31 = vpop.f32.mrb[22].mxu1  ;;  %4062 = vmatprep.subr.bf16.mxu0 %v4291_v22 }
 0x2de   : > { %4491 = vtanh.f32 %v1195_v27  ;;  %v1198_v1 = vadd.f32 %v3861_v31, %v5520_v53  ;;  %v1189_v32 = vpop.f32.mrb[23].mxu1  ;;  %3934 = vmatprep.mubr.bf16.mxu1 %v1433_v29  ;;  %4063 = vmatpush3.bf16.msra.mxu0 %v4291_v22 }
 0x2df   : > { %4493 = vtanh.f32 %v1187_v30  ;;  %v1190_v33 = vadd.f32 %v1189_v32, %v5520_v53  ;;  %3935 = vmatmul.mubr.bf16.gmra.mrb[80].mxu1 %v1434_v26  ;;  %4064 = vmatprep.subr.bf16.mxu0 %v4292_v49 }
 0x2e0   : > { %4495 = vtanh.f32 %v1198_v1 }
 0x2e1   : > { %4497 = vtanh.f32 %v1190_v33 }
 0x2e2   : > { %4065 = vmatpush3.bf16.msra.mxu0 %v4292_v49 }
 0x2e3   : > { %4066 = vmatprep.subr.bf16.mxu0 %v4293_v17 }
 0x2e6   : > { %4067 = vmatpush3.bf16.msra.mxu0 %v4293_v17 }
 0x2e8   : > { %v4492_v35 = vpop.eup %4491 }
 0x2e9   : > { %v4494_v36 = vpop.eup %4493 }
 0x2ea   : > { %v4496_v37 = vpop.eup %4495 }
 0x2eb   : > { %v4498_v38 = vpop.eup %4497  ;;  %v3864_v39 = vpop.f32.mrb[24].mxu1  ;;  %v1436_v40 = vpack.c.bf16 %v4496_v37, %v4492_v35 }
 0x2ec   : > { %v1211_v41 = vadd.f32 %v3864_v39, %v5520_v53  ;;  %v1202_v42 = vpop.f32.mrb[25].mxu1  ;;  %v1435_v43 = vpack.c.bf16 %v4498_v38, %v4494_v36 }
 0x2ed   : > { %v1203_v44 = vadd.f32 %v1202_v42, %v5520_v53  ;;  %v3865_v45 = vpop.f32.mrb[26].mxu1 }
 0x2ee   : > { %4499 = vtanh.f32 %v1211_v41  ;;  %v1214_v46 = vadd.f32 %v3865_v45, %v5520_v53  ;;  %v1205_v47 = vpop.f32.mrb[27].mxu1  ;;  %3938 = vmatprep.mubr.bf16.mxu1 %v1435_v43 }
 0x2ef   : > { %4501 = vtanh.f32 %v1203_v44  ;;  %v1206_v48 = vadd.f32 %v1205_v47, %v5520_v53  ;;  %3939 = vmatmul.mubr.bf16.gmra.mrb[84].mxu1 %v1436_v40 }
 0x2f0   : > { %4503 = vtanh.f32 %v1214_v46 }
 0x2f1   : > { %4505 = vtanh.f32 %v1206_v48 }
 0x2f8   : > { %v4500_v50 = vpop.eup %4499 }
 0x2f9   : > { %v4502_v51 = vpop.eup %4501 }
 0x2fa   : > { %v4504_v52 = vpop.eup %4503 }
 0x2fb   : > { %v4506_v54 = vpop.eup %4505  ;;  %v3868_v55 = vpop.f32.mrb[28].mxu1  ;;  %v1438_v56 = vpack.c.bf16 %v4504_v52, %v4500_v50 }
 0x2fc   : > { %v1227_v57 = vadd.f32 %v3868_v55, %v5520_v53  ;;  %v1218_v58 = vpop.f32.mrb[29].mxu1  ;;  %v1437_v59 = vpack.c.bf16 %v4506_v54, %v4502_v51 }
 0x2fd   : > { %v1219_v60 = vadd.f32 %v1218_v58, %v5520_v53  ;;  %v3869_v61 = vpop.f32.mrb[30].mxu1 }
 0x2fe   : > { %4507 = vtanh.f32 %v1227_v57  ;;  %v1230_v62 = vadd.f32 %v3869_v61, %v5520_v53  ;;  %v1221_v63 = vpop.f32.mrb[31].mxu1  ;;  %3942 = vmatprep.mubr.bf16.mxu1 %v1437_v59 }
 0x2ff   : > { %4509 = vtanh.f32 %v1219_v60  ;;  %v1222_v2 = vadd.f32 %v1221_v63, %v5520_v53  ;;  %3943 = vmatmul.mubr.bf16.gmra.mrb[88].mxu1 %v1438_v56 }
 0x300   : > { %4511 = vtanh.f32 %v1230_v62 }
 0x301   : > { %4513 = vtanh.f32 %v1222_v2 }
 0x308   : > { %v4508_v4 = vpop.eup %4507 }
 0x309   : > { %v4510_v5 = vpop.eup %4509 }
 0x30a   : > { %v4512_v6 = vpop.eup %4511 }
 0x30b   : > { %v4514_v7 = vpop.eup %4513  ;;  %v3872_v8 = vpop.f32.mrb[32].mxu1  ;;  %v1440_v9 = vpack.c.bf16 %v4512_v6, %v4508_v4 }
 0x30c   : > { %v1243_v10 = vadd.f32 %v3872_v8, %v5520_v53  ;;  %v1234_v11 = vpop.f32.mrb[33].mxu1  ;;  %v1439_v12 = vpack.c.bf16 %v4514_v7, %v4510_v5 }
 0x30d   : > { %v1235_v13 = vadd.f32 %v1234_v11, %v5520_v53  ;;  %v3873_v14 = vpop.f32.mrb[34].mxu1 }
 0x30e   : > { %4515 = vtanh.f32 %v1243_v10  ;;  %v1246_v15 = vadd.f32 %v3873_v14, %v5520_v53  ;;  %v1237_v16 = vpop.f32.mrb[35].mxu1  ;;  %3946 = vmatprep.mubr.bf16.mxu1 %v1439_v12 }
 0x30f   : > { %4517 = vtanh.f32 %v1235_v13  ;;  %v1238_v18 = vadd.f32 %v1237_v16, %v5520_v53  ;;  %3947 = vmatmul.mubr.bf16.gmra.mrb[92].mxu1 %v1440_v9 }
 0x310   : > { %4519 = vtanh.f32 %v1246_v15 }
 0x311   : > { %4521 = vtanh.f32 %v1238_v18 }
 0x318   : > { %v4516_v20 = vpop.eup %4515 }
 0x319   : > { %v4518_v21 = vpop.eup %4517 }
 0x31a   : > { %v4520_v23 = vpop.eup %4519 }
 0x31b   : > { %v4522_v24 = vpop.eup %4521  ;;  %v3876_v25 = vpop.f32.mrb[36].mxu1  ;;  %v1442_v26 = vpack.c.bf16 %v4520_v23, %v4516_v20 }
 0x31c   : > { %v1259_v27 = vadd.f32 %v3876_v25, %v5520_v53  ;;  %v1250_v28 = vpop.f32.mrb[37].mxu1  ;;  %v1441_v29 = vpack.c.bf16 %v4522_v24, %v4518_v21 }
 0x31d   : > { %v1251_v30 = vadd.f32 %v1250_v28, %v5520_v53  ;;  %v3877_v31 = vpop.f32.mrb[38].mxu1 }
 0x31e   : > { %4523 = vtanh.f32 %v1259_v27  ;;  %v1262_v1 = vadd.f32 %v3877_v31, %v5520_v53  ;;  %v1253_v32 = vpop.f32.mrb[39].mxu1  ;;  %3950 = vmatprep.mubr.bf16.mxu1 %v1441_v29 }
 0x31f   : > { %4525 = vtanh.f32 %v1251_v30  ;;  %v1254_v33 = vadd.f32 %v1253_v32, %v5520_v53  ;;  %3951 = vmatmul.mubr.bf16.gmra.mrb[96].mxu1 %v1442_v26 }
 0x320   : > { %4527 = vtanh.f32 %v1262_v1 }
 0x321   : > { %4529 = vtanh.f32 %v1254_v33 }
 0x328   : > { %v4524_v34 = vpop.eup %4523 }
 0x329   : > { %v4526_v35 = vpop.eup %4525 }
 0x32a   : > { %v4528_v36 = vpop.eup %4527 }
 0x32b   : > { %v4530_v37 = vpop.eup %4529  ;;  %v3880_v38 = vpop.f32.mrb[40].mxu1  ;;  %v1444_v39 = vpack.c.bf16 %v4528_v36, %v4524_v34 }
 0x32c   : > { %v1275_v40 = vadd.f32 %v3880_v38, %v5520_v53  ;;  %v1266_v41 = vpop.f32.mrb[41].mxu1  ;;  %v1443_v42 = vpack.c.bf16 %v4530_v37, %v4526_v35 }
 0x32d   : > { %v1267_v43 = vadd.f32 %v1266_v41, %v5520_v53  ;;  %v3881_v44 = vpop.f32.mrb[42].mxu1 }
 0x32e   : > { %4531 = vtanh.f32 %v1275_v40  ;;  %v1278_v45 = vadd.f32 %v3881_v44, %v5520_v53  ;;  %v1269_v46 = vpop.f32.mrb[43].mxu1  ;;  %3954 = vmatprep.mubr.bf16.mxu1 %v1443_v42 }
 0x32f   : > { %4533 = vtanh.f32 %v1267_v43  ;;  %v1270_v47 = vadd.f32 %v1269_v46, %v5520_v53  ;;  %3955 = vmatmul.mubr.bf16.gmra.mrb[100].mxu1 %v1444_v39 }
 0x330   : > { %4535 = vtanh.f32 %v1278_v45  ;;  %v4294_v45 = vld [vmem:[#allocation5 + $0x158] sm:$0xff]  }
 0x331   : > { %4537 = vtanh.f32 %v1270_v47  ;;  %4068 = vmatprep.subr.bf16.mxu0 %v4294_v45 }
 0x332   : > { %4069 = vmatpush3.bf16.msra.mxu0 %v4294_v45 }
 0x338   : > { %v4532_v48 = vpop.eup %4531 }
 0x339   : > { %v4534_v50 = vpop.eup %4533 }
 0x33a   : > { %v4536_v51 = vpop.eup %4535 }
 0x33b   : > { %v4538_v52 = vpop.eup %4537  ;;  %v3884_v54 = vpop.f32.mrb[44].mxu1  ;;  %v1446_v55 = vpack.c.bf16 %v4536_v51, %v4532_v48 }
 0x33c   : > { %v1291_v56 = vadd.f32 %v3884_v54, %v5520_v53  ;;  %v1282_v57 = vpop.f32.mrb[45].mxu1  ;;  %v1445_v58 = vpack.c.bf16 %v4538_v52, %v4534_v50 }
 0x33d   : > { %v1283_v59 = vadd.f32 %v1282_v57, %v5520_v53  ;;  %v3885_v60 = vpop.f32.mrb[46].mxu1 }
 0x33e   : > { %4539 = vtanh.f32 %v1291_v56  ;;  %v1294_v61 = vadd.f32 %v3885_v60, %v5520_v53  ;;  %v1285_v62 = vpop.f32.mrb[47].mxu1  ;;  %3958 = vmatprep.mubr.bf16.mxu1 %v1445_v58  ;;  %v5591_v60 = vld [vmem:[#allocation8 + $0x10] ss:$0 sm:$0xff] }
 0x33f   : > { %4541 = vtanh.f32 %v1283_v59  ;;  %v1286_v63 = vadd.f32 %v1285_v62, %v5520_v53  ;;  %3959 = vmatmul.mubr.bf16.gmra.mrb[104].mxu1 %v1446_v55 }
 0x340   : > { %4543 = vtanh.f32 %v1294_v61 }
 0x341   : > { %4545 = vtanh.f32 %v1286_v63 }
 0x348   : > { %v4540_v2 = vpop.eup %4539 }
 0x349   : > { %v4542_v3 = vpop.eup %4541 }
 0x34a   : > { %v4544_v4 = vpop.eup %4543 }
 0x34b   : > { %v4546_v5 = vpop.eup %4545  ;;  %v3888_v6 = vpop.f32.mrb[48].mxu1  ;;  %v1448_v7 = vpack.c.bf16 %v4544_v4, %v4540_v2 }
 0x34c   : > { %v1307_v8 = vadd.f32 %v3888_v6, %v5520_v53  ;;  %v1298_v9 = vpop.f32.mrb[49].mxu1  ;;  %v1447_v10 = vpack.c.bf16 %v4546_v5, %v4542_v3 }
 0x34d   : > { %v1299_v11 = vadd.f32 %v1298_v9, %v5520_v53  ;;  %v3889_v12 = vpop.f32.mrb[50].mxu1 }
 0x34e   : > { %4547 = vtanh.f32 %v1307_v8  ;;  %v1310_v13 = vadd.f32 %v3889_v12, %v5520_v53  ;;  %v1301_v14 = vpop.f32.mrb[51].mxu1  ;;  %3962 = vmatprep.mubr.bf16.mxu1 %v1447_v10 }
 0x34f   : > { %4549 = vtanh.f32 %v1299_v11  ;;  %v1302_v15 = vadd.f32 %v1301_v14, %v5520_v53  ;;  %3963 = vmatmul.mubr.bf16.gmra.mrb[108].mxu1 %v1448_v7 }
 0x350   : > { %4551 = vtanh.f32 %v1310_v13 }
 0x351   : > { %4553 = vtanh.f32 %v1302_v15 }
 0x358   : > { %v4548_v16 = vpop.eup %4547 }
 0x359   : > { %v4550_v18 = vpop.eup %4549 }
 0x35a   : > { %v4552_v19 = vpop.eup %4551 }
 0x35b   : > { %v4554_v20 = vpop.eup %4553  ;;  %v3892_v21 = vpop.f32.mrb[52].mxu1  ;;  %v1450_v22 = vpack.c.bf16 %v4552_v19, %v4548_v16 }
 0x35c   : > { %v1323_v23 = vadd.f32 %v3892_v21, %v5520_v53  ;;  %v1314_v24 = vpop.f32.mrb[53].mxu1  ;;  %v1449_v25 = vpack.c.bf16 %v4554_v20, %v4550_v18 }
 0x35d   : > { %v1315_v26 = vadd.f32 %v1314_v24, %v5520_v53  ;;  %v3893_v27 = vpop.f32.mrb[54].mxu1 }
 0x35e   : > { %4555 = vtanh.f32 %v1323_v23  ;;  %v1326_v28 = vadd.f32 %v3893_v27, %v5520_v53  ;;  %v1317_v29 = vpop.f32.mrb[55].mxu1  ;;  %3966 = vmatprep.mubr.bf16.mxu1 %v1449_v25 }
 0x35f   : > { %4557 = vtanh.f32 %v1315_v26  ;;  %v1318_v30 = vadd.f32 %v1317_v29, %v5520_v53  ;;  %3967 = vmatmul.mubr.bf16.gmra.mrb[112].mxu1 %v1450_v22 }
 0x360   : > { %4559 = vtanh.f32 %v1326_v28 }
 0x361   : > { %4561 = vtanh.f32 %v1318_v30 }
 0x368   : > { %v4556_v31 = vpop.eup %4555 }
 0x369   : > { %v4558_v1 = vpop.eup %4557 }
 0x36a   : > { %v4560_v32 = vpop.eup %4559 }
 0x36b   : > { %v4562_v33 = vpop.eup %4561  ;;  %v3896_v34 = vpop.f32.mrb[56].mxu1  ;;  %v1452_v35 = vpack.c.bf16 %v4560_v32, %v4556_v31  ;;  %v4295_v32 = vld [vmem:[#allocation5 + $0x160] sm:$0xff]  }
 0x36c   : > { %v1339_v36 = vadd.f32 %v3896_v34, %v5520_v53  ;;  %v1330_v37 = vpop.f32.mrb[57].mxu1  ;;  %v1451_v38 = vpack.c.bf16 %v4562_v33, %v4558_v1  ;;  %4070 = vmatprep.subr.bf16.mxu0 %v4295_v32 }
 0x36d   : > { %v1331_v39 = vadd.f32 %v1330_v37, %v5520_v53  ;;  %v3897_v40 = vpop.f32.mrb[58].mxu1  ;;  %4071 = vmatpush3.bf16.msra.mxu0 %v4295_v32 }
 0x36e   : > { %4563 = vtanh.f32 %v1339_v36  ;;  %v1342_v41 = vadd.f32 %v3897_v40, %v5520_v53  ;;  %v1333_v42 = vpop.f32.mrb[59].mxu1  ;;  %3970 = vmatprep.mubr.bf16.mxu1 %v1451_v38 }
 0x36f   : > { %4565 = vtanh.f32 %v1331_v39  ;;  %v1334_v43 = vadd.f32 %v1333_v42, %v5520_v53  ;;  %3971 = vmatmul.mubr.bf16.gmra.mrb[116].mxu1 %v1452_v35 }
 0x370   : > { %4567 = vtanh.f32 %v1342_v41 }
 0x371   : > { %4569 = vtanh.f32 %v1334_v43 }
 0x378   : > { %v4564_v44 = vpop.eup %4563 }
 0x379   : > { %v4566_v46 = vpop.eup %4565 }
 0x37a   : > { %v4568_v47 = vpop.eup %4567 }
 0x37b   : > { %v4570_v48 = vpop.eup %4569  ;;  %v3900_v49 = vpop.f32.mrb[60].mxu1  ;;  %v1454_v50 = vpack.c.bf16 %v4568_v47, %v4564_v44 }
 0x37c   : > { %v1355_v51 = vadd.f32 %v3900_v49, %v5520_v53  ;;  %v1346_v52 = vpop.f32.mrb[61].mxu1  ;;  %v1453_v54 = vpack.c.bf16 %v4570_v48, %v4566_v46 }
 0x37d   : > { %v1347_v55 = vadd.f32 %v1346_v52, %v5520_v53  ;;  %v3901_v56 = vpop.f32.mrb[62].mxu1 }
 0x37e   : > { %4571 = vtanh.f32 %v1355_v51  ;;  %v1358_v57 = vadd.f32 %v3901_v56, %v5520_v53  ;;  %v1349_v58 = vpop.f32.mrb[63].mxu1  ;;  %3974 = vmatprep.mubr.bf16.mxu1 %v1453_v54 }
 0x37f   : > { %4573 = vtanh.f32 %v1347_v55  ;;  %v1350_v59 = vadd.f32 %v1349_v58, %v5520_v53  ;;  %3975 = vmatmul.mubr.bf16.gmra.mrb[120].mxu1 %v1454_v50  ;;  %v4296_v55 = vld [vmem:[#allocation5 + $0x168] sm:$0xff]  }
 0x380   : > { %4575 = vtanh.f32 %v1358_v57  ;;  %4072 = vmatprep.subr.bf16.mxu0 %v4296_v55 }
 0x381   : > { %4577 = vtanh.f32 %v1350_v59  ;;  %4073 = vmatpush3.bf16.msra.mxu0 %v4296_v55 }
 0x383   : > { %v3920_v61 = vpop.f32.mrb[64].mxu1 }
 0x384   : > { %v1565_v62 = vadd.f32 %v3920_v61, %v5591_v60  ;;  %v1556_v63 = vpop.f32.mrb[65].mxu1 }
 0x385   : > { %v1557_v2 = vadd.f32 %v1556_v63, %v5591_v60  ;;  %v3921_v3 = vpop.f32.mrb[66].mxu1 }
 0x386   : > { %1813 = vst [vmem:[%s5595_s26 + $0x10] sm:$0xff] %v1565_v62  ;;  %v1568_v53 = vadd.f32 %v3921_v3, %v5591_v60  ;;  %v1559_v4 = vpop.f32.mrb[67].mxu1 }
 0x387   : > { %1811 = vst [vmem:[%s5595_s26] sm:$0xff] %v1557_v2  ;;  %v1560_v5 = vadd.f32 %v1559_v4, %v5591_v60 }
 0x388   : > { %v4572_v6 = vpop.eup %4571  ;;  %1814 = vst [vmem:[%s5595_s26 + $0x18] sm:$0xff] %v1568_v53  ;;  %v1876_v7 = vpack.c.bf16 %v1568_v53, %v1565_v62 }
 0x389   : > { %v4574_v8 = vpop.eup %4573  ;;  %1812 = vst [vmem:[%s5595_s26 + $0x8] sm:$0xff] %v1560_v5  ;;  %v1875_v9 = vpack.c.bf16 %v1560_v5, %v1557_v2 }
 0x38a   : > { %v4576_v10 = vpop.eup %4575 }
 0x38b   : > { %v4578_v11 = vpop.eup %4577  ;;  %v3924_v12 = vpop.f32.mrb[68].mxu1  ;;  %v1456_v13 = vpack.c.bf16 %v4576_v10, %v4572_v6 }
 0x38c   : > { %v1581_v14 = vadd.f32 %v3924_v12, %v5591_v60  ;;  %v1572_v15 = vpop.f32.mrb[69].mxu1  ;;  %v1455_v16 = vpack.c.bf16 %v4578_v11, %v4574_v8 }
 0x38d   : > { %v1573_v17 = vadd.f32 %v1572_v15, %v5591_v60  ;;  %v3925_v18 = vpop.f32.mrb[70].mxu1 }
 0x38e   : > { %1817 = vst [vmem:[%s5595_s26 + $0x30] sm:$0xff] %v1581_v14  ;;  %v1584_v19 = vadd.f32 %v3925_v18, %v5591_v60  ;;  %v1575_v20 = vpop.f32.mrb[71].mxu1  ;;  %3978 = vmatprep.mubr.bf16.mxu1 %v1455_v16 }
 0x38f   : > { %1815 = vst [vmem:[%s5595_s26 + $0x20] sm:$0xff] %v1573_v17  ;;  %v1576_v21 = vadd.f32 %v1575_v20, %v5591_v60  ;;  %3979 = vmatmul.mubr.bf16.gmra.mrb[124].mxu1 %v1456_v13 }
 0x390   : > { %1818 = vst [vmem:[%s5595_s26 + $0x38] sm:$0xff] %v1584_v19  ;;  %v1878_v22 = vpack.c.bf16 %v1584_v19, %v1581_v14  ;;  %3998 = vmatprep.mubr.bf16.mxu1 %v1875_v9  ;;  %v4297_v14 = vld [vmem:[#allocation5 + $0x170] sm:$0xff]  }
 0x391   : > { %1816 = vst [vmem:[%s5595_s26 + $0x28] sm:$0xff] %v1576_v21  ;;  %v1877_v23 = vpack.c.bf16 %v1576_v21, %v1573_v17  ;;  %4074 = vmatprep.subr.bf16.mxu0 %v4297_v14 }
 0x392   : > { %4075 = vmatpush3.bf16.msra.mxu0 %v4297_v14 }
 0x393   : > { %v3928_v24 = vpop.f32.mrb[72].mxu1 }
 0x394   : > { %v1597_v25 = vadd.f32 %v3928_v24, %v5591_v60  ;;  %v1588_v26 = vpop.f32.mrb[73].mxu1 }
 0x395   : > { %v1589_v27 = vadd.f32 %v1588_v26, %v5591_v60  ;;  %v3929_v28 = vpop.f32.mrb[74].mxu1 }
 0x396   : > { %1821 = vst [vmem:[%s5595_s26 + $0x50] sm:$0xff] %v1597_v25  ;;  %v1600_v29 = vadd.f32 %v3929_v28, %v5591_v60  ;;  %v1591_v30 = vpop.f32.mrb[75].mxu1 }
 0x397   : > { %1819 = vst [vmem:[%s5595_s26 + $0x40] sm:$0xff] %v1589_v27  ;;  %v1592_v31 = vadd.f32 %v1591_v30, %v5591_v60  ;;  %3999 = vmatmul.mubr.bf16.vlgmr.msra.gmra.mrb[128].mxu1 %v1876_v7 }
 0x398   : > { %1822 = vst [vmem:[%s5595_s26 + $0x58] sm:$0xff] %v1600_v29  ;;  %v1880_v1 = vpack.c.bf16 %v1600_v29, %v1597_v25  ;;  %4002 = vmatprep.mubr.bf16.mxu1 %v1877_v23 }
 0x399   : > { %1820 = vst [vmem:[%s5595_s26 + $0x48] sm:$0xff] %v1592_v31  ;;  %v1879_v33 = vpack.c.bf16 %v1592_v31, %v1589_v27 }
 0x39f   : > { %4003 = vmatmul.mubr.bf16.gmra.mrb[132].mxu1 %v1878_v22 }
 0x3a0   : > { %4006 = vmatprep.mubr.bf16.mxu1 %v1879_v33 }
 0x3a2   : > { %v3932_v34 = vpop.f32.mrb[76].mxu1 }
 0x3a3   : > { %v1613_v35 = vadd.f32 %v3932_v34, %v5591_v60  ;;  %v1604_v36 = vpop.f32.mrb[77].mxu1  ;;  %v4298_v34 = vld [vmem:[#allocation5 + $0x178] sm:$0xff]  }
 0x3a4   : > { %v1605_v37 = vadd.f32 %v1604_v36, %v5591_v60  ;;  %v3933_v38 = vpop.f32.mrb[78].mxu1  ;;  %4076 = vmatprep.subr.bf16.mxu0 %v4298_v34 }
 0x3a5   : > { %1825 = vst [vmem:[%s5595_s26 + $0x70] sm:$0xff] %v1613_v35  ;;  %v1616_v39 = vadd.f32 %v3933_v38, %v5591_v60  ;;  %v1607_v40 = vpop.f32.mrb[79].mxu1  ;;  %4077 = vmatpush3.bf16.msra.mxu0 %v4298_v34 }
 0x3a6   : > { %1823 = vst [vmem:[%s5595_s26 + $0x60] sm:$0xff] %v1605_v37  ;;  %v1608_v41 = vadd.f32 %v1607_v40, %v5591_v60 }
 0x3a7   : > { %1826 = vst [vmem:[%s5595_s26 + $0x78] sm:$0xff] %v1616_v39  ;;  %v1882_v42 = vpack.c.bf16 %v1616_v39, %v1613_v35  ;;  %4007 = vmatmul.mubr.bf16.gmra.mrb[136].mxu1 %v1880_v1 }
 0x3a8   : > { %1824 = vst [vmem:[%s5595_s26 + $0x68] sm:$0xff] %v1608_v41  ;;  %v1881_v43 = vpack.c.bf16 %v1608_v41, %v1605_v37 }
 0x3aa   : > { %4010 = vmatprep.mubr.bf16.mxu1 %v1881_v43 }
 0x3af   : > { %4011 = vmatmul.mubr.bf16.gmra.mrb[140].mxu1 %v1882_v42 }
 0x3b2   : > { %v3936_v44 = vpop.f32.mrb[80].mxu1 }
 0x3b3   : > { %v1629_v45 = vadd.f32 %v3936_v44, %v5591_v60  ;;  %v1620_v46 = vpop.f32.mrb[81].mxu1 }
 0x3b4   : > { %v1621_v47 = vadd.f32 %v1620_v46, %v5591_v60  ;;  %v3937_v48 = vpop.f32.mrb[82].mxu1 }
 0x3b5   : > { %1829 = vst [vmem:[%s5595_s26 + $0x90] sm:$0xff] %v1629_v45  ;;  %v1632_v49 = vadd.f32 %v3937_v48, %v5591_v60  ;;  %v1623_v50 = vpop.f32.mrb[83].mxu1 }
 0x3b6   : > { %1827 = vst [vmem:[%s5595_s26 + $0x80] sm:$0xff] %v1621_v47  ;;  %v1624_v51 = vadd.f32 %v1623_v50, %v5591_v60 }
 0x3b7   : > { %1830 = vst [vmem:[%s5595_s26 + $0x98] sm:$0xff] %v1632_v49  ;;  %v1884_v52 = vpack.c.bf16 %v1632_v49, %v1629_v45 }
 0x3b8   : > { %1828 = vst [vmem:[%s5595_s26 + $0x88] sm:$0xff] %v1624_v51  ;;  %v1883_v54 = vpack.c.bf16 %v1624_v51, %v1621_v47 }
 0x3ba   : > { %4014 = vmatprep.mubr.bf16.mxu1 %v1883_v54 }
 0x3bb   : > { %4015 = vmatmul.mubr.bf16.gmra.mrb[144].mxu1 %v1884_v52 }
 0x3c2   : > { %v3940_v56 = vpop.f32.mrb[84].mxu1 }
 0x3c3   : > { %v1645_v57 = vadd.f32 %v3940_v56, %v5591_v60  ;;  %v1636_v58 = vpop.f32.mrb[85].mxu1 }
 0x3c4   : > { %v1637_v59 = vadd.f32 %v1636_v58, %v5591_v60  ;;  %v3941_v61 = vpop.f32.mrb[86].mxu1 }
 0x3c5   : > { %1833 = vst [vmem:[%s5595_s26 + $0xb0] sm:$0xff] %v1645_v57  ;;  %v1648_v62 = vadd.f32 %v3941_v61, %v5591_v60  ;;  %v1639_v63 = vpop.f32.mrb[87].mxu1 }
 0x3c6   : > { %1831 = vst [vmem:[%s5595_s26 + $0xa0] sm:$0xff] %v1637_v59  ;;  %v1640_v2 = vadd.f32 %v1639_v63, %v5591_v60 }
 0x3c7   : > { %1834 = vst [vmem:[%s5595_s26 + $0xb8] sm:$0xff] %v1648_v62  ;;  %v1886_v3 = vpack.c.bf16 %v1648_v62, %v1645_v57 }
 0x3c8   : > { %1832 = vst [vmem:[%s5595_s26 + $0xa8] sm:$0xff] %v1640_v2  ;;  %v1885_v53 = vpack.c.bf16 %v1640_v2, %v1637_v59 }
 0x3ca   : > { %4018 = vmatprep.mubr.bf16.mxu1 %v1885_v53 }
 0x3cb   : > { %4019 = vmatmul.mubr.bf16.gmra.mrb[148].mxu1 %v1886_v3 }
 0x3d2   : > { %v3944_v4 = vpop.f32.mrb[88].mxu1 }
 0x3d3   : > { %v1661_v5 = vadd.f32 %v3944_v4, %v5591_v60  ;;  %v1652_v6 = vpop.f32.mrb[89].mxu1 }
 0x3d4   : > { %v1653_v7 = vadd.f32 %v1652_v6, %v5591_v60  ;;  %v3945_v8 = vpop.f32.mrb[90].mxu1 }
 0x3d5   : > { %1837 = vst [vmem:[%s5595_s26 + $0xd0] sm:$0xff] %v1661_v5  ;;  %v1664_v9 = vadd.f32 %v3945_v8, %v5591_v60  ;;  %v1655_v10 = vpop.f32.mrb[91].mxu1 }
 0x3d6   : > { %1835 = vst [vmem:[%s5595_s26 + $0xc0] sm:$0xff] %v1653_v7  ;;  %v1656_v11 = vadd.f32 %v1655_v10, %v5591_v60 }
 0x3d7   : > { %1838 = vst [vmem:[%s5595_s26 + $0xd8] sm:$0xff] %v1664_v9  ;;  %v1888_v12 = vpack.c.bf16 %v1664_v9, %v1661_v5 }
 0x3d8   : > { %1836 = vst [vmem:[%s5595_s26 + $0xc8] sm:$0xff] %v1656_v11  ;;  %v1887_v13 = vpack.c.bf16 %v1656_v11, %v1653_v7 }
 0x3da   : > { %4022 = vmatprep.mubr.bf16.mxu1 %v1887_v13 }
 0x3db   : > { %4023 = vmatmul.mubr.bf16.gmra.mrb[152].mxu1 %v1888_v12 }
 0x3e2   : > { %v3948_v15 = vpop.f32.mrb[92].mxu1 }
 0x3e3   : > { %v1677_v16 = vadd.f32 %v3948_v15, %v5591_v60  ;;  %v1668_v17 = vpop.f32.mrb[93].mxu1 }
 0x3e4   : > { %v1669_v18 = vadd.f32 %v1668_v17, %v5591_v60  ;;  %v3949_v19 = vpop.f32.mrb[94].mxu1 }
 0x3e5   : > { %1841 = vst [vmem:[%s5595_s26 + $0xf0] sm:$0xff] %v1677_v16  ;;  %v1680_v20 = vadd.f32 %v3949_v19, %v5591_v60  ;;  %v1671_v21 = vpop.f32.mrb[95].mxu1 }
 0x3e6   : > { %1839 = vst [vmem:[%s5595_s26 + $0xe0] sm:$0xff] %v1669_v18  ;;  %v1672_v22 = vadd.f32 %v1671_v21, %v5591_v60 }
 0x3e7   : > { %1842 = vst [vmem:[%s5595_s26 + $0xf8] sm:$0xff] %v1680_v20  ;;  %v1890_v23 = vpack.c.bf16 %v1680_v20, %v1677_v16 }
 0x3e8   : > { %1840 = vst [vmem:[%s5595_s26 + $0xe8] sm:$0xff] %v1672_v22  ;;  %v1889_v24 = vpack.c.bf16 %v1672_v22, %v1669_v18 }
 0x3ea   : > { %4026 = vmatprep.mubr.bf16.mxu1 %v1889_v24 }
 0x3eb   : > { %4027 = vmatmul.mubr.bf16.gmra.mrb[156].mxu1 %v1890_v23 }
 0x3f2   : > { %v3952_v25 = vpop.f32.mrb[96].mxu1 }
 0x3f3   : > { %v1693_v26 = vadd.f32 %v3952_v25, %v5591_v60  ;;  %v1684_v27 = vpop.f32.mrb[97].mxu1 }
 0x3f4   : > { %v1685_v28 = vadd.f32 %v1684_v27, %v5591_v60  ;;  %v3953_v29 = vpop.f32.mrb[98].mxu1 }
 0x3f5   : > { %1845 = vst [vmem:[%s5595_s26 + $0x110] sm:$0xff] %v1693_v26  ;;  %v1696_v30 = vadd.f32 %v3953_v29, %v5591_v60  ;;  %v1687_v31 = vpop.f32.mrb[99].mxu1 }
 0x3f6   : > { %1843 = vst [vmem:[%s5595_s26 + $0x100] sm:$0xff] %v1685_v28  ;;  %v1688_v1 = vadd.f32 %v1687_v31, %v5591_v60 }
 0x3f7   : > { %1846 = vst [vmem:[%s5595_s26 + $0x118] sm:$0xff] %v1696_v30  ;;  %v1892_v32 = vpack.c.bf16 %v1696_v30, %v1693_v26 }
 0x3f8   : > { %1844 = vst [vmem:[%s5595_s26 + $0x108] sm:$0xff] %v1688_v1  ;;  %v1891_v33 = vpack.c.bf16 %v1688_v1, %v1685_v28 }
 0x3fa   : > { %4030 = vmatprep.mubr.bf16.mxu1 %v1891_v33 }
 0x3fb   : > { %4031 = vmatmul.mubr.bf16.gmra.mrb[160].mxu1 %v1892_v32 }
 0x402   : > { %v3956_v35 = vpop.f32.mrb[100].mxu1 }
 0x403   : > { %v1709_v36 = vadd.f32 %v3956_v35, %v5591_v60  ;;  %v1700_v37 = vpop.f32.mrb[101].mxu1 }
 0x404   : > { %v1701_v38 = vadd.f32 %v1700_v37, %v5591_v60  ;;  %v3957_v39 = vpop.f32.mrb[102].mxu1 }
 0x405   : > { %1849 = vst [vmem:[%s5595_s26 + $0x130] sm:$0xff] %v1709_v36  ;;  %v1712_v40 = vadd.f32 %v3957_v39, %v5591_v60  ;;  %v1703_v41 = vpop.f32.mrb[103].mxu1 }
 0x406   : > { %1847 = vst [vmem:[%s5595_s26 + $0x120] sm:$0xff] %v1701_v38  ;;  %v1704_v42 = vadd.f32 %v1703_v41, %v5591_v60 }
 0x407   : > { %1850 = vst [vmem:[%s5595_s26 + $0x138] sm:$0xff] %v1712_v40  ;;  %v1894_v43 = vpack.c.bf16 %v1712_v40, %v1709_v36 }
 0x408   : > { %1848 = vst [vmem:[%s5595_s26 + $0x128] sm:$0xff] %v1704_v42  ;;  %v1893_v44 = vpack.c.bf16 %v1704_v42, %v1701_v38 }
 0x40a   : > { %4034 = vmatprep.mubr.bf16.mxu1 %v1893_v44 }
 0x40b   : > { %4035 = vmatmul.mubr.bf16.gmra.mrb[164].mxu1 %v1894_v43  ;;  %v5723_v43 = vld [vmem:[#allocation8 + $0x18] ss:$0 sm:$0xff] }
 0x412   : > { %v3960_v45 = vpop.f32.mrb[104].mxu1 }
 0x413   : > { %v1725_v46 = vadd.f32 %v3960_v45, %v5591_v60  ;;  %v1716_v47 = vpop.f32.mrb[105].mxu1 }
 0x414   : > { %v1717_v48 = vadd.f32 %v1716_v47, %v5591_v60  ;;  %v3961_v49 = vpop.f32.mrb[106].mxu1 }
 0x415   : > { %1853 = vst [vmem:[%s5595_s26 + $0x150] sm:$0xff] %v1725_v46  ;;  %v1728_v50 = vadd.f32 %v3961_v49, %v5591_v60  ;;  %v1719_v51 = vpop.f32.mrb[107].mxu1 }
 0x416   : > { %1851 = vst [vmem:[%s5595_s26 + $0x140] sm:$0xff] %v1717_v48  ;;  %v1720_v52 = vadd.f32 %v1719_v51, %v5591_v60 }
 0x417   : > { %1854 = vst [vmem:[%s5595_s26 + $0x158] sm:$0xff] %v1728_v50  ;;  %v1896_v54 = vpack.c.bf16 %v1728_v50, %v1725_v46 }
 0x418   : > { %1852 = vst [vmem:[%s5595_s26 + $0x148] sm:$0xff] %v1720_v52  ;;  %v1895_v55 = vpack.c.bf16 %v1720_v52, %v1717_v48 }
 0x41a   : > { %4038 = vmatprep.mubr.bf16.mxu1 %v1895_v55 }
 0x41b   : > { %4039 = vmatmul.mubr.bf16.gmra.mrb[168].mxu1 %v1896_v54 }
 0x422   : > { %v3964_v56 = vpop.f32.mrb[108].mxu1 }
 0x423   : > { %v1741_v57 = vadd.f32 %v3964_v56, %v5591_v60  ;;  %v1732_v58 = vpop.f32.mrb[109].mxu1 }
 0x424   : > { %v1733_v59 = vadd.f32 %v1732_v58, %v5591_v60  ;;  %v3965_v61 = vpop.f32.mrb[110].mxu1 }
 0x425   : > { %1857 = vst [vmem:[%s5595_s26 + $0x170] sm:$0xff] %v1741_v57  ;;  %v1744_v62 = vadd.f32 %v3965_v61, %v5591_v60  ;;  %v1735_v63 = vpop.f32.mrb[111].mxu1 }
 0x426   : > { %1855 = vst [vmem:[%s5595_s26 + $0x160] sm:$0xff] %v1733_v59  ;;  %v1736_v2 = vadd.f32 %v1735_v63, %v5591_v60 }
 0x427   : > { %1858 = vst [vmem:[%s5595_s26 + $0x178] sm:$0xff] %v1744_v62  ;;  %v1898_v3 = vpack.c.bf16 %v1744_v62, %v1741_v57 }
 0x428   : > { %1856 = vst [vmem:[%s5595_s26 + $0x168] sm:$0xff] %v1736_v2  ;;  %v1897_v53 = vpack.c.bf16 %v1736_v2, %v1733_v59 }
 0x42a   : > { %4042 = vmatprep.mubr.bf16.mxu1 %v1897_v53 }
 0x42b   : > { %4043 = vmatmul.mubr.bf16.gmra.mrb[172].mxu1 %v1898_v3 }
 0x432   : > { %v3968_v4 = vpop.f32.mrb[112].mxu1 }
 0x433   : > { %v1757_v5 = vadd.f32 %v3968_v4, %v5591_v60  ;;  %v1748_v6 = vpop.f32.mrb[113].mxu1 }
 0x434   : > { %v1749_v7 = vadd.f32 %v1748_v6, %v5591_v60  ;;  %v3969_v8 = vpop.f32.mrb[114].mxu1 }
 0x435   : > { %1861 = vst [vmem:[%s5595_s26 + $0x190] sm:$0xff] %v1757_v5  ;;  %v1760_v9 = vadd.f32 %v3969_v8, %v5591_v60  ;;  %v1751_v10 = vpop.f32.mrb[115].mxu1 }
 0x436   : > { %1859 = vst [vmem:[%s5595_s26 + $0x180] sm:$0xff] %v1749_v7  ;;  %v1752_v11 = vadd.f32 %v1751_v10, %v5591_v60 }
 0x437   : > { %1862 = vst [vmem:[%s5595_s26 + $0x198] sm:$0xff] %v1760_v9  ;;  %v1900_v12 = vpack.c.bf16 %v1760_v9, %v1757_v5 }
 0x438   : > { %1860 = vst [vmem:[%s5595_s26 + $0x188] sm:$0xff] %v1752_v11  ;;  %v1899_v13 = vpack.c.bf16 %v1752_v11, %v1749_v7 }
 0x43a   : > { %4046 = vmatprep.mubr.bf16.mxu1 %v1899_v13 }
 0x43b   : > { %4047 = vmatmul.mubr.bf16.gmra.mrb[176].mxu1 %v1900_v12 }
 0x442   : > { %v3972_v14 = vpop.f32.mrb[116].mxu1 }
 0x443   : > { %v1773_v15 = vadd.f32 %v3972_v14, %v5591_v60  ;;  %v1764_v16 = vpop.f32.mrb[117].mxu1 }
 0x444   : > { %v1765_v17 = vadd.f32 %v1764_v16, %v5591_v60  ;;  %v3973_v18 = vpop.f32.mrb[118].mxu1 }
 0x445   : > { %1865 = vst [vmem:[%s5595_s26 + $0x1b0] sm:$0xff] %v1773_v15  ;;  %v1776_v19 = vadd.f32 %v3973_v18, %v5591_v60  ;;  %v1767_v20 = vpop.f32.mrb[119].mxu1 }
 0x446   : > { %1863 = vst [vmem:[%s5595_s26 + $0x1a0] sm:$0xff] %v1765_v17  ;;  %v1768_v21 = vadd.f32 %v1767_v20, %v5591_v60 }
 0x447   : > { %1866 = vst [vmem:[%s5595_s26 + $0x1b8] sm:$0xff] %v1776_v19  ;;  %v1902_v22 = vpack.c.bf16 %v1776_v19, %v1773_v15 }
 0x448   : > { %1864 = vst [vmem:[%s5595_s26 + $0x1a8] sm:$0xff] %v1768_v21  ;;  %v1901_v23 = vpack.c.bf16 %v1768_v21, %v1765_v17 }
 0x44a   : > { %4050 = vmatprep.mubr.bf16.mxu1 %v1901_v23 }
 0x44b   : > { %4051 = vmatmul.mubr.bf16.gmra.mrb[180].mxu1 %v1902_v22 }
 0x452   : > { %v3976_v24 = vpop.f32.mrb[120].mxu1 }
 0x453   : > { %v1789_v25 = vadd.f32 %v3976_v24, %v5591_v60  ;;  %v1780_v26 = vpop.f32.mrb[121].mxu1 }
 0x454   : > { %v1781_v27 = vadd.f32 %v1780_v26, %v5591_v60  ;;  %v3977_v28 = vpop.f32.mrb[122].mxu1 }
 0x455   : > { %1869 = vst [vmem:[%s5595_s26 + $0x1d0] sm:$0xff] %v1789_v25  ;;  %v1792_v29 = vadd.f32 %v3977_v28, %v5591_v60  ;;  %v1783_v30 = vpop.f32.mrb[123].mxu1 }
 0x456   : > { %1867 = vst [vmem:[%s5595_s26 + $0x1c0] sm:$0xff] %v1781_v27  ;;  %v1784_v31 = vadd.f32 %v1783_v30, %v5591_v60 }
 0x457   : > { %1870 = vst [vmem:[%s5595_s26 + $0x1d8] sm:$0xff] %v1792_v29  ;;  %v1904_v1 = vpack.c.bf16 %v1792_v29, %v1789_v25 }
 0x458   : > { %1868 = vst [vmem:[%s5595_s26 + $0x1c8] sm:$0xff] %v1784_v31  ;;  %v1903_v32 = vpack.c.bf16 %v1784_v31, %v1781_v27 }
 0x45a   : > { %4054 = vmatprep.mubr.bf16.mxu1 %v1903_v32 }
 0x45b   : > { %4055 = vmatmul.mubr.bf16.gmra.mrb[184].mxu1 %v1904_v1 }
 0x462   : > { %v3980_v33 = vpop.f32.mrb[124].mxu1 }
 0x463   : > { %v1805_v34 = vadd.f32 %v3980_v33, %v5591_v60  ;;  %v1796_v35 = vpop.f32.mrb[125].mxu1 }
 0x464   : > { %v1797_v36 = vadd.f32 %v1796_v35, %v5591_v60  ;;  %v3981_v37 = vpop.f32.mrb[126].mxu1 }
 0x465   : > { %1873 = vst [vmem:[%s5595_s26 + $0x1f0] sm:$0xff] %v1805_v34  ;;  %v1808_v38 = vadd.f32 %v3981_v37, %v5591_v60  ;;  %v1799_v39 = vpop.f32.mrb[127].mxu1 }
 0x466   : > { %1871 = vst [vmem:[%s5595_s26 + $0x1e0] sm:$0xff] %v1797_v36  ;;  %v1800_v40 = vadd.f32 %v1799_v39, %v5591_v60 }
 0x467   : > { %1874 = vst [vmem:[%s5595_s26 + $0x1f8] sm:$0xff] %v1808_v38  ;;  %v1906_v41 = vpack.c.bf16 %v1808_v38, %v1805_v34 }
 0x468   : > { %1872 = vst [vmem:[%s5595_s26 + $0x1e8] sm:$0xff] %v1800_v40  ;;  %v1905_v42 = vpack.c.bf16 %v1800_v40, %v1797_v36 }
 0x46a   : > { %v4000_v44 = vpop.f32.mrb[128].mxu1  ;;  %4058 = vmatprep.mubr.bf16.mxu1 %v1905_v42 }
 0x46b   : > { %v2015_v45 = vadd.f32 %v4000_v44, %v5723_v43  ;;  %v2006_v46 = vpop.f32.mrb[129].mxu1  ;;  %4059 = vmatmul.mubr.bf16.gmra.mrb[188].mxu1 %v1906_v41 }
 0x46c   : > { %v2007_v47 = vadd.f32 %v2006_v46, %v5723_v43  ;;  %v4001_v48 = vpop.f32.mrb[130].mxu1  ;;  %3088 = vmatprep.mubr.bf16.mxu1 %v5067_v0 }
 0x46d   : > { %4579 = vtanh.f32 %v2015_v45  ;;  %v2018_v60 = vadd.f32 %v4001_v48, %v5723_v43  ;;  %v2009_v49 = vpop.f32.mrb[131].mxu1 }
 0x46e   : > { %4581 = vtanh.f32 %v2007_v47  ;;  %v2010_v50 = vadd.f32 %v2009_v49, %v5723_v43 }
 0x46f   : > { %4583 = vtanh.f32 %v2018_v60 }
 0x470   : > { %4585 = vtanh.f32 %v2010_v50 }
 0x472   : > { %v4004_v51 = vpop.f32.mrb[132].mxu1 }
 0x473   : > { %v2031_v52 = vadd.f32 %v4004_v51, %v5723_v43  ;;  %v2022_v54 = vpop.f32.mrb[133].mxu1 }
 0x474   : > { %v2023_v55 = vadd.f32 %v2022_v54, %v5723_v43  ;;  %v4005_v56 = vpop.f32.mrb[134].mxu1 }
 0x475   : > { %4587 = vtanh.f32 %v2031_v52  ;;  %v2034_v57 = vadd.f32 %v4005_v56, %v5723_v43  ;;  %v2025_v58 = vpop.f32.mrb[135].mxu1 }
 0x476   : > { %4589 = vtanh.f32 %v2023_v55  ;;  %v2026_v59 = vadd.f32 %v2025_v58, %v5723_v43 }
 0x477   : > { %v4580_v61 = vpop.eup %4579  ;;  %4591 = vtanh.f32 %v2034_v57 }
 0x478   : > { %v4582_v62 = vpop.eup %4581  ;;  %4593 = vtanh.f32 %v2026_v59 }
 0x479   : > { %v4584_v63 = vpop.eup %4583 }
 0x47a   : > { %v4586_v2 = vpop.eup %4585  ;;  %v4008_v3 = vpop.f32.mrb[136].mxu1  ;;  %v2326_v53 = vpack.c.bf16 %v4584_v63, %v4580_v61 }
 0x47b   : > { %v2047_v4 = vadd.f32 %v4008_v3, %v5723_v43  ;;  %v2038_v5 = vpop.f32.mrb[137].mxu1  ;;  %v2325_v6 = vpack.c.bf16 %v4586_v2, %v4582_v62 }
 0x47c   : > { %v2039_v7 = vadd.f32 %v2038_v5, %v5723_v43  ;;  %v4009_v8 = vpop.f32.mrb[138].mxu1 }
 0x47d   : > { %4595 = vtanh.f32 %v2047_v4  ;;  %v2050_v9 = vadd.f32 %v4009_v8, %v5723_v43  ;;  %v2041_v10 = vpop.f32.mrb[139].mxu1  ;;  %4078 = vmatprep.mubr.bf16.mxu0 %v2325_v6 }
 0x47e   : > { %4597 = vtanh.f32 %v2039_v7  ;;  %v2042_v11 = vadd.f32 %v2041_v10, %v5723_v43  ;;  %4079 = vmatmul.mubr.bf16.vlgmr.msra.gmra.mrb[128].mxu0 %v2326_v53 }
 0x47f   : > { %v4588_v12 = vpop.eup %4587  ;;  %4599 = vtanh.f32 %v2050_v9 }
 0x480   : > { %v4590_v13 = vpop.eup %4589  ;;  %4601 = vtanh.f32 %v2042_v11 }
 0x481   : > { %v4592_v14 = vpop.eup %4591 }
 0x482   : > { %v4594_v15 = vpop.eup %4593  ;;  %v4012_v16 = vpop.f32.mrb[140].mxu1  ;;  %v2328_v17 = vpack.c.bf16 %v4592_v14, %v4588_v12  ;;  %v4299_v12 = vld [vmem:[#allocation7] ss:$8 sps:$4 sm:$0xff]  }
 0x483   : > { %v2063_v18 = vadd.f32 %v4012_v16, %v5723_v43  ;;  %v2054_v19 = vpop.f32.mrb[141].mxu1  ;;  %v2327_v20 = vpack.c.bf16 %v4594_v15, %v4590_v13  ;;  %v4301_v13 = vld [vmem:[#allocation7 + $0x4] ss:$8 sps:$4 sm:$0xff]  }
 0x484   : > { %v2055_v21 = vadd.f32 %v2054_v19, %v5723_v43  ;;  %v4013_v22 = vpop.f32.mrb[142].mxu1  ;;  %4142 = vmatprep.subr.bf16.mxu1 %v4301_v13  ;;  %2916 = vmatprep.subr.bf16.mxu0 %v4301_v13 }
 0x485   : > { %4603 = vtanh.f32 %v2063_v18  ;;  %v2066_v23 = vadd.f32 %v4013_v22, %v5723_v43  ;;  %v2057_v24 = vpop.f32.mrb[143].mxu1  ;;  %4082 = vmatprep.mubr.bf16.mxu0 %v2327_v20  ;;  %4150 = vmatpush1.bf16.msra.mxu1 %v4299_v12 }
 0x486   : > { %4605 = vtanh.f32 %v2055_v21  ;;  %v2058_v25 = vadd.f32 %v2057_v24, %v5723_v43  ;;  %4083 = vmatmul.mubr.bf16.gmra.mrb[132].mxu0 %v2328_v17 }
 0x487   : > { %v4596_v26 = vpop.eup %4595  ;;  %4607 = vtanh.f32 %v2066_v23  ;;  %2917 = vmatpush1.bf16.msra.mxu0 %v4299_v12 }
 0x488   : > { %v4598_v27 = vpop.eup %4597  ;;  %4609 = vtanh.f32 %v2058_v25 }
 0x489   : > { %v4600_v28 = vpop.eup %4599 }
 0x48a   : > { %v4602_v29 = vpop.eup %4601  ;;  %v2330_v30 = vpack.c.bf16 %v4600_v28, %v4596_v26  ;;  %v4302_v28 = vld [vmem:[#allocation7 + $0x10] ss:$8 sps:$4 sm:$0xff]  }
 0x48b   : > { %v2329_v31 = vpack.c.bf16 %v4602_v29, %v4598_v27  ;;  %v4304_v29 = vld [vmem:[#allocation7 + $0x14] ss:$8 sps:$4 sm:$0xff]  }
 0x48c   : > { %4143 = vmatprep.subr.bf16.mxu1 %v4304_v29  ;;  %2918 = vmatprep.subr.bf16.mxu0 %v4304_v29 }
 0x48d   : > { %4086 = vmatprep.mubr.bf16.mxu0 %v2329_v31  ;;  %4151 = vmatpush1.bf16.msra.mxu1 %v4302_v28  ;;  %v4305_v31 = vld [vmem:[#allocation7 + $0x20] ss:$8 sps:$4 sm:$0xff]  }
 0x48e   : > { %v4016_v1 = vpop.f32.mrb[144].mxu1  ;;  %4087 = vmatmul.mubr.bf16.gmra.mrb[136].mxu0 %v2330_v30  ;;  %v4307_v30 = vld [vmem:[#allocation7 + $0x24] ss:$8 sps:$4 sm:$0xff]  }
 0x48f   : > { %v4604_v32 = vpop.eup %4603  ;;  %v2079_v33 = vadd.f32 %v4016_v1, %v5723_v43  ;;  %v2070_v34 = vpop.f32.mrb[145].mxu1  ;;  %2919 = vmatpush1.bf16.msra.mxu0 %v4302_v28  ;;  %v4310_v1 = vld [vmem:[#allocation7 + $0x34] ss:$8 sps:$4 sm:$0xff]   ;;  %4144 = vmatprep.subr.bf16.mxu1 %v4307_v30 }
 0x490   : > { %v4606_v35 = vpop.eup %4605  ;;  %v2071_v36 = vadd.f32 %v2070_v34, %v5723_v43  ;;  %v4017_v37 = vpop.f32.mrb[146].mxu1  ;;  %2920 = vmatprep.subr.bf16.mxu0 %v4307_v30 }
 0x491   : > { %v4608_v38 = vpop.eup %4607  ;;  %4611 = vtanh.f32 %v2079_v33  ;;  %v2082_v39 = vadd.f32 %v4017_v37, %v5723_v43  ;;  %v2073_v40 = vpop.f32.mrb[147].mxu1  ;;  %v4308_v33 = vld [vmem:[#allocation7 + $0x30] ss:$8 sps:$4 sm:$0xff]   ;;  %4152 = vmatpush1.bf16.msra.mxu1 %v4305_v31 }
 0x492   : > { %v4610_v41 = vpop.eup %4609  ;;  %4613 = vtanh.f32 %v2071_v36  ;;  %v2074_v42 = vadd.f32 %v2073_v40, %v5723_v43  ;;  %v2332_v44 = vpack.c.bf16 %v4608_v38, %v4604_v32  ;;  %4145 = vmatprep.subr.bf16.mxu1 %v4310_v1 }
 0x493   : > { %4615 = vtanh.f32 %v2082_v39  ;;  %v2331_v45 = vpack.c.bf16 %v4610_v41, %v4606_v35  ;;  %2921 = vmatpush1.bf16.msra.mxu0 %v4305_v31 }
 0x494   : > { %4617 = vtanh.f32 %v2074_v42  ;;  %2922 = vmatprep.subr.bf16.mxu0 %v4310_v1 }
 0x495   : > { %4090 = vmatprep.mubr.bf16.mxu0 %v2331_v45  ;;  %4153 = vmatpush1.bf16.msra.mxu1 %v4308_v33 }
 0x496   : > { %4091 = vmatmul.mubr.bf16.gmra.mrb[140].mxu0 %v2332_v44 }
 0x497   : > { %2923 = vmatpush1.bf16.msra.mxu0 %v4308_v33 }
 0x49b   : > { %v4612_v46 = vpop.eup %4611 }
 0x49c   : > { %v4614_v47 = vpop.eup %4613 }
 0x49d   : > { %v4616_v48 = vpop.eup %4615 }
 0x49e   : > { %v4618_v60 = vpop.eup %4617  ;;  %v4020_v49 = vpop.f32.mrb[148].mxu1  ;;  %v2334_v50 = vpack.c.bf16 %v4616_v48, %v4612_v46  ;;  %v4313_v48 = vld [vmem:[#allocation7 + $0x44] ss:$8 sps:$4 sm:$0xff]  }
 0x49f   : > { %v2095_v51 = vadd.f32 %v4020_v49, %v5723_v43  ;;  %v2086_v52 = vpop.f32.mrb[149].mxu1  ;;  %v2333_v54 = vpack.c.bf16 %v4618_v60, %v4614_v47  ;;  %v4311_v60 = vld [vmem:[#allocation7 + $0x40] ss:$8 sps:$4 sm:$0xff]   ;;  %2924 = vmatprep.subr.bf16.mxu0 %v4313_v48  ;;  %4146 = vmatprep.subr.bf16.mxu1 %v4313_v48  ;;  %v4314_v49 = vld [vmem:[#allocation7 + $0x50] ss:$8 sps:$4 sm:$0xff]  }
 0x4a0   : > { %v2087_v55 = vadd.f32 %v2086_v52, %v5723_v43  ;;  %v4021_v56 = vpop.f32.mrb[150].mxu1  ;;  %2925 = vmatpush1.bf16.msra.mxu0 %v4311_v60  ;;  %4154 = vmatpush1.bf16.msra.mxu1 %v4311_v60  ;;  %v4319_v52 = vld [vmem:[#allocation7 + $0x64] ss:$8 sps:$4 sm:$0xff]  }
 0x4a1   : > { %4619 = vtanh.f32 %v2095_v51  ;;  %v2098_v57 = vadd.f32 %v4021_v56, %v5723_v43  ;;  %v2089_v58 = vpop.f32.mrb[151].mxu1  ;;  %4094 = vmatprep.mubr.bf16.mxu0 %v2333_v54 }
 0x4a2   : > { %4621 = vtanh.f32 %v2087_v55  ;;  %v2090_v59 = vadd.f32 %v2089_v58, %v5723_v43  ;;  %4095 = vmatmul.mubr.bf16.gmra.mrb[144].mxu0 %v2334_v50  ;;  %v4316_v50 = vld [vmem:[#allocation7 + $0x54] ss:$8 sps:$4 sm:$0xff]   ;;  %v4317_v55 = vld [vmem:[#allocation7 + $0x60] ss:$8 sps:$4 sm:$0xff]  }
 0x4a3   : > { %4623 = vtanh.f32 %v2098_v57  ;;  %2926 = vmatprep.subr.bf16.mxu0 %v4316_v50  ;;  %4147 = vmatprep.subr.bf16.mxu1 %v4316_v50 }
 0x4a4   : > { %4625 = vtanh.f32 %v2090_v59  ;;  %2927 = vmatpush1.bf16.msra.mxu0 %v4314_v49  ;;  %4155 = vmatpush1.bf16.msra.mxu1 %v4314_v49 }
 0x4a5   : > { %2928 = vmatprep.subr.bf16.mxu0 %v4319_v52  ;;  %4148 = vmatprep.subr.bf16.mxu1 %v4319_v52 }
 0x4a8   : > { %2929 = vmatpush1.bf16.msra.mxu0 %v4317_v55  ;;  %4156 = vmatpush1.bf16.msra.mxu1 %v4317_v55 }
 0x4ab   : > { %v4620_v61 = vpop.eup %4619 }
 0x4ac   : > { %v4622_v62 = vpop.eup %4621 }
 0x4ad   : > { %v4624_v63 = vpop.eup %4623 }
 0x4ae   : > { %v4626_v2 = vpop.eup %4625  ;;  %v4024_v3 = vpop.f32.mrb[152].mxu1  ;;  %v2336_v53 = vpack.c.bf16 %v4624_v63, %v4620_v61 }
 0x4af   : > { %v2111_v4 = vadd.f32 %v4024_v3, %v5723_v43  ;;  %v2102_v5 = vpop.f32.mrb[153].mxu1  ;;  %v2335_v6 = vpack.c.bf16 %v4626_v2, %v4622_v62  ;;  %v4320_v2 = vld [vmem:[#allocation7 + $0x70] ss:$8 sps:$4 sm:$0xff]   ;;  %v4322_v3 = vld [vmem:[#allocation7 + $0x74] ss:$8 sps:$4 sm:$0xff]  }
 0x4b0   : > { %v2103_v7 = vadd.f32 %v2102_v5, %v5723_v43  ;;  %v4025_v8 = vpop.f32.mrb[154].mxu1  ;;  %2930 = vmatprep.subr.bf16.mxu0 %v4322_v3  ;;  %4149 = vmatprep.subr.bf16.mxu1 %v4322_v3 }
 0x4b1   : > { %4627 = vtanh.f32 %v2111_v4  ;;  %v2114_v9 = vadd.f32 %v4025_v8, %v5723_v43  ;;  %v2105_v10 = vpop.f32.mrb[155].mxu1  ;;  %4098 = vmatprep.mubr.bf16.mxu0 %v2335_v6  ;;  %2931 = vmatpush1.bf16.msra.mxu0 %v4320_v2 }
 0x4b2   : > { %4629 = vtanh.f32 %v2103_v7  ;;  %v2106_v11 = vadd.f32 %v2105_v10, %v5723_v43  ;;  %4099 = vmatmul.mubr.bf16.gmra.mrb[148].mxu0 %v2336_v53  ;;  %4157 = vmatpush1.bf16.msra.mxu1 %v4320_v2 }
 0x4b3   : > { %4631 = vtanh.f32 %v2114_v9 }
 0x4b4   : > { %4633 = vtanh.f32 %v2106_v11 }
 0x4bb   : > { %v4628_v14 = vpop.eup %4627 }
 0x4bc   : > { %v4630_v15 = vpop.eup %4629 }
 0x4bd   : > { %v4632_v16 = vpop.eup %4631 }
 0x4be   : > { %v4634_v17 = vpop.eup %4633  ;;  %v4028_v18 = vpop.f32.mrb[156].mxu1  ;;  %v2338_v19 = vpack.c.bf16 %v4632_v16, %v4628_v14 }
 0x4bf   : > { %v2127_v20 = vadd.f32 %v4028_v18, %v5723_v43  ;;  %v2118_v21 = vpop.f32.mrb[157].mxu1  ;;  %v2337_v22 = vpack.c.bf16 %v4634_v17, %v4630_v15 }
 0x4c0   : > { %v2119_v23 = vadd.f32 %v2118_v21, %v5723_v43  ;;  %v4029_v24 = vpop.f32.mrb[158].mxu1 }
 0x4c1   : > { %4635 = vtanh.f32 %v2127_v20  ;;  %v2130_v25 = vadd.f32 %v4029_v24, %v5723_v43  ;;  %v2121_v26 = vpop.f32.mrb[159].mxu1  ;;  %4102 = vmatprep.mubr.bf16.mxu0 %v2337_v22 }
 0x4c2   : > { %4637 = vtanh.f32 %v2119_v23  ;;  %v2122_v27 = vadd.f32 %v2121_v26, %v5723_v43  ;;  %4103 = vmatmul.mubr.bf16.gmra.mrb[152].mxu0 %v2338_v19 }
 0x4c3   : > { %4639 = vtanh.f32 %v2130_v25 }
 0x4c4   : > { %4641 = vtanh.f32 %v2122_v27 }
 0x4cb   : > { %v4636_v32 = vpop.eup %4635 }
 0x4cc   : > { %v4638_v34 = vpop.eup %4637 }
 0x4cd   : > { %v4640_v35 = vpop.eup %4639 }
 0x4ce   : > { %v4642_v36 = vpop.eup %4641  ;;  %v4032_v37 = vpop.f32.mrb[160].mxu1  ;;  %v2340_v38 = vpack.c.bf16 %v4640_v35, %v4636_v32 }
 0x4cf   : > { %v2143_v39 = vadd.f32 %v4032_v37, %v5723_v43  ;;  %v2134_v40 = vpop.f32.mrb[161].mxu1  ;;  %v2339_v41 = vpack.c.bf16 %v4642_v36, %v4638_v34 }
 0x4d0   : > { %v2135_v42 = vadd.f32 %v2134_v40, %v5723_v43  ;;  %v4033_v44 = vpop.f32.mrb[162].mxu1 }
 0x4d1   : > { %4643 = vtanh.f32 %v2143_v39  ;;  %v2146_v45 = vadd.f32 %v4033_v44, %v5723_v43  ;;  %v2137_v46 = vpop.f32.mrb[163].mxu1  ;;  %4106 = vmatprep.mubr.bf16.mxu0 %v2339_v41 }
 0x4d2   : > { %4645 = vtanh.f32 %v2135_v42  ;;  %v2138_v47 = vadd.f32 %v2137_v46, %v5723_v43  ;;  %4107 = vmatmul.mubr.bf16.gmra.mrb[156].mxu0 %v2340_v38 }
 0x4d3   : > { %4647 = vtanh.f32 %v2146_v45 }
 0x4d4   : > { %4649 = vtanh.f32 %v2138_v47 }
 0x4db   : > { %v4644_v51 = vpop.eup %4643 }
 0x4dc   : > { %v4646_v54 = vpop.eup %4645 }
 0x4dd   : > { %v4648_v56 = vpop.eup %4647 }
 0x4de   : > { %v4650_v57 = vpop.eup %4649  ;;  %v4036_v58 = vpop.f32.mrb[164].mxu1  ;;  %v2342_v59 = vpack.c.bf16 %v4648_v56, %v4644_v51 }
 0x4df   : > { %v2159_v61 = vadd.f32 %v4036_v58, %v5723_v43  ;;  %v2150_v62 = vpop.f32.mrb[165].mxu1  ;;  %v2341_v63 = vpack.c.bf16 %v4650_v57, %v4646_v54 }
 0x4e0   : > { %v2151_v53 = vadd.f32 %v2150_v62, %v5723_v43  ;;  %v4037_v4 = vpop.f32.mrb[166].mxu1 }
 0x4e1   : > { %4651 = vtanh.f32 %v2159_v61  ;;  %v2162_v5 = vadd.f32 %v4037_v4, %v5723_v43  ;;  %v2153_v6 = vpop.f32.mrb[167].mxu1  ;;  %4110 = vmatprep.mubr.bf16.mxu0 %v2341_v63 }
 0x4e2   : > { %4653 = vtanh.f32 %v2151_v53  ;;  %v2154_v7 = vadd.f32 %v2153_v6, %v5723_v43  ;;  %4111 = vmatmul.mubr.bf16.gmra.mrb[160].mxu0 %v2342_v59 }
 0x4e3   : > { %4655 = vtanh.f32 %v2162_v5 }
 0x4e4   : > { %4657 = vtanh.f32 %v2154_v7 }
 0x4eb   : > { %v4652_v8 = vpop.eup %4651 }
 0x4ec   : > { %v4654_v9 = vpop.eup %4653 }
 0x4ed   : > { %v4656_v10 = vpop.eup %4655 }
 0x4ee   : > { %v4658_v11 = vpop.eup %4657  ;;  %v4040_v12 = vpop.f32.mrb[168].mxu1  ;;  %v2344_v13 = vpack.c.bf16 %v4656_v10, %v4652_v8 }
 0x4ef   : > { %v2175_v14 = vadd.f32 %v4040_v12, %v5723_v43  ;;  %v2166_v15 = vpop.f32.mrb[169].mxu1  ;;  %v2343_v16 = vpack.c.bf16 %v4658_v11, %v4654_v9 }
 0x4f0   : > { %v2167_v17 = vadd.f32 %v2166_v15, %v5723_v43  ;;  %v4041_v18 = vpop.f32.mrb[170].mxu1 }
 0x4f1   : > { %4659 = vtanh.f32 %v2175_v14  ;;  %v2178_v19 = vadd.f32 %v4041_v18, %v5723_v43  ;;  %v2169_v20 = vpop.f32.mrb[171].mxu1  ;;  %4114 = vmatprep.mubr.bf16.mxu0 %v2343_v16 }
 0x4f2   : > { %4661 = vtanh.f32 %v2167_v17  ;;  %v2170_v21 = vadd.f32 %v2169_v20, %v5723_v43  ;;  %4115 = vmatmul.mubr.bf16.gmra.mrb[164].mxu0 %v2344_v13 }
 0x4f3   : > { %4663 = vtanh.f32 %v2178_v19 }
 0x4f4   : > { %4665 = vtanh.f32 %v2170_v21 }
 0x4fb   : > { %v4660_v22 = vpop.eup %4659 }
 0x4fc   : > { %v4662_v23 = vpop.eup %4661 }
 0x4fd   : > { %v4664_v24 = vpop.eup %4663 }
 0x4fe   : > { %v4666_v25 = vpop.eup %4665  ;;  %v4044_v26 = vpop.f32.mrb[172].mxu1  ;;  %v2346_v27 = vpack.c.bf16 %v4664_v24, %v4660_v22 }
 0x4ff   : > { %v2191_v28 = vadd.f32 %v4044_v26, %v5723_v43  ;;  %v2182_v29 = vpop.f32.mrb[173].mxu1  ;;  %v2345_v30 = vpack.c.bf16 %v4666_v25, %v4662_v23 }
 0x500   : > { %v2183_v31 = vadd.f32 %v2182_v29, %v5723_v43  ;;  %v4045_v1 = vpop.f32.mrb[174].mxu1 }
 0x501   : > { %4667 = vtanh.f32 %v2191_v28  ;;  %v2194_v32 = vadd.f32 %v4045_v1, %v5723_v43  ;;  %v2185_v33 = vpop.f32.mrb[175].mxu1  ;;  %4118 = vmatprep.mubr.bf16.mxu0 %v2345_v30 }
 0x502   : > { %4669 = vtanh.f32 %v2183_v31  ;;  %v2186_v34 = vadd.f32 %v2185_v33, %v5723_v43  ;;  %4119 = vmatmul.mubr.bf16.gmra.mrb[168].mxu0 %v2346_v27 }
 0x503   : > { %4671 = vtanh.f32 %v2194_v32 }
 0x504   : > { %4673 = vtanh.f32 %v2186_v34  ;;  %v5790_v34 = vld [vmem:[#allocation8 + $0x20] ss:$0 sm:$0xff] }
 0x50b   : > { %v4668_v35 = vpop.eup %4667 }
 0x50c   : > { %v4670_v36 = vpop.eup %4669 }
 0x50d   : > { %v4672_v37 = vpop.eup %4671 }
 0x50e   : > { %v4674_v38 = vpop.eup %4673  ;;  %v4048_v39 = vpop.f32.mrb[176].mxu1  ;;  %v2348_v40 = vpack.c.bf16 %v4672_v37, %v4668_v35 }
 0x50f   : > { %v2207_v41 = vadd.f32 %v4048_v39, %v5723_v43  ;;  %v2198_v42 = vpop.f32.mrb[177].mxu1  ;;  %v2347_v44 = vpack.c.bf16 %v4674_v38, %v4670_v36 }
 0x510   : > { %v2199_v45 = vadd.f32 %v2198_v42, %v5723_v43  ;;  %v4049_v46 = vpop.f32.mrb[178].mxu1 }
 0x511   : > { %4675 = vtanh.f32 %v2207_v41  ;;  %v2210_v47 = vadd.f32 %v4049_v46, %v5723_v43  ;;  %v2201_v48 = vpop.f32.mrb[179].mxu1  ;;  %4122 = vmatprep.mubr.bf16.mxu0 %v2347_v44 }
 0x512   : > { %4677 = vtanh.f32 %v2199_v45  ;;  %v2202_v60 = vadd.f32 %v2201_v48, %v5723_v43  ;;  %4123 = vmatmul.mubr.bf16.gmra.mrb[172].mxu0 %v2348_v40 }
 0x513   : > { %4679 = vtanh.f32 %v2210_v47 }
 0x514   : > { %4681 = vtanh.f32 %v2202_v60 }
 0x51b   : > { %v4676_v49 = vpop.eup %4675 }
 0x51c   : > { %v4678_v50 = vpop.eup %4677 }
 0x51d   : > { %v4680_v51 = vpop.eup %4679 }
 0x51e   : > { %v4682_v52 = vpop.eup %4681  ;;  %v4052_v54 = vpop.f32.mrb[180].mxu1  ;;  %v2350_v55 = vpack.c.bf16 %v4680_v51, %v4676_v49 }
 0x51f   : > { %v2223_v56 = vadd.f32 %v4052_v54, %v5723_v43  ;;  %v2214_v57 = vpop.f32.mrb[181].mxu1  ;;  %v2349_v58 = vpack.c.bf16 %v4682_v52, %v4678_v50 }
 0x520   : > { %v2215_v59 = vadd.f32 %v2214_v57, %v5723_v43  ;;  %v4053_v61 = vpop.f32.mrb[182].mxu1 }
 0x521   : > { %4683 = vtanh.f32 %v2223_v56  ;;  %v2226_v62 = vadd.f32 %v4053_v61, %v5723_v43  ;;  %v2217_v63 = vpop.f32.mrb[183].mxu1  ;;  %4126 = vmatprep.mubr.bf16.mxu0 %v2349_v58 }
 0x522   : > { %4685 = vtanh.f32 %v2215_v59  ;;  %v2218_v2 = vadd.f32 %v2217_v63, %v5723_v43  ;;  %4127 = vmatmul.mubr.bf16.gmra.mrb[176].mxu0 %v2350_v55 }
 0x523   : > { %4687 = vtanh.f32 %v2226_v62 }
 0x524   : > { %4689 = vtanh.f32 %v2218_v2 }
 0x52b   : > { %v4684_v3 = vpop.eup %4683 }
 0x52c   : > { %v4686_v53 = vpop.eup %4685 }
 0x52d   : > { %v4688_v4 = vpop.eup %4687 }
 0x52e   : > { %v4690_v5 = vpop.eup %4689  ;;  %v4056_v6 = vpop.f32.mrb[184].mxu1  ;;  %v2352_v7 = vpack.c.bf16 %v4688_v4, %v4684_v3 }
 0x52f   : > { %v2239_v8 = vadd.f32 %v4056_v6, %v5723_v43  ;;  %v2230_v9 = vpop.f32.mrb[185].mxu1  ;;  %v2351_v10 = vpack.c.bf16 %v4690_v5, %v4686_v53 }
 0x530   : > { %v2231_v11 = vadd.f32 %v2230_v9, %v5723_v43  ;;  %v4057_v12 = vpop.f32.mrb[186].mxu1 }
 0x531   : > { %4691 = vtanh.f32 %v2239_v8  ;;  %v2242_v13 = vadd.f32 %v4057_v12, %v5723_v43  ;;  %v2233_v14 = vpop.f32.mrb[187].mxu1  ;;  %4130 = vmatprep.mubr.bf16.mxu0 %v2351_v10 }
 0x532   : > { %4693 = vtanh.f32 %v2231_v11  ;;  %v2234_v15 = vadd.f32 %v2233_v14, %v5723_v43  ;;  %4131 = vmatmul.mubr.bf16.gmra.mrb[180].mxu0 %v2352_v7 }
 0x533   : > { %4695 = vtanh.f32 %v2242_v13 }
 0x534   : > { %4697 = vtanh.f32 %v2234_v15 }
 0x53b   : > { %v4692_v16 = vpop.eup %4691 }
 0x53c   : > { %v4694_v17 = vpop.eup %4693 }
 0x53d   : > { %v4696_v18 = vpop.eup %4695 }
 0x53e   : > { %v4698_v19 = vpop.eup %4697  ;;  %v4060_v20 = vpop.f32.mrb[188].mxu1  ;;  %v2354_v21 = vpack.c.bf16 %v4696_v18, %v4692_v16 }
 0x53f   : > { %v2255_v22 = vadd.f32 %v4060_v20, %v5723_v43  ;;  %v2246_v23 = vpop.f32.mrb[189].mxu1  ;;  %v2353_v24 = vpack.c.bf16 %v4698_v19, %v4694_v17 }
 0x540   : > { %v2247_v25 = vadd.f32 %v2246_v23, %v5723_v43  ;;  %v4061_v26 = vpop.f32.mrb[190].mxu1 }
 0x541   : > { %4699 = vtanh.f32 %v2255_v22  ;;  %v2258_v27 = vadd.f32 %v4061_v26, %v5723_v43  ;;  %v2249_v28 = vpop.f32.mrb[191].mxu1  ;;  %4134 = vmatprep.mubr.bf16.mxu0 %v2353_v24 }
 0x542   : > { %4701 = vtanh.f32 %v2247_v25  ;;  %v2250_v29 = vadd.f32 %v2249_v28, %v5723_v43  ;;  %4135 = vmatmul.mubr.bf16.gmra.mrb[184].mxu0 %v2354_v21 }
 0x543   : > { %4703 = vtanh.f32 %v2258_v27 }
 0x544   : > { %4705 = vtanh.f32 %v2250_v29 }
 0x54b   : > { %v4700_v30 = vpop.eup %4699 }
 0x54c   : > { %v4702_v31 = vpop.eup %4701 }
 0x54d   : > { %v4704_v1 = vpop.eup %4703 }
 0x54e   : > { %v4706_v32 = vpop.eup %4705  ;;  %v2356_v33 = vpack.c.bf16 %v4704_v1, %v4700_v30 }
 0x54f   : > { %v2355_v35 = vpack.c.bf16 %v4706_v32, %v4702_v31 }
 0x551   : > { %v4080_v36 = vpop.f32.mrb[128].mxu0  ;;  %4138 = vmatprep.mubr.bf16.mxu0 %v2355_v35 }
 0x552   : > { %v2465_v37 = vadd.f32 %v4080_v36, %v5790_v34  ;;  %v2456_v38 = vpop.f32.mrb[129].mxu0  ;;  %4139 = vmatmul.mubr.bf16.gmra.mrb[188].mxu0 %v2356_v33 }
 0x553   : > { %v2457_v39 = vadd.f32 %v2456_v38, %v5790_v34  ;;  %v4081_v43 = vpop.f32.mrb[130].mxu0  ;;  %2948 = vmatprep.mubr.bf16.mxu0 %v5067_v0 }
 0x554   : > { %4707 = vtanh.f32 %v2465_v37  ;;  %v2468_v40 = vadd.f32 %v4081_v43, %v5790_v34  ;;  %v2459_v41 = vpop.f32.mrb[131].mxu0 }
 0x555   : > { %4709 = vtanh.f32 %v2457_v39  ;;  %v2460_v42 = vadd.f32 %v2459_v41, %v5790_v34 }
 0x556   : > { %4711 = vtanh.f32 %v2468_v40 }
 0x557   : > { %4713 = vtanh.f32 %v2460_v42 }
 0x559   : > { %v4084_v44 = vpop.f32.mrb[132].mxu0 }
 0x55a   : > { %v2481_v45 = vadd.f32 %v4084_v44, %v5790_v34  ;;  %v2472_v46 = vpop.f32.mrb[133].mxu0 }
 0x55b   : > { %v2473_v47 = vadd.f32 %v2472_v46, %v5790_v34  ;;  %v4085_v48 = vpop.f32.mrb[134].mxu0 }
 0x55c   : > { %4715 = vtanh.f32 %v2481_v45  ;;  %v2484_v60 = vadd.f32 %v4085_v48, %v5790_v34  ;;  %v2475_v49 = vpop.f32.mrb[135].mxu0 }
 0x55d   : > { %4717 = vtanh.f32 %v2473_v47  ;;  %v2476_v50 = vadd.f32 %v2475_v49, %v5790_v34 }
 0x55e   : > { %v4708_v51 = vpop.eup %4707  ;;  %4719 = vtanh.f32 %v2484_v60 }
 0x55f   : > { %v4710_v52 = vpop.eup %4709  ;;  %4721 = vtanh.f32 %v2476_v50 }
 0x560   : > { %v4712_v54 = vpop.eup %4711 }
 0x561   : > { %v4714_v55 = vpop.eup %4713  ;;  %v4088_v56 = vpop.f32.mrb[136].mxu0  ;;  %v2776_v57 = vpack.c.bf16 %v4712_v54, %v4708_v51 }
 0x562   : > { %v2497_v58 = vadd.f32 %v4088_v56, %v5790_v34  ;;  %v2488_v59 = vpop.f32.mrb[137].mxu0  ;;  %v2775_v61 = vpack.c.bf16 %v4714_v55, %v4710_v52 }
 0x563   : > { %v2489_v62 = vadd.f32 %v2488_v59, %v5790_v34  ;;  %v4089_v63 = vpop.f32.mrb[138].mxu0 }
 0x564   : > { %4723 = vtanh.f32 %v2497_v58  ;;  %v2500_v2 = vadd.f32 %v4089_v63, %v5790_v34  ;;  %v2491_v3 = vpop.f32.mrb[139].mxu0  ;;  %2949 = vmatmul.mubr.bf16.vlgmr.msra.gmra.mrb[192].mxu0 %v2775_v61 }
 0x565   : > { %4725 = vtanh.f32 %v2489_v62  ;;  %v2492_v53 = vadd.f32 %v2491_v3, %v5790_v34  ;;  %2958 = vmatprep.mubr.bf16.mxu0 %v5067_v0 }
 0x566   : > { %v4716_v4 = vpop.eup %4715  ;;  %4727 = vtanh.f32 %v2500_v2 }
 0x567   : > { %v4718_v5 = vpop.eup %4717  ;;  %4729 = vtanh.f32 %v2492_v53 }
 0x568   : > { %v4720_v6 = vpop.eup %4719 }
 0x569   : > { %v4722_v7 = vpop.eup %4721  ;;  %v4092_v8 = vpop.f32.mrb[140].mxu0  ;;  %v2778_v9 = vpack.c.bf16 %v4720_v6, %v4716_v4 }
 0x56a   : > { %v2513_v10 = vadd.f32 %v4092_v8, %v5790_v34  ;;  %v2504_v11 = vpop.f32.mrb[141].mxu0  ;;  %v2777_v12 = vpack.c.bf16 %v4722_v7, %v4718_v5 }
 0x56b   : > { %v2505_v13 = vadd.f32 %v2504_v11, %v5790_v34  ;;  %v4093_v14 = vpop.f32.mrb[142].mxu0 }
 0x56c   : > { %4731 = vtanh.f32 %v2513_v10  ;;  %v2516_v15 = vadd.f32 %v4093_v14, %v5790_v34  ;;  %v2507_v16 = vpop.f32.mrb[143].mxu0  ;;  %2959 = vmatmul.mubr.bf16.gmra.mrb[196].mxu0 %v2776_v57 }
 0x56d   : > { %4733 = vtanh.f32 %v2505_v13  ;;  %v2508_v17 = vadd.f32 %v2507_v16, %v5790_v34  ;;  %2968 = vmatprep.mubr.bf16.mxu0 %v5067_v0 }
 0x56e   : > { %v4724_v18 = vpop.eup %4723  ;;  %4735 = vtanh.f32 %v2516_v15 }
 0x56f   : > { %v4726_v19 = vpop.eup %4725  ;;  %4737 = vtanh.f32 %v2508_v17 }
 0x570   : > { %v4728_v20 = vpop.eup %4727 }
 0x571   : > { %v4730_v21 = vpop.eup %4729  ;;  %v2780_v22 = vpack.c.bf16 %v4728_v20, %v4724_v18 }
 0x572   : > { %v2779_v23 = vpack.c.bf16 %v4730_v21, %v4726_v19 }
 0x574   : > { %2969 = vmatmul.mubr.bf16.gmra.mrb[200].mxu0 %v2777_v12 }
 0x575   : > { %v4096_v24 = vpop.f32.mrb[144].mxu0  ;;  %2978 = vmatprep.mubr.bf16.mxu0 %v5067_v0 }
 0x576   : > { %v4732_v25 = vpop.eup %4731  ;;  %v2529_v26 = vadd.f32 %v4096_v24, %v5790_v34  ;;  %v2520_v27 = vpop.f32.mrb[145].mxu0 }
 0x577   : > { %v4734_v28 = vpop.eup %4733  ;;  %v2521_v29 = vadd.f32 %v2520_v27, %v5790_v34  ;;  %v4097_v30 = vpop.f32.mrb[146].mxu0 }
 0x578   : > { %v4736_v31 = vpop.eup %4735  ;;  %4739 = vtanh.f32 %v2529_v26  ;;  %v2532_v1 = vadd.f32 %v4097_v30, %v5790_v34  ;;  %v2523_v32 = vpop.f32.mrb[147].mxu0 }
 0x579   : > { %v4738_v33 = vpop.eup %4737  ;;  %4741 = vtanh.f32 %v2521_v29  ;;  %v2524_v35 = vadd.f32 %v2523_v32, %v5790_v34  ;;  %v2782_v36 = vpack.c.bf16 %v4736_v31, %v4732_v25 }
 0x57a   : > { %4743 = vtanh.f32 %v2532_v1  ;;  %v2781_v37 = vpack.c.bf16 %v4738_v33, %v4734_v28 }
 0x57b   : > { %4745 = vtanh.f32 %v2524_v35 }
 0x57c   : > { %2979 = vmatmul.mubr.bf16.gmra.mrb[204].mxu0 %v2778_v9 }
 0x57d   : > { %2988 = vmatprep.mubr.bf16.mxu0 %v5067_v0 }
 0x582   : > { %v5817_v38 = vpop.eup %4739 }
 0x583   : > { %v4742_v39 = vpop.eup %4741 }
 0x584   : > { %v4744_v43 = vpop.eup %4743  ;;  %2989 = vmatmul.mubr.bf16.gmra.mrb[208].mxu0 %v2779_v23 }
 0x585   : > { %v4746_v40 = vpop.eup %4745  ;;  %v4100_v41 = vpop.f32.mrb[148].mxu0  ;;  %2998 = vmatprep.mubr.bf16.mxu0 %v5067_v0  ;;  %v2784_v42 = vpack.c.bf16 %v4744_v43, %v5817_v38 }
 0x586   : > { %v2545_v44 = vadd.f32 %v4100_v41, %v5790_v34  ;;  %v2536_v45 = vpop.f32.mrb[149].mxu0  ;;  %v2783_v46 = vpack.c.bf16 %v4746_v40, %v4742_v39 }
 0x587   : > { %v2537_v47 = vadd.f32 %v2536_v45, %v5790_v34  ;;  %v4101_v48 = vpop.f32.mrb[150].mxu0 }
 0x588   : > { %4747 = vtanh.f32 %v2545_v44  ;;  %v2548_v60 = vadd.f32 %v4101_v48, %v5790_v34  ;;  %v2539_v49 = vpop.f32.mrb[151].mxu0 }
 0x589   : > { %4749 = vtanh.f32 %v2537_v47  ;;  %v2540_v50 = vadd.f32 %v2539_v49, %v5790_v34 }
 0x58a   : > { %4751 = vtanh.f32 %v2548_v60 }
 0x58b   : > { %4753 = vtanh.f32 %v2540_v50 }
 0x58c   : > { %2999 = vmatmul.mubr.bf16.gmra.mrb[212].mxu0 %v2780_v22 }
 0x58d   : > { %3008 = vmatprep.mubr.bf16.mxu0 %v5067_v0 }
 0x592   : > { %v5826_v51 = vpop.eup %4747 }
 0x593   : > { %v4750_v52 = vpop.eup %4749 }
 0x594   : > { %v5828_v54 = vpop.eup %4751  ;;  %3009 = vmatmul.mubr.bf16.gmra.mrb[216].mxu0 %v2781_v37 }
 0x595   : > { %v4754_v55 = vpop.eup %4753  ;;  %v4104_v56 = vpop.f32.mrb[152].mxu0  ;;  %3018 = vmatprep.mubr.bf16.mxu0 %v5067_v0  ;;  %v2786_v57 = vpack.c.bf16 %v5828_v54, %v5826_v51 }
 0x596   : > { %v2561_v58 = vadd.f32 %v4104_v56, %v5790_v34  ;;  %v2552_v59 = vpop.f32.mrb[153].mxu0  ;;  %v2785_v61 = vpack.c.bf16 %v4754_v55, %v4750_v52 }
 0x597   : > { %v2553_v62 = vadd.f32 %v2552_v59, %v5790_v34  ;;  %v4105_v63 = vpop.f32.mrb[154].mxu0 }
 0x598   : > { %4755 = vtanh.f32 %v2561_v58  ;;  %v2564_v2 = vadd.f32 %v4105_v63, %v5790_v34  ;;  %v2555_v3 = vpop.f32.mrb[155].mxu0 }
 0x599   : > { %4757 = vtanh.f32 %v2553_v62  ;;  %v2556_v53 = vadd.f32 %v2555_v3, %v5790_v34 }
 0x59a   : > { %4759 = vtanh.f32 %v2564_v2 }
 0x59b   : > { %4761 = vtanh.f32 %v2556_v53 }
 0x59c   : > { %3019 = vmatmul.mubr.bf16.gmra.mrb[220].mxu0 %v2782_v36 }
 0x59d   : > { %3028 = vmatprep.mubr.bf16.mxu0 %v5067_v0 }
 0x5a2   : > { %v5838_v4 = vpop.eup %4755 }
 0x5a3   : > { %v4758_v5 = vpop.eup %4757 }
 0x5a4   : > { %v5840_v6 = vpop.eup %4759  ;;  %3029 = vmatmul.mubr.bf16.gmra.mrb[224].mxu0 %v2783_v46 }
 0x5a5   : > { %v4762_v7 = vpop.eup %4761  ;;  %v4108_v8 = vpop.f32.mrb[156].mxu0  ;;  %3038 = vmatprep.mubr.bf16.mxu0 %v5067_v0  ;;  %v2788_v9 = vpack.c.bf16 %v5840_v6, %v5838_v4 }
 0x5a6   : > { %v2577_v10 = vadd.f32 %v4108_v8, %v5790_v34  ;;  %v2568_v11 = vpop.f32.mrb[157].mxu0  ;;  %v2787_v12 = vpack.c.bf16 %v4762_v7, %v4758_v5 }
 0x5a7   : > { %v2569_v13 = vadd.f32 %v2568_v11, %v5790_v34  ;;  %v4109_v14 = vpop.f32.mrb[158].mxu0 }
 0x5a8   : > { %4763 = vtanh.f32 %v2577_v10  ;;  %v2580_v15 = vadd.f32 %v4109_v14, %v5790_v34  ;;  %v2571_v16 = vpop.f32.mrb[159].mxu0 }
 0x5a9   : > { %4765 = vtanh.f32 %v2569_v13  ;;  %v2572_v17 = vadd.f32 %v2571_v16, %v5790_v34 }
 0x5aa   : > { %4767 = vtanh.f32 %v2580_v15 }
 0x5ab   : > { %4769 = vtanh.f32 %v2572_v17 }
 0x5ac   : > { %3039 = vmatmul.mubr.bf16.gmra.mrb[228].mxu0 %v2784_v42 }
 0x5ad   : > { %3048 = vmatprep.mubr.bf16.mxu0 %v5067_v0 }
 0x5b2   : > { %v4764_v18 = vpop.eup %4763 }
 0x5b3   : > { %v4766_v19 = vpop.eup %4765 }
 0x5b4   : > { %v4768_v20 = vpop.eup %4767  ;;  %3049 = vmatmul.mubr.bf16.gmra.mrb[232].mxu0 %v2785_v61 }
 0x5b5   : > { %v4770_v21 = vpop.eup %4769  ;;  %v4112_v22 = vpop.f32.mrb[160].mxu0  ;;  %3058 = vmatprep.mubr.bf16.mxu0 %v5067_v0  ;;  %v2790_v23 = vpack.c.bf16 %v4768_v20, %v4764_v18 }
 0x5b6   : > { %v2593_v24 = vadd.f32 %v4112_v22, %v5790_v34  ;;  %v2584_v25 = vpop.f32.mrb[161].mxu0  ;;  %v2789_v26 = vpack.c.bf16 %v4770_v21, %v4766_v19 }
 0x5b7   : > { %v2585_v27 = vadd.f32 %v2584_v25, %v5790_v34  ;;  %v4113_v28 = vpop.f32.mrb[162].mxu0 }
 0x5b8   : > { %4771 = vtanh.f32 %v2593_v24  ;;  %v2596_v29 = vadd.f32 %v4113_v28, %v5790_v34  ;;  %v2587_v30 = vpop.f32.mrb[163].mxu0  ;;  %3089 = vmatmul.mubr.bf16.vlgmr.msra.gmra.mrb[192].mxu1 %v2789_v26 }
 0x5b9   : > { %4773 = vtanh.f32 %v2585_v27  ;;  %v2588_v31 = vadd.f32 %v2587_v30, %v5790_v34  ;;  %3098 = vmatprep.mubr.bf16.mxu1 %v5067_v0 }
 0x5ba   : > { %4775 = vtanh.f32 %v2596_v29 }
 0x5bb   : > { %4777 = vtanh.f32 %v2588_v31 }
 0x5bc   : > { %3059 = vmatmul.mubr.bf16.gmra.mrb[236].mxu0 %v2786_v57 }
 0x5bd   : > { %3068 = vmatprep.mubr.bf16.mxu0 %v5067_v0 }
 0x5c0   : > { %3099 = vmatmul.mubr.bf16.gmra.mrb[196].mxu1 %v2790_v23 }
 0x5c1   : > { %3108 = vmatprep.mubr.bf16.mxu1 %v5067_v0 }
 0x5c2   : > { %v4772_v1 = vpop.eup %4771 }
 0x5c3   : > { %v4774_v32 = vpop.eup %4773 }
 0x5c4   : > { %v4776_v33 = vpop.eup %4775  ;;  %3069 = vmatmul.mubr.bf16.gmra.mrb[240].mxu0 %v2787_v12 }
 0x5c5   : > { %v4778_v35 = vpop.eup %4777  ;;  %v4116_v36 = vpop.f32.mrb[164].mxu0  ;;  %3078 = vmatprep.mubr.bf16.mxu0 %v5067_v0  ;;  %v2792_v37 = vpack.c.bf16 %v4776_v33, %v4772_v1 }
 0x5c6   : > { %v2609_v38 = vadd.f32 %v4116_v36, %v5790_v34  ;;  %v2600_v39 = vpop.f32.mrb[165].mxu0  ;;  %v2791_v43 = vpack.c.bf16 %v4778_v35, %v4774_v32 }
 0x5c7   : > { %v2601_v40 = vadd.f32 %v2600_v39, %v5790_v34  ;;  %v4117_v41 = vpop.f32.mrb[166].mxu0 }
 0x5c8   : > { %4779 = vtanh.f32 %v2609_v38  ;;  %v2612_v42 = vadd.f32 %v4117_v41, %v5790_v34  ;;  %v2603_v44 = vpop.f32.mrb[167].mxu0  ;;  %3109 = vmatmul.mubr.bf16.gmra.mrb[200].mxu1 %v2791_v43 }
 0x5c9   : > { %4781 = vtanh.f32 %v2601_v40  ;;  %v2604_v45 = vadd.f32 %v2603_v44, %v5790_v34  ;;  %3118 = vmatprep.mubr.bf16.mxu1 %v5067_v0 }
 0x5ca   : > { %4783 = vtanh.f32 %v2612_v42 }
 0x5cb   : > { %4785 = vtanh.f32 %v2604_v45 }
 0x5cc   : > { %3079 = vmatmul.mubr.bf16.gmra.mrb[244].mxu0 %v2788_v9 }
 0x5d0   : > { %3119 = vmatmul.mubr.bf16.gmra.mrb[204].mxu1 %v2792_v37 }
 0x5d1   : > { %3128 = vmatprep.mubr.bf16.mxu1 %v5067_v0 }
 0x5d2   : > { %v4780_v46 = vpop.eup %4779 }
 0x5d3   : > { %v4782_v47 = vpop.eup %4781 }
 0x5d4   : > { %v4784_v48 = vpop.eup %4783 }
 0x5d5   : > { %v4786_v60 = vpop.eup %4785  ;;  %v4120_v49 = vpop.f32.mrb[168].mxu0  ;;  %v2794_v50 = vpack.c.bf16 %v4784_v48, %v4780_v46 }
 0x5d6   : > { %v2625_v51 = vadd.f32 %v4120_v49, %v5790_v34  ;;  %v2616_v52 = vpop.f32.mrb[169].mxu0  ;;  %v2793_v54 = vpack.c.bf16 %v4786_v60, %v4782_v47 }
 0x5d7   : > { %v2617_v55 = vadd.f32 %v2616_v52, %v5790_v34  ;;  %v4121_v56 = vpop.f32.mrb[170].mxu0 }
 0x5d8   : > { %4787 = vtanh.f32 %v2625_v51  ;;  %v2628_v57 = vadd.f32 %v4121_v56, %v5790_v34  ;;  %v2619_v58 = vpop.f32.mrb[171].mxu0  ;;  %3129 = vmatmul.mubr.bf16.gmra.mrb[208].mxu1 %v2793_v54 }
 0x5d9   : > { %4789 = vtanh.f32 %v2617_v55  ;;  %v2620_v59 = vadd.f32 %v2619_v58, %v5790_v34  ;;  %3138 = vmatprep.mubr.bf16.mxu1 %v5067_v0 }
 0x5da   : > { %4791 = vtanh.f32 %v2628_v57 }
 0x5db   : > { %4793 = vtanh.f32 %v2620_v59 }
 0x5e0   : > { %3139 = vmatmul.mubr.bf16.gmra.mrb[212].mxu1 %v2794_v50 }
 0x5e1   : > { %3148 = vmatprep.mubr.bf16.mxu1 %v5067_v0 }
 0x5e2   : > { %v4788_v61 = vpop.eup %4787 }
 0x5e3   : > { %v4790_v62 = vpop.eup %4789 }
 0x5e4   : > { %v4792_v63 = vpop.eup %4791 }
 0x5e5   : > { %v4794_v2 = vpop.eup %4793  ;;  %v4124_v3 = vpop.f32.mrb[172].mxu0  ;;  %v2796_v53 = vpack.c.bf16 %v4792_v63, %v4788_v61 }
 0x5e6   : > { %v2641_v4 = vadd.f32 %v4124_v3, %v5790_v34  ;;  %v2632_v5 = vpop.f32.mrb[173].mxu0  ;;  %v2795_v6 = vpack.c.bf16 %v4794_v2, %v4790_v62 }
 0x5e7   : > { %v2633_v7 = vadd.f32 %v2632_v5, %v5790_v34  ;;  %v4125_v8 = vpop.f32.mrb[174].mxu0  ;;  %v2826_v5 = vlaneseq }
 0x5e8   : > { %4795 = vtanh.f32 %v2641_v4  ;;  %v2644_v9 = vadd.f32 %v4125_v8, %v5790_v34  ;;  %v2635_v10 = vpop.f32.mrb[175].mxu0  ;;  %3149 = vmatmul.mubr.bf16.gmra.mrb[216].mxu1 %v2795_v6 }
 0x5e9   : > { %4797 = vtanh.f32 %v2633_v7  ;;  %v2636_v11 = vadd.f32 %v2635_v10, %v5790_v34  ;;  %3158 = vmatprep.mubr.bf16.mxu1 %v5067_v0  ;;  %v2827_v7 = vshrl.u32 %v2826_v5, 7 }
 0x5ea   : > { %4799 = vtanh.f32 %v2644_v9  ;;  %v2824_v9 = vld [vmem:[#allocation8 + $0x28] ss:$8 sm:$0x3] }
 0x5eb   : > { %4801 = vtanh.f32 %v2636_v11  ;;  %v2828_v8 = vsub.s32 0, %v2827_v7  ;;  %v2832_v10 = vsub.s32 1, %v2827_v7 }
 0x5f0   : > { %3159 = vmatmul.mubr.bf16.gmra.mrb[220].mxu1 %v2796_v53 }
 0x5f1   : > { %3168 = vmatprep.mubr.bf16.mxu1 %v5067_v0 }
 0x5f2   : > { %v4796_v12 = vpop.eup %4795 }
 0x5f3   : > { %v4798_v13 = vpop.eup %4797 }
 0x5f4   : > { %v4800_v14 = vpop.eup %4799 }
 0x5f5   : > { %v4802_v15 = vpop.eup %4801  ;;  %v4128_v16 = vpop.f32.mrb[176].mxu0  ;;  %v2798_v17 = vpack.c.bf16 %v4800_v14, %v4796_v12  ;;  %v5901_v14 = vrot.slane %v2824_v9, %v2828_v8 }
 0x5f6   : > { %v2657_v18 = vadd.f32 %v4128_v16, %v5790_v34  ;;  %v2648_v19 = vpop.f32.mrb[177].mxu0  ;;  %v2797_v20 = vpack.c.bf16 %v4802_v15, %v4798_v13 }
 0x5f7   : > { %v2649_v21 = vadd.f32 %v2648_v19, %v5790_v34  ;;  %v4129_v22 = vpop.f32.mrb[178].mxu0 }
 0x5f8   : > { %4803 = vtanh.f32 %v2657_v18  ;;  %v2660_v23 = vadd.f32 %v4129_v22, %v5790_v34  ;;  %v2651_v24 = vpop.f32.mrb[179].mxu0  ;;  %3169 = vmatmul.mubr.bf16.gmra.mrb[224].mxu1 %v2797_v20 }
 0x5f9   : > { %4805 = vtanh.f32 %v2649_v21  ;;  %v2652_v25 = vadd.f32 %v2651_v24, %v5790_v34  ;;  %3178 = vmatprep.mubr.bf16.mxu1 %v5067_v0 }
 0x5fa   : > { %4807 = vtanh.f32 %v2660_v23 }
 0x5fb   : > { %4809 = vtanh.f32 %v2652_v25 }
 0x600   : > { %3179 = vmatmul.mubr.bf16.gmra.mrb[228].mxu1 %v2798_v17 }
 0x601   : > { %3188 = vmatprep.mubr.bf16.mxu1 %v5067_v0 }
 0x602   : > { %v4804_v26 = vpop.eup %4803 }
 0x603   : > { %v4806_v27 = vpop.eup %4805 }
 0x604   : > { %v4808_v28 = vpop.eup %4807 }
 0x605   : > { %v4810_v29 = vpop.eup %4809  ;;  %v4132_v30 = vpop.f32.mrb[180].mxu0  ;;  %v2800_v31 = vpack.c.bf16 %v4808_v28, %v4804_v26 }
 0x606   : > { %v2673_v1 = vadd.f32 %v4132_v30, %v5790_v34  ;;  %v2664_v32 = vpop.f32.mrb[181].mxu0  ;;  %v2799_v33 = vpack.c.bf16 %v4810_v29, %v4806_v27 }
 0x607   : > { %v2665_v35 = vadd.f32 %v2664_v32, %v5790_v34  ;;  %v4133_v36 = vpop.f32.mrb[182].mxu0 }
 0x608   : > { %4811 = vtanh.f32 %v2673_v1  ;;  %v2676_v37 = vadd.f32 %v4133_v36, %v5790_v34  ;;  %v2667_v38 = vpop.f32.mrb[183].mxu0  ;;  %3189 = vmatmul.mubr.bf16.gmra.mrb[232].mxu1 %v2799_v33 }
 0x609   : > { %4813 = vtanh.f32 %v2665_v35  ;;  %v2668_v39 = vadd.f32 %v2667_v38, %v5790_v34  ;;  %3198 = vmatprep.mubr.bf16.mxu1 %v5067_v0 }
 0x60a   : > { %4815 = vtanh.f32 %v2676_v37 }
 0x60b   : > { %4817 = vtanh.f32 %v2668_v39 }
 0x610   : > { %3199 = vmatmul.mubr.bf16.gmra.mrb[236].mxu1 %v2800_v31 }
 0x611   : > { %3208 = vmatprep.mubr.bf16.mxu1 %v5067_v0 }
 0x612   : > { %v4812_v43 = vpop.eup %4811 }
 0x613   : > { %v4814_v40 = vpop.eup %4813 }
 0x614   : > { %v4816_v41 = vpop.eup %4815 }
 0x615   : > { %v4818_v42 = vpop.eup %4817  ;;  %v4136_v44 = vpop.f32.mrb[184].mxu0  ;;  %v2802_v45 = vpack.c.bf16 %v4816_v41, %v4812_v43 }
 0x616   : > { %v2689_v46 = vadd.f32 %v4136_v44, %v5790_v34  ;;  %v2680_v47 = vpop.f32.mrb[185].mxu0  ;;  %v2801_v48 = vpack.c.bf16 %v4818_v42, %v4814_v40 }
 0x617   : > { %v2681_v60 = vadd.f32 %v2680_v47, %v5790_v34  ;;  %v4137_v49 = vpop.f32.mrb[186].mxu0 }
 0x618   : > { %4819 = vtanh.f32 %v2689_v46  ;;  %v2692_v50 = vadd.f32 %v4137_v49, %v5790_v34  ;;  %v2683_v51 = vpop.f32.mrb[187].mxu0  ;;  %3209 = vmatmul.mubr.bf16.gmra.mrb[240].mxu1 %v2801_v48 }
 0x619   : > { %4821 = vtanh.f32 %v2681_v60  ;;  %v2684_v52 = vadd.f32 %v2683_v51, %v5790_v34  ;;  %3218 = vmatprep.mubr.bf16.mxu1 %v5067_v0 }
 0x61a   : > { %4823 = vtanh.f32 %v2692_v50 }
 0x61b   : > { %4825 = vtanh.f32 %v2684_v52 }
 0x620   : > { %3219 = vmatmul.mubr.bf16.gmra.mrb[244].mxu1 %v2802_v45 }
 0x621   : > { %3228 = vmatprep.mubr.bf16.mxu1 %v5067_v0 }
 0x622   : > { %v4820_v54 = vpop.eup %4819 }
 0x623   : > { %v4822_v55 = vpop.eup %4821 }
 0x624   : > { %v4824_v56 = vpop.eup %4823 }
 0x625   : > { %v4826_v57 = vpop.eup %4825  ;;  %v4140_v58 = vpop.f32.mrb[188].mxu0  ;;  %v2804_v59 = vpack.c.bf16 %v4824_v56, %v4820_v54 }
 0x626   : > { %v2705_v61 = vadd.f32 %v4140_v58, %v5790_v34  ;;  %v2696_v62 = vpop.f32.mrb[189].mxu0  ;;  %v2803_v63 = vpack.c.bf16 %v4826_v57, %v4822_v55 }
 0x627   : > { %v2697_v2 = vadd.f32 %v2696_v62, %v5790_v34  ;;  %v4141_v3 = vpop.f32.mrb[190].mxu0 }
 0x628   : > { %4827 = vtanh.f32 %v2705_v61  ;;  %v2708_v53 = vadd.f32 %v4141_v3, %v5790_v34  ;;  %v2699_v4 = vpop.f32.mrb[191].mxu0  ;;  %3229 = vmatmul.mubr.bf16.gmra.mrb[248].mxu1 %v2803_v63 }
 0x629   : > { %4829 = vtanh.f32 %v2697_v2  ;;  %v2700_v6 = vadd.f32 %v2699_v4, %v5790_v34  ;;  %3238 = vmatprep.mubr.bf16.mxu1 %v5067_v0  ;;  %v5903_v34 = vrot.slane %v2824_v9, %v2832_v10 }
 0x62a   : > { %4831 = vtanh.f32 %v2708_v53 }
 0x62b   : > { %4833 = vtanh.f32 %v2700_v6 }
 0x630   : > { %3239 = vmatmul.mubr.bf16.gmra.mrb[252].mxu1 %v2804_v59 }
 0x631   : > { %3248 = vmatprep.mubr.bf16.mxu1 %v5067_v0 }
 0x632   : > { %v4828_v11 = vpop.eup %4827 }
 0x633   : > { %v4830_v12 = vpop.eup %4829 }
 0x634   : > { %v4832_v13 = vpop.eup %4831 }
 0x635   : > { %v4834_v15 = vpop.eup %4833  ;;  %v2806_v16 = vpack.c.bf16 %v4832_v13, %v4828_v11 }
 0x636   : > { %v2805_v17 = vpack.c.bf16 %v4834_v15, %v4830_v12 }
 0x637   : > { %v2950_v18 = vpop.f32.mrb[192].mxu0 }
 0x638   : > { %v2951_v19 = vadd.f32 %v2950_v18, %v5901_v14  ;;  %v2952_v20 = vpop.f32.mrb[193].mxu0  ;;  %3249 = vmatmul.mubr.bf16.gmra.mrb[0].mxu1 %v2805_v17 }
 0x639   : > { %v2953_v21 = vadd.f32 %v2952_v20, %v5903_v34  ;;  %v2954_v22 = vpop.f32.mrb[194].mxu0  ;;  %3258 = vmatprep.mubr.bf16.mxu1 %v5067_v0 }
 0x63a   : > { %3269 = vst [vmem:[%s5910_s27] sm:$0xff] %v2951_v19  ;;  %v2955_v23 = vadd.f32 %v2954_v22, %v5901_v14  ;;  %v2956_v24 = vpop.f32.mrb[195].mxu0 }
 0x63b   : > { %3270 = vst [vmem:[%s5910_s27 + $0x8] sm:$0xff] %v2953_v21  ;;  %v2957_v25 = vadd.f32 %v2956_v24, %v5903_v34 }
 0x63c   : > { %3271 = vst [vmem:[%s5910_s27 + $0x10] sm:$0xff] %v2955_v23 }
 0x63d   : > { %3272 = vst [vmem:[%s5910_s27 + $0x18] sm:$0xff] %v2957_v25 }
 0x63f   : > { %v2960_v0 = vpop.f32.mrb[196].mxu0 }
 0x640   : > { %v2961_v26 = vadd.f32 %v2960_v0, %v5901_v14  ;;  %v2962_v27 = vpop.f32.mrb[197].mxu0  ;;  %3259 = vmatmul.mubr.bf16.gmra.mrb[4].mxu1 %v2806_v16 }
 0x641   : > { %v2963_v28 = vadd.f32 %v2962_v27, %v5903_v34  ;;  %v2964_v29 = vpop.f32.mrb[198].mxu0 }
 0x642   : > { %3273 = vst [vmem:[%s5910_s27 + $0x20] sm:$0xff] %v2961_v26  ;;  %v2965_v30 = vadd.f32 %v2964_v29, %v5901_v14  ;;  %v2966_v31 = vpop.f32.mrb[199].mxu0 }
 0x643   : > { %3274 = vst [vmem:[%s5910_s27 + $0x28] sm:$0xff] %v2963_v28  ;;  %v2967_v1 = vadd.f32 %v2966_v31, %v5903_v34 }
 0x644   : > { %3275 = vst [vmem:[%s5910_s27 + $0x30] sm:$0xff] %v2965_v30 }
 0x645   : > { %3276 = vst [vmem:[%s5910_s27 + $0x38] sm:$0xff] %v2967_v1 }
 0x647   : > { %v2970_v32 = vpop.f32.mrb[200].mxu0 }
 0x648   : > { %v2971_v33 = vadd.f32 %v2970_v32, %v5901_v14  ;;  %v2972_v35 = vpop.f32.mrb[201].mxu0 }
 0x649   : > { %v2973_v36 = vadd.f32 %v2972_v35, %v5903_v34  ;;  %v2974_v37 = vpop.f32.mrb[202].mxu0 }
 0x64a   : > { %3277 = vst [vmem:[%s5910_s27 + $0x40] sm:$0xff] %v2971_v33  ;;  %v2975_v38 = vadd.f32 %v2974_v37, %v5901_v14  ;;  %v2976_v39 = vpop.f32.mrb[203].mxu0 }
 0x64b   : > { %3278 = vst [vmem:[%s5910_s27 + $0x48] sm:$0xff] %v2973_v36  ;;  %v2977_v43 = vadd.f32 %v2976_v39, %v5903_v34 }
 0x64c   : > { %3279 = vst [vmem:[%s5910_s27 + $0x50] sm:$0xff] %v2975_v38 }
 0x64d   : > { %3280 = vst [vmem:[%s5910_s27 + $0x58] sm:$0xff] %v2977_v43 }
 0x64f   : > { %v2980_v40 = vpop.f32.mrb[204].mxu0 }
 0x650   : > { %v2981_v41 = vadd.f32 %v2980_v40, %v5901_v14  ;;  %v2982_v42 = vpop.f32.mrb[205].mxu0 }
 0x651   : > { %v2983_v44 = vadd.f32 %v2982_v42, %v5903_v34  ;;  %v2984_v45 = vpop.f32.mrb[206].mxu0 }
 0x652   : > { %3281 = vst [vmem:[%s5910_s27 + $0x60] sm:$0xff] %v2981_v41  ;;  %v2985_v46 = vadd.f32 %v2984_v45, %v5901_v14  ;;  %v2986_v47 = vpop.f32.mrb[207].mxu0 }
 0x653   : > { %3282 = vst [vmem:[%s5910_s27 + $0x68] sm:$0xff] %v2983_v44  ;;  %v2987_v48 = vadd.f32 %v2986_v47, %v5903_v34 }
 0x654   : > { %3283 = vst [vmem:[%s5910_s27 + $0x70] sm:$0xff] %v2985_v46 }
 0x655   : > { %3284 = vst [vmem:[%s5910_s27 + $0x78] sm:$0xff] %v2987_v48 }
 0x657   : > { %v2990_v60 = vpop.f32.mrb[208].mxu0 }
 0x658   : > { %v2991_v49 = vadd.f32 %v2990_v60, %v5901_v14  ;;  %v2992_v50 = vpop.f32.mrb[209].mxu0 }
 0x659   : > { %v2993_v51 = vadd.f32 %v2992_v50, %v5903_v34  ;;  %v2994_v52 = vpop.f32.mrb[210].mxu0 }
 0x65a   : > { %3285 = vst [vmem:[%s5910_s27 + $0x80] sm:$0xff] %v2991_v49  ;;  %v2995_v54 = vadd.f32 %v2994_v52, %v5901_v14  ;;  %v2996_v55 = vpop.f32.mrb[211].mxu0 }
 0x65b   : > { %3286 = vst [vmem:[%s5910_s27 + $0x88] sm:$0xff] %v2993_v51  ;;  %v2997_v56 = vadd.f32 %v2996_v55, %v5903_v34 }
 0x65c   : > { %3287 = vst [vmem:[%s5910_s27 + $0x90] sm:$0xff] %v2995_v54 }
 0x65d   : > { %3288 = vst [vmem:[%s5910_s27 + $0x98] sm:$0xff] %v2997_v56 }
 0x65f   : > { %v3000_v57 = vpop.f32.mrb[212].mxu0 }
 0x660   : > { %v3001_v58 = vadd.f32 %v3000_v57, %v5901_v14  ;;  %v3002_v59 = vpop.f32.mrb[213].mxu0 }
 0x661   : > { %v3003_v61 = vadd.f32 %v3002_v59, %v5903_v34  ;;  %v3004_v62 = vpop.f32.mrb[214].mxu0 }
 0x662   : > { %3289 = vst [vmem:[%s5910_s27 + $0xa0] sm:$0xff] %v3001_v58  ;;  %v3005_v63 = vadd.f32 %v3004_v62, %v5901_v14  ;;  %v3006_v2 = vpop.f32.mrb[215].mxu0 }
 0x663   : > { %3290 = vst [vmem:[%s5910_s27 + $0xa8] sm:$0xff] %v3003_v61  ;;  %v3007_v3 = vadd.f32 %v3006_v2, %v5903_v34 }
 0x664   : > { %3291 = vst [vmem:[%s5910_s27 + $0xb0] sm:$0xff] %v3005_v63 }
 0x665   : > { %3292 = vst [vmem:[%s5910_s27 + $0xb8] sm:$0xff] %v3007_v3 }
 0x667   : > { %v3010_v53 = vpop.f32.mrb[216].mxu0 }
 0x668   : > { %v3011_v4 = vadd.f32 %v3010_v53, %v5901_v14  ;;  %v3012_v5 = vpop.f32.mrb[217].mxu0 }
 0x669   : > { %v3013_v6 = vadd.f32 %v3012_v5, %v5903_v34  ;;  %v3014_v7 = vpop.f32.mrb[218].mxu0 }
 0x66a   : > { %3293 = vst [vmem:[%s5910_s27 + $0xc0] sm:$0xff] %v3011_v4  ;;  %v3015_v8 = vadd.f32 %v3014_v7, %v5901_v14  ;;  %v3016_v9 = vpop.f32.mrb[219].mxu0 }
 0x66b   : > { %3294 = vst [vmem:[%s5910_s27 + $0xc8] sm:$0xff] %v3013_v6  ;;  %v3017_v10 = vadd.f32 %v3016_v9, %v5903_v34 }
 0x66c   : > { %3295 = vst [vmem:[%s5910_s27 + $0xd0] sm:$0xff] %v3015_v8 }
 0x66d   : > { %3296 = vst [vmem:[%s5910_s27 + $0xd8] sm:$0xff] %v3017_v10 }
 0x66f   : > { %v3020_v11 = vpop.f32.mrb[220].mxu0 }
 0x670   : > { %v3021_v12 = vadd.f32 %v3020_v11, %v5901_v14  ;;  %v3022_v13 = vpop.f32.mrb[221].mxu0 }
 0x671   : > { %v3023_v15 = vadd.f32 %v3022_v13, %v5903_v34  ;;  %v3024_v16 = vpop.f32.mrb[222].mxu0 }
 0x672   : > { %3297 = vst [vmem:[%s5910_s27 + $0xe0] sm:$0xff] %v3021_v12  ;;  %v3025_v17 = vadd.f32 %v3024_v16, %v5901_v14  ;;  %v3026_v18 = vpop.f32.mrb[223].mxu0 }
 0x673   : > { %3298 = vst [vmem:[%s5910_s27 + $0xe8] sm:$0xff] %v3023_v15  ;;  %v3027_v19 = vadd.f32 %v3026_v18, %v5903_v34 }
 0x674   : > { %3299 = vst [vmem:[%s5910_s27 + $0xf0] sm:$0xff] %v3025_v17 }
 0x675   : > { %3300 = vst [vmem:[%s5910_s27 + $0xf8] sm:$0xff] %v3027_v19 }
 0x677   : > { %v3030_v20 = vpop.f32.mrb[224].mxu0 }
 0x678   : > { %v3031_v21 = vadd.f32 %v3030_v20, %v5901_v14  ;;  %v3032_v22 = vpop.f32.mrb[225].mxu0 }
 0x679   : > { %v3033_v23 = vadd.f32 %v3032_v22, %v5903_v34  ;;  %v3034_v24 = vpop.f32.mrb[226].mxu0 }
 0x67a   : > { %3301 = vst [vmem:[%s5910_s27 + $0x100] sm:$0xff] %v3031_v21  ;;  %v3035_v25 = vadd.f32 %v3034_v24, %v5901_v14  ;;  %v3036_v0 = vpop.f32.mrb[227].mxu0 }
 0x67b   : > { %3302 = vst [vmem:[%s5910_s27 + $0x108] sm:$0xff] %v3033_v23  ;;  %v3037_v26 = vadd.f32 %v3036_v0, %v5903_v34 }
 0x67c   : > { %3303 = vst [vmem:[%s5910_s27 + $0x110] sm:$0xff] %v3035_v25 }
 0x67d   : > { %3304 = vst [vmem:[%s5910_s27 + $0x118] sm:$0xff] %v3037_v26 }
 0x67f   : > { %v3040_v27 = vpop.f32.mrb[228].mxu0 }
 0x680   : > { %v3041_v28 = vadd.f32 %v3040_v27, %v5901_v14  ;;  %v3042_v29 = vpop.f32.mrb[229].mxu0 }
 0x681   : > { %v3043_v30 = vadd.f32 %v3042_v29, %v5903_v34  ;;  %v3044_v31 = vpop.f32.mrb[230].mxu0 }
 0x682   : > { %3305 = vst [vmem:[%s5910_s27 + $0x120] sm:$0xff] %v3041_v28  ;;  %v3045_v1 = vadd.f32 %v3044_v31, %v5901_v14  ;;  %v3046_v32 = vpop.f32.mrb[231].mxu0 }
 0x683   : > { %3306 = vst [vmem:[%s5910_s27 + $0x128] sm:$0xff] %v3043_v30  ;;  %v3047_v33 = vadd.f32 %v3046_v32, %v5903_v34 }
 0x684   : > { %3307 = vst [vmem:[%s5910_s27 + $0x130] sm:$0xff] %v3045_v1 }
 0x685   : > { %3308 = vst [vmem:[%s5910_s27 + $0x138] sm:$0xff] %v3047_v33 }
 0x687   : > { %v3050_v35 = vpop.f32.mrb[232].mxu0 }
 0x688   : > { %v3051_v36 = vadd.f32 %v3050_v35, %v5901_v14  ;;  %v3052_v37 = vpop.f32.mrb[233].mxu0 }
 0x689   : > { %v3053_v38 = vadd.f32 %v3052_v37, %v5903_v34  ;;  %v3054_v39 = vpop.f32.mrb[234].mxu0 }
 0x68a   : > { %3309 = vst [vmem:[%s5910_s27 + $0x140] sm:$0xff] %v3051_v36  ;;  %v3055_v43 = vadd.f32 %v3054_v39, %v5901_v14  ;;  %v3056_v40 = vpop.f32.mrb[235].mxu0 }
 0x68b   : > { %3310 = vst [vmem:[%s5910_s27 + $0x148] sm:$0xff] %v3053_v38  ;;  %v3057_v41 = vadd.f32 %v3056_v40, %v5903_v34  ;;  %v3090_v42 = vpop.f32.mrb[192].mxu1 }
 0x68c   : > { %3311 = vst [vmem:[%s5910_s27 + $0x150] sm:$0xff] %v3055_v43  ;;  %v3091_v44 = vadd.f32 %v3090_v42, %v5901_v14  ;;  %v3092_v45 = vpop.f32.mrb[193].mxu1 }
 0x68d   : > { %3312 = vst [vmem:[%s5910_s27 + $0x158] sm:$0xff] %v3057_v41  ;;  %v3093_v46 = vadd.f32 %v3092_v45, %v5903_v34  ;;  %v3094_v47 = vpop.f32.mrb[194].mxu1 }
 0x68e   : > { %3325 = vst [vmem:[%s5910_s27 + $0x1c0] sm:$0xff] %v3091_v44  ;;  %v3095_v48 = vadd.f32 %v3094_v47, %v5901_v14  ;;  %v3096_v60 = vpop.f32.mrb[195].mxu1 }
 0x68f   : > { %3326 = vst [vmem:[%s5910_s27 + $0x1c8] sm:$0xff] %v3093_v46  ;;  %v3097_v49 = vadd.f32 %v3096_v60, %v5903_v34  ;;  %v3060_v50 = vpop.f32.mrb[236].mxu0 }
 0x690   : > { %3327 = vst [vmem:[%s5910_s27 + $0x1d0] sm:$0xff] %v3095_v48  ;;  %v3061_v51 = vadd.f32 %v3060_v50, %v5901_v14  ;;  %v3062_v52 = vpop.f32.mrb[237].mxu0 }
 0x691   : > { %3328 = vst [vmem:[%s5910_s27 + $0x1d8] sm:$0xff] %v3097_v49  ;;  %v3063_v54 = vadd.f32 %v3062_v52, %v5903_v34  ;;  %v3064_v55 = vpop.f32.mrb[238].mxu0 }
 0x692   : > { %3313 = vst [vmem:[%s5910_s27 + $0x160] sm:$0xff] %v3061_v51  ;;  %v3065_v56 = vadd.f32 %v3064_v55, %v5901_v14  ;;  %v3066_v57 = vpop.f32.mrb[239].mxu0 }
 0x693   : > { %3314 = vst [vmem:[%s5910_s27 + $0x168] sm:$0xff] %v3063_v54  ;;  %v3067_v58 = vadd.f32 %v3066_v57, %v5903_v34  ;;  %v3100_v59 = vpop.f32.mrb[196].mxu1 }
 0x694   : > { %3315 = vst [vmem:[%s5910_s27 + $0x170] sm:$0xff] %v3065_v56  ;;  %v3101_v61 = vadd.f32 %v3100_v59, %v5901_v14  ;;  %v3102_v62 = vpop.f32.mrb[197].mxu1 }
 0x695   : > { %3316 = vst [vmem:[%s5910_s27 + $0x178] sm:$0xff] %v3067_v58  ;;  %v3103_v63 = vadd.f32 %v3102_v62, %v5903_v34  ;;  %v3104_v2 = vpop.f32.mrb[198].mxu1 }
 0x696   : > { %3329 = vst [vmem:[%s5910_s27 + $0x1e0] sm:$0xff] %v3101_v61  ;;  %v3105_v3 = vadd.f32 %v3104_v2, %v5901_v14  ;;  %v3106_v53 = vpop.f32.mrb[199].mxu1 }
 0x697   : > { %3330 = vst [vmem:[%s5910_s27 + $0x1e8] sm:$0xff] %v3103_v63  ;;  %v3107_v4 = vadd.f32 %v3106_v53, %v5903_v34  ;;  %v3070_v5 = vpop.f32.mrb[240].mxu0 }
 0x698   : > { %3331 = vst [vmem:[%s5910_s27 + $0x1f0] sm:$0xff] %v3105_v3  ;;  %v3071_v6 = vadd.f32 %v3070_v5, %v5901_v14  ;;  %v3072_v7 = vpop.f32.mrb[241].mxu0 }
 0x699   : > { %3332 = vst [vmem:[%s5910_s27 + $0x1f8] sm:$0xff] %v3107_v4  ;;  %v3073_v8 = vadd.f32 %v3072_v7, %v5903_v34  ;;  %v3074_v9 = vpop.f32.mrb[242].mxu0 }
 0x69a   : > { %3317 = vst [vmem:[%s5910_s27 + $0x180] sm:$0xff] %v3071_v6  ;;  %v3075_v10 = vadd.f32 %v3074_v9, %v5901_v14  ;;  %v3076_v11 = vpop.f32.mrb[243].mxu0 }
 0x69b   : > { %3318 = vst [vmem:[%s5910_s27 + $0x188] sm:$0xff] %v3073_v8  ;;  %v3077_v12 = vadd.f32 %v3076_v11, %v5903_v34  ;;  %v3110_v13 = vpop.f32.mrb[200].mxu1 }
 0x69c   : > { %3319 = vst [vmem:[%s5910_s27 + $0x190] sm:$0xff] %v3075_v10  ;;  %v3111_v15 = vadd.f32 %v3110_v13, %v5901_v14  ;;  %v3112_v16 = vpop.f32.mrb[201].mxu1 }
 0x69d   : > { %3320 = vst [vmem:[%s5910_s27 + $0x198] sm:$0xff] %v3077_v12  ;;  %v3113_v17 = vadd.f32 %v3112_v16, %v5903_v34  ;;  %v3114_v18 = vpop.f32.mrb[202].mxu1 }
 0x69e   : > { %4962 = shalt.err (!%p4959_p4)
}
 0x69f   : > { %s4963_s7 = scalar_lea.hbm %s6030_s23, 8192  ;;  %s4967_s26 = scalar_lea.hbm %s6254_s4, 16384 }
 0x6a0   : > { %p4964_p9 = scmp.ne.s32.totalorder %s6030_s23, %s4963_s7  ;;  %p4968_p8 = scmp.lt.u32.totalorder %s6030_s23, %s6254_s4 }
 0x6a1   : > { %p4969_p13 = scmp.lt.u32.totalorder %s4967_s26, %s4963_s7  ;;  %p4971_p10 = scmp.lt.u32.totalorder %s4963_s7, %s6030_s23 }
 0x6a2   : > { %p4965_p0 = pnand %p4964_p9, %p5246_p5 }
 0x6a3   : > { %p4970_p6 = por %p4969_p13, %p4968_p8 }
 0x6a4   : > { %p4966_p11 = pneg %p4965_p0 }
 0x6a5   : > { %p4972_p3 = por %p4971_p10, %p4970_p6 }
 0x6a7   : > { %p4973_p7 = pnand %p4972_p3, %p4966_p11 }
 0x6a9   : > { %4976 = shalt.err (!%p4973_p7)
}
 0x6aa   : > { %s5069_s6 = smov 128   ;;  %s5070_s11 = smov 8   ;;  %3333 = vst [vmem:[%s5910_s27 + $0x200] sm:$0xff] %v3111_v15  ;;  %v3115_v19 = vadd.f32 %v3114_v18, %v5901_v14  ;;  %v3116_v20 = vpop.f32.mrb[203].mxu1  ;;  %3334 = vst [vmem:[%s5910_s27 + $0x208] sm:$0xff] %v3113_v17  ;;  %v3080_v22 = vpop.f32.mrb[244].mxu0 }
 0x6ab   : > { %4172 = dma.vmem_to_hbm [thread:$0]  (%p5246_p5), %s6035_s9, 8192, %s6030_s23, %s3398_s10, %s5069_s6, %s5069_s6, %s5070_s11   ;;  %v3117_v21 = vadd.f32 %v3116_v20, %v5903_v34  ;;  %v3081_v23 = vadd.f32 %v3080_v22, %v5901_v14  ;;  %v3082_v24 = vpop.f32.mrb[245].mxu0  ;;  %v3120_v29 = vpop.f32.mrb[204].mxu1 }
 0x6ac   : > { %3335 = vst [vmem:[%s5910_s27 + $0x210] sm:$0xff] %v3115_v19  ;;  %v3083_v25 = vadd.f32 %v3082_v24, %v5903_v34  ;;  %v3084_v0 = vpop.f32.mrb[246].mxu0  ;;  %v3121_v30 = vadd.f32 %v3120_v29, %v5901_v14  ;;  %v3122_v31 = vpop.f32.mrb[205].mxu1  ;;  %s3661_s23 = sshll.u32 %s5125_s22, 14  ;;  %s3433_s9 = sshll.u32 %s5910_s27, 4  ;;  %s6202_s9 = int_to_ptr.vmem [resolvable:$true] %s3433_s9 }
 0x6ad   : > { %3336 = vst [vmem:[%s5910_s27 + $0x218] sm:$0xff] %v3117_v21  ;;  %3321 = vst [vmem:[%s5910_s27 + $0x1a0] sm:$0xff] %v3081_v23  ;;  %v3085_v26 = vadd.f32 %v3084_v0, %v5901_v14  ;;  %v3086_v27 = vpop.f32.mrb[247].mxu0  ;;  %v3123_v1 = vadd.f32 %v3122_v31, %v5903_v34  ;;  %v3124_v32 = vpop.f32.mrb[206].mxu1  ;;  %s6200_s15 = scalar_lea.hbm %s6255_s5, %s3661_s23  ;;  %s3403_s22 = scalar_lea.sflag [#allocation12], %s5294_s12 }
 0x6ae   : > { %3322 = vst [vmem:[%s5910_s27 + $0x1a8] sm:$0xff] %v3083_v25  ;;  %v3087_v28 = vadd.f32 %v3086_v27, %v5903_v34  ;;  %3337 = vst [vmem:[%s5910_s27 + $0x220] sm:$0xff] %v3121_v30  ;;  %v3125_v33 = vadd.f32 %v3124_v32, %v5901_v14  ;;  %v3126_v35 = vpop.f32.mrb[207].mxu1  ;;  %s4977_s16 = scalar_lea.vmem %s6202_s9, 16384  ;;  %s5071_s7 = smov [#allocation11]  }
 0x6af   : > { %3323 = vst [vmem:[%s5910_s27 + $0x1b0] sm:$0xff] %v3085_v26  ;;  %3338 = vst [vmem:[%s5910_s27 + $0x228] sm:$0xff] %v3123_v1  ;;  %v3127_v36 = vadd.f32 %v3126_v35, %v5903_v34  ;;  %v3130_v37 = vpop.f32.mrb[208].mxu1  ;;  %p4978_p12 = scmp.ne.s32.totalorder %s6202_s9, %s4977_s16  ;;  %s4981_s8 = sshll.u32 %s5071_s7, 4  ;;  %s4982_s8 = int_to_ptr.vmem [resolvable:$false] %s4981_s8 }
 0x6b0   : > { %3324 = vst [vmem:[%s5910_s27 + $0x1b8] sm:$0xff] %v3087_v28  ;;  %3339 = vst [vmem:[%s5910_s27 + $0x230] sm:$0xff] %v3125_v33  ;;  %v3131_v38 = vadd.f32 %v3130_v37, %v5901_v14  ;;  %v3132_v39 = vpop.f32.mrb[209].mxu1  ;;  %s4983_s24 = scalar_lea.vmem %s4982_s8, 32768  ;;  %p4984_p4 = scmp.lt.s32.totalorder %s6202_s9, %s4982_s8 }
 0x6b1   : > { %3340 = vst [vmem:[%s5910_s27 + $0x238] sm:$0xff] %v3127_v36  ;;  %v3133_v43 = vadd.f32 %v3132_v39, %v5903_v34  ;;  %v3134_v40 = vpop.f32.mrb[210].mxu1  ;;  %p4979_p2 = pnand %p4978_p12, %p5246_p5  ;;  %p4985_p9 = scmp.lt.s32.totalorder %s4983_s24, %s4977_s16 }
 0x6b2   : > { %3341 = vst [vmem:[%s5910_s27 + $0x240] sm:$0xff] %v3131_v38  ;;  %v3135_v41 = vadd.f32 %v3134_v40, %v5901_v14  ;;  %v3136_v42 = vpop.f32.mrb[211].mxu1 }
 0x6b3   : > { %3342 = vst [vmem:[%s5910_s27 + $0x248] sm:$0xff] %v3133_v43  ;;  %v3137_v44 = vadd.f32 %v3136_v42, %v5903_v34  ;;  %v3140_v45 = vpop.f32.mrb[212].mxu1  ;;  %p4980_p1 = pneg %p4979_p2  ;;  %p4986_p0 = por %p4985_p9, %p4984_p4 }
 0x6b4   : > { %3343 = vst [vmem:[%s5910_s27 + $0x250] sm:$0xff] %v3135_v41  ;;  %v3141_v46 = vadd.f32 %v3140_v45, %v5901_v14  ;;  %v3142_v47 = vpop.f32.mrb[213].mxu1 }
 0x6b5   : > { %3344 = vst [vmem:[%s5910_s27 + $0x258] sm:$0xff] %v3137_v44  ;;  %v3143_v48 = vadd.f32 %v3142_v47, %v5903_v34  ;;  %v3144_v60 = vpop.f32.mrb[214].mxu1  ;;  %p4987_p11 = pnand %p4986_p0, %p4980_p1 }
 0x6b6   : > { %3345 = vst [vmem:[%s5910_s27 + $0x260] sm:$0xff] %v3141_v46  ;;  %v3145_v49 = vadd.f32 %v3144_v60, %v5901_v14  ;;  %v3146_v50 = vpop.f32.mrb[215].mxu1 }
 0x6b7   : > { %3346 = vst [vmem:[%s5910_s27 + $0x268] sm:$0xff] %v3143_v48  ;;  %v3147_v51 = vadd.f32 %v3146_v50, %v5903_v34 }
 0x6b8   : > { %3347 = vst [vmem:[%s5910_s27 + $0x270] sm:$0xff] %v3145_v49 }
 0x6b9   : > { %3348 = vst [vmem:[%s5910_s27 + $0x278] sm:$0xff] %v3147_v51 }
 0x6bb   : > { %v3150_v52 = vpop.f32.mrb[216].mxu1 }
 0x6bc   : > { %v3151_v54 = vadd.f32 %v3150_v52, %v5901_v14  ;;  %v3152_v55 = vpop.f32.mrb[217].mxu1 }
 0x6bd   : > { %v3153_v56 = vadd.f32 %v3152_v55, %v5903_v34  ;;  %v3154_v57 = vpop.f32.mrb[218].mxu1 }
 0x6be   : > { %3349 = vst [vmem:[%s5910_s27 + $0x280] sm:$0xff] %v3151_v54  ;;  %v3155_v58 = vadd.f32 %v3154_v57, %v5901_v14  ;;  %v3156_v59 = vpop.f32.mrb[219].mxu1 }
 0x6bf   : > { %3350 = vst [vmem:[%s5910_s27 + $0x288] sm:$0xff] %v3153_v56  ;;  %v3157_v61 = vadd.f32 %v3156_v59, %v5903_v34 }
 0x6c0   : > { %3351 = vst [vmem:[%s5910_s27 + $0x290] sm:$0xff] %v3155_v58 }
 0x6c1   : > { %3352 = vst [vmem:[%s5910_s27 + $0x298] sm:$0xff] %v3157_v61 }
 0x6c3   : > { %v3160_v62 = vpop.f32.mrb[220].mxu1 }
 0x6c4   : > { %v3161_v63 = vadd.f32 %v3160_v62, %v5901_v14  ;;  %v3162_v2 = vpop.f32.mrb[221].mxu1 }
 0x6c5   : > { %v3163_v3 = vadd.f32 %v3162_v2, %v5903_v34  ;;  %v3164_v53 = vpop.f32.mrb[222].mxu1 }
 0x6c6   : > { %3353 = vst [vmem:[%s5910_s27 + $0x2a0] sm:$0xff] %v3161_v63  ;;  %v3165_v4 = vadd.f32 %v3164_v53, %v5901_v14  ;;  %v3166_v5 = vpop.f32.mrb[223].mxu1 }
 0x6c7   : > { %3354 = vst [vmem:[%s5910_s27 + $0x2a8] sm:$0xff] %v3163_v3  ;;  %v3167_v6 = vadd.f32 %v3166_v5, %v5903_v34 }
 0x6c8   : > { %3355 = vst [vmem:[%s5910_s27 + $0x2b0] sm:$0xff] %v3165_v4 }
 0x6c9   : > { %3356 = vst [vmem:[%s5910_s27 + $0x2b8] sm:$0xff] %v3167_v6 }
 0x6cb   : > { %v3170_v7 = vpop.f32.mrb[224].mxu1 }
 0x6cc   : > { %v3171_v8 = vadd.f32 %v3170_v7, %v5901_v14  ;;  %v3172_v9 = vpop.f32.mrb[225].mxu1 }
 0x6cd   : > { %v3173_v10 = vadd.f32 %v3172_v9, %v5903_v34  ;;  %v3174_v11 = vpop.f32.mrb[226].mxu1 }
 0x6ce   : > { %3357 = vst [vmem:[%s5910_s27 + $0x2c0] sm:$0xff] %v3171_v8  ;;  %v3175_v12 = vadd.f32 %v3174_v11, %v5901_v14  ;;  %v3176_v13 = vpop.f32.mrb[227].mxu1 }
 0x6cf   : > { %3358 = vst [vmem:[%s5910_s27 + $0x2c8] sm:$0xff] %v3173_v10  ;;  %v3177_v15 = vadd.f32 %v3176_v13, %v5903_v34 }
 0x6d0   : > { %3359 = vst [vmem:[%s5910_s27 + $0x2d0] sm:$0xff] %v3175_v12 }
 0x6d1   : > { %3360 = vst [vmem:[%s5910_s27 + $0x2d8] sm:$0xff] %v3177_v15 }
 0x6d3   : > { %v3180_v16 = vpop.f32.mrb[228].mxu1 }
 0x6d4   : > { %v3181_v17 = vadd.f32 %v3180_v16, %v5901_v14  ;;  %v3182_v18 = vpop.f32.mrb[229].mxu1 }
 0x6d5   : > { %v3183_v19 = vadd.f32 %v3182_v18, %v5903_v34  ;;  %v3184_v20 = vpop.f32.mrb[230].mxu1 }
 0x6d6   : > { %3361 = vst [vmem:[%s5910_s27 + $0x2e0] sm:$0xff] %v3181_v17  ;;  %v3185_v21 = vadd.f32 %v3184_v20, %v5901_v14  ;;  %v3186_v22 = vpop.f32.mrb[231].mxu1 }
 0x6d7   : > { %3362 = vst [vmem:[%s5910_s27 + $0x2e8] sm:$0xff] %v3183_v19  ;;  %v3187_v23 = vadd.f32 %v3186_v22, %v5903_v34 }
 0x6d8   : > { %3363 = vst [vmem:[%s5910_s27 + $0x2f0] sm:$0xff] %v3185_v21 }
 0x6d9   : > { %3364 = vst [vmem:[%s5910_s27 + $0x2f8] sm:$0xff] %v3187_v23 }
 0x6db   : > { %v3190_v24 = vpop.f32.mrb[232].mxu1 }
 0x6dc   : > { %v3191_v25 = vadd.f32 %v3190_v24, %v5901_v14  ;;  %v3192_v0 = vpop.f32.mrb[233].mxu1 }
 0x6dd   : > { %v3193_v26 = vadd.f32 %v3192_v0, %v5903_v34  ;;  %v3194_v27 = vpop.f32.mrb[234].mxu1 }
 0x6de   : > { %3365 = vst [vmem:[%s5910_s27 + $0x300] sm:$0xff] %v3191_v25  ;;  %v3195_v28 = vadd.f32 %v3194_v27, %v5901_v14  ;;  %v3196_v29 = vpop.f32.mrb[235].mxu1 }
 0x6df   : > { %3366 = vst [vmem:[%s5910_s27 + $0x308] sm:$0xff] %v3193_v26  ;;  %v3197_v30 = vadd.f32 %v3196_v29, %v5903_v34 }
 0x6e0   : > { %3367 = vst [vmem:[%s5910_s27 + $0x310] sm:$0xff] %v3195_v28 }
 0x6e1   : > { %3368 = vst [vmem:[%s5910_s27 + $0x318] sm:$0xff] %v3197_v30 }
 0x6e3   : > { %v3200_v31 = vpop.f32.mrb[236].mxu1 }
 0x6e4   : > { %v3201_v1 = vadd.f32 %v3200_v31, %v5901_v14  ;;  %v3202_v32 = vpop.f32.mrb[237].mxu1 }
 0x6e5   : > { %v3203_v33 = vadd.f32 %v3202_v32, %v5903_v34  ;;  %v3204_v35 = vpop.f32.mrb[238].mxu1 }
 0x6e6   : > { %3369 = vst [vmem:[%s5910_s27 + $0x320] sm:$0xff] %v3201_v1  ;;  %v3205_v36 = vadd.f32 %v3204_v35, %v5901_v14  ;;  %v3206_v37 = vpop.f32.mrb[239].mxu1 }
 0x6e7   : > { %3370 = vst [vmem:[%s5910_s27 + $0x328] sm:$0xff] %v3203_v33  ;;  %v3207_v38 = vadd.f32 %v3206_v37, %v5903_v34 }
 0x6e8   : > { %3371 = vst [vmem:[%s5910_s27 + $0x330] sm:$0xff] %v3205_v36 }
 0x6e9   : > { %3372 = vst [vmem:[%s5910_s27 + $0x338] sm:$0xff] %v3207_v38 }
 0x6eb   : > { %v3210_v39 = vpop.f32.mrb[240].mxu1 }
 0x6ec   : > { %v3211_v43 = vadd.f32 %v3210_v39, %v5901_v14  ;;  %v3212_v40 = vpop.f32.mrb[241].mxu1 }
 0x6ed   : > { %v3213_v41 = vadd.f32 %v3212_v40, %v5903_v34  ;;  %v3214_v42 = vpop.f32.mrb[242].mxu1 }
 0x6ee   : > { %3373 = vst [vmem:[%s5910_s27 + $0x340] sm:$0xff] %v3211_v43  ;;  %v3215_v44 = vadd.f32 %v3214_v42, %v5901_v14  ;;  %v3216_v45 = vpop.f32.mrb[243].mxu1 }
 0x6ef   : > { %3374 = vst [vmem:[%s5910_s27 + $0x348] sm:$0xff] %v3213_v41  ;;  %v3217_v46 = vadd.f32 %v3216_v45, %v5903_v34 }
 0x6f0   : > { %3375 = vst [vmem:[%s5910_s27 + $0x350] sm:$0xff] %v3215_v44 }
 0x6f1   : > { %3376 = vst [vmem:[%s5910_s27 + $0x358] sm:$0xff] %v3217_v46 }
 0x6f3   : > { %v3220_v47 = vpop.f32.mrb[244].mxu1 }
 0x6f4   : > { %v3221_v48 = vadd.f32 %v3220_v47, %v5901_v14  ;;  %v3222_v60 = vpop.f32.mrb[245].mxu1 }
 0x6f5   : > { %v3223_v49 = vadd.f32 %v3222_v60, %v5903_v34  ;;  %v3224_v50 = vpop.f32.mrb[246].mxu1 }
 0x6f6   : > { %3377 = vst [vmem:[%s5910_s27 + $0x360] sm:$0xff] %v3221_v48  ;;  %v3225_v51 = vadd.f32 %v3224_v50, %v5901_v14  ;;  %v3226_v52 = vpop.f32.mrb[247].mxu1 }
 0x6f7   : > { %3378 = vst [vmem:[%s5910_s27 + $0x368] sm:$0xff] %v3223_v49  ;;  %v3227_v54 = vadd.f32 %v3226_v52, %v5903_v34 }
 0x6f8   : > { %3379 = vst [vmem:[%s5910_s27 + $0x370] sm:$0xff] %v3225_v51 }
 0x6f9   : > { %3380 = vst [vmem:[%s5910_s27 + $0x378] sm:$0xff] %v3227_v54 }
 0x6fb   : > { %v3230_v55 = vpop.f32.mrb[248].mxu1 }
 0x6fc   : > { %v3231_v56 = vadd.f32 %v3230_v55, %v5901_v14  ;;  %v3232_v57 = vpop.f32.mrb[249].mxu1 }
 0x6fd   : > { %v3233_v58 = vadd.f32 %v3232_v57, %v5903_v34  ;;  %v3234_v59 = vpop.f32.mrb[250].mxu1 }
 0x6fe   : > { %3381 = vst [vmem:[%s5910_s27 + $0x380] sm:$0xff] %v3231_v56  ;;  %v3235_v61 = vadd.f32 %v3234_v59, %v5901_v14  ;;  %v3236_v62 = vpop.f32.mrb[251].mxu1 }
 0x6ff   : > { %3382 = vst [vmem:[%s5910_s27 + $0x388] sm:$0xff] %v3233_v58  ;;  %v3237_v63 = vadd.f32 %v3236_v62, %v5903_v34 }
 0x700   : > { %3383 = vst [vmem:[%s5910_s27 + $0x390] sm:$0xff] %v3235_v61 }
 0x701   : > { %3384 = vst [vmem:[%s5910_s27 + $0x398] sm:$0xff] %v3237_v63 }
 0x703   : > { %v3240_v2 = vpop.f32.mrb[252].mxu1 }
 0x704   : > { %v3241_v3 = vadd.f32 %v3240_v2, %v5901_v14  ;;  %v3242_v53 = vpop.f32.mrb[253].mxu1 }
 0x705   : > { %v3243_v4 = vadd.f32 %v3242_v53, %v5903_v34  ;;  %v3244_v5 = vpop.f32.mrb[254].mxu1 }
 0x706   : > { %3385 = vst [vmem:[%s5910_s27 + $0x3a0] sm:$0xff] %v3241_v3  ;;  %v3245_v6 = vadd.f32 %v3244_v5, %v5901_v14  ;;  %v3246_v7 = vpop.f32.mrb[255].mxu1 }
 0x707   : > { %3386 = vst [vmem:[%s5910_s27 + $0x3a8] sm:$0xff] %v3243_v4  ;;  %v3247_v8 = vadd.f32 %v3246_v7, %v5903_v34 }
 0x708   : > { %3387 = vst [vmem:[%s5910_s27 + $0x3b0] sm:$0xff] %v3245_v6 }
 0x709   : > { %3388 = vst [vmem:[%s5910_s27 + $0x3b8] sm:$0xff] %v3247_v8 }
 0x70b   : > { %v3250_v9 = vpop.f32.mrb[0].mxu1 }
 0x70c   : > { %v3251_v10 = vadd.f32 %v3250_v9, %v5901_v14  ;;  %v3252_v11 = vpop.f32.mrb[1].mxu1 }
 0x70d   : > { %v3253_v12 = vadd.f32 %v3252_v11, %v5903_v34  ;;  %v3254_v13 = vpop.f32.mrb[2].mxu1 }
 0x70e   : > { %3389 = vst [vmem:[%s5910_s27 + $0x3c0] sm:$0xff] %v3251_v10  ;;  %v3255_v15 = vadd.f32 %v3254_v13, %v5901_v14  ;;  %v3256_v16 = vpop.f32.mrb[3].mxu1 }
 0x70f   : > { %3390 = vst [vmem:[%s5910_s27 + $0x3c8] sm:$0xff] %v3253_v12  ;;  %v3257_v17 = vadd.f32 %v3256_v16, %v5903_v34 }
 0x710   : > { %3391 = vst [vmem:[%s5910_s27 + $0x3d0] sm:$0xff] %v3255_v15 }
 0x711   : > { %3392 = vst [vmem:[%s5910_s27 + $0x3d8] sm:$0xff] %v3257_v17 }
 0x713   : > { %v3260_v18 = vpop.f32.mrb[4].mxu1 }
 0x714   : > { %v3261_v19 = vadd.f32 %v3260_v18, %v5901_v14  ;;  %v3262_v20 = vpop.f32.mrb[5].mxu1 }
 0x715   : > { %v3263_v21 = vadd.f32 %v3262_v20, %v5903_v34  ;;  %v3264_v22 = vpop.f32.mrb[6].mxu1 }
 0x716   : > { %3393 = vst [vmem:[%s5910_s27 + $0x3e0] sm:$0xff] %v3261_v19  ;;  %v3265_v23 = vadd.f32 %v3264_v22, %v5901_v14  ;;  %v3266_v24 = vpop.f32.mrb[7].mxu1 }
 0x717   : > { %3394 = vst [vmem:[%s5910_s27 + $0x3e8] sm:$0xff] %v3263_v21  ;;  %v3267_v25 = vadd.f32 %v3266_v24, %v5903_v34 }
 0x718   : > { %3395 = vst [vmem:[%s5910_s27 + $0x3f0] sm:$0xff] %v3265_v23 }
 0x719   : > { %3396 = vst [vmem:[%s5910_s27 + $0x3f8] sm:$0xff] %v3267_v25 }
 0x71a   : > { %4990 = shalt.err (!%p4987_p11)
}
 0x71b   : > { %s4991_s27 = scalar_lea.hbm %s6200_s15, 16384  ;;  %s4995_s28 = scalar_lea.hbm %s6255_s5, 32768 }
 0x71c   : > { %p4992_p8 = scmp.ne.s32.totalorder %s6200_s15, %s4991_s27  ;;  %p4996_p10 = scmp.lt.u32.totalorder %s6200_s15, %s6255_s5 }
 0x71d   : > { %p4997_p3 = scmp.lt.u32.totalorder %s4995_s28, %s4991_s27  ;;  %p4999_p12 = scmp.lt.u32.totalorder %s4991_s27, %s6200_s15 }
 0x71e   : > { %p4993_p13 = pnand %p4992_p8, %p5246_p5 }
 0x71f   : > { %p4998_p7 = por %p4997_p3, %p4996_p10 }
 0x720   : > { %p4994_p6 = pneg %p4993_p13 }
 0x721   : > { %p5000_p2 = por %p4999_p12, %p4998_p7 }
 0x723   : > { %p5001_p1 = pnand %p5000_p2, %p4994_p6 }
 0x725   : > { %5004 = shalt.err (!%p5001_p1)
}
 0x726   : > { %s5072_s23 = smov 256   ;;  %s5073_s10 = smov 16  }
 0x727   : > { %4173 = dma.vmem_to_hbm [thread:$0]  (%p5246_p5), %s6202_s9, 16384, %s6200_s15, %s3403_s22, %s5072_s23, %s5072_s23, %s5073_s10  }
 0x728 PF: > { %s3448_s14 = sand.u32 1, %s5043_s18   ;;  %p6273_p4 = scmp.ne.s32.totalorder %s6260_s25, 0 }
 0x729   : > { %p6274_p9 = scmp.ge.s32.totalorder %s5055_s21, 2  ;;  %s3449_s16 = scalar_lea.sflag [#allocation4], %s3448_s14 }
 0x72b   : > { %p4191_p0 = pnand %p6274_p9, %p6273_p4 }
 0x72d   : > { %5034 = dma.done.wait (!%p4191_p0), %s3449_s16, 8192  }
 0x72e   : > { %5036 = vsyncadd (!%p4191_p0), %s3449_s16, 4294959104  ;;  %s3458_s7 = scalar_lea.sflag [#allocation12], %s3448_s14 }
 0x72f   : > { %5038 = dma.done.wait (!%p4191_p0), %s3458_s7, 16384  }
 0x730   : > { %5040 = vsyncadd (!%p4191_p0), %s3458_s7, 4294950912  ;;  %p24_p5 = scmp.ge.s32.totalorder %s5214_s30, 4   ;;  %s6275_s18 = smov %s5047_s19 }
 0x731   : > { %s6276_s19 = smov %s5051_s20  ;;  %s6277_s20 = smov %s5242_s29 }
 0x732   : > { %s6278_s21 = smov %s5214_s30  ;;  %26 = sbr.rel (!%p24_p5) target bundleno = 9 (0x9), region = 111 }
 0x739   :  { %3463 = vsyncpa [#allocation3], 1 }
 0x73a   :  { %3465 = vsyncpa [#allocation3 + $0x1], 1 }
 0x73b   :  { %3466 = vsyncpa [#allocation6], 1 }
 0x73c   :  { %3467 = vsyncpa [#allocation9], 1 }
 0x73d   :  { %3468 = vsyncpa [#allocation4], 1 }
 0x73e   :  { %3470 = vsyncpa [#allocation4 + $0x1], 1 }
 0x73f   :  { %3471 = vsyncpa [#allocation12], 1 }
 0x740   :  { %3473 = vsyncpa [#allocation12 + $0x1], 1 }

</bundles_post_ra>
